<compile_context>
chip_gen: v5e
topology: v5e:2x2
jax: 0.10.0
libtpu: 0.0.40
codegen_flags: <defaults>
</compile_context>

<pallas_src>
import functools

import jax
import jax.numpy as jnp
from jax.experimental import pallas as pl
from jax.experimental.pallas import tpu as pltpu


# Static per-layer config: (H, W, Cin, Cout) for each conv stage (input 16x16x1).
_LAYER_DIMS = ((16, 16, 1, 64), (8, 8, 64, 32), (4, 4, 32, 16), (2, 2, 16, 8))


def _silu(x):
    # x * sigmoid(x). exp and approx-reciprocal both go to the EUP slot.
    return x * pl.reciprocal(1.0 + jnp.exp(-x), approx=True)


def _stage(act, pad_ref, w_ref, b_ref, H, W, Cin, Cout):
    """conv3x3(pad=1) -> SiLU -> maxpool(2,2) on a VMEM-resident activation."""
    Hh, Wh = H // 2, W // 2

    # Zero-padded copy of the activation, kept in VMEM scratch.
    pad_ref[...] = jnp.zeros_like(pad_ref)
    pad_ref[1:H + 1, 1:W + 1, :] = act

    # Conv as 9 shifted-tap matmuls accumulated in f32 (bf16 MXU operands).
    acc = jnp.zeros((H * W, Cout), jnp.float32)
    for dh in range(3):
        for dw in range(3):
            t = dh * 3 + dw
            tap = pad_ref[dh:dh + H, dw:dw + W, :].reshape(H * W, Cin)
            if Cin == 1:
                # Degenerate K=1 contraction: do it as a VPU broadcast-multiply.
                acc = acc + tap * w_ref[t:t + 1, :].astype(jnp.float32)
            else:
                acc = acc + jnp.dot(tap.astype(jnp.bfloat16),
                                    w_ref[t * Cin:(t + 1) * Cin, :],
                                    preferred_element_type=jnp.float32)
    acc = acc + b_ref[...]

    # SiLU BEFORE pooling (SiLU is non-monotonic; order matters).
    y = _silu(acc)                                        # (H*W, Cout)

    # 2x2 max-pool via lane-preserving reshapes + elementwise max.
    yw = y.reshape(H * Wh, 2, Cout)
    m1 = jnp.maximum(yw[:, 0, :], yw[:, 1, :])            # pooled along W
    yh = m1.reshape(Hh, 2, Wh, Cout)
    return jnp.maximum(yh[:, 0, :, :], yh[:, 1, :, :])    # (Hh, Wh, Cout)


def _encoder_kernel(x_ref, *refs, dims):
    n_layers = len(dims)
    w_refs = refs[0:2 * n_layers:2]
    b_refs = refs[1:2 * n_layers:2]
    o_ref = refs[2 * n_layers]
    pad_refs = refs[2 * n_layers + 1:]

    act = x_ref[...]                                      # (16, 16, 1) f32
    for i, (H, W, Cin, Cout) in enumerate(dims):
        act = _stage(act, pad_refs[i], w_refs[i], b_refs[i], H, W, Cin, Cout)

    # Only the final (1, Cout_last) tile ever leaves VMEM.
    o_ref[...] = act.reshape(1, dims[-1][3]).astype(o_ref.dtype)


@jax.jit
def encoder_forward(x_nchw, params):
    """Full Encoder forward (NCHW in / NCHW out), fused into one Pallas kernel."""
    N = x_nchw.shape[0]
    H0, W0, C0, _ = _LAYER_DIMS[0]
    assert x_nchw.shape[1:] == (C0, H0, W0), x_nchw.shape

    x = jnp.transpose(x_nchw, (0, 2, 3, 1)).astype(jnp.float32)   # NCHW -> NHWC

    flat_args = [x]
    in_specs = [pl.BlockSpec((None, H0, W0, C0), lambda n: (n, 0, 0, 0))]
    for (w_hwio, b), (_, _, cin, cout) in zip(params, _LAYER_DIMS):
        k = 9 * cin
        # (dh, dw, ci) -> rows of (K, Cout); matches in-kernel tap order.
        flat_args.append(w_hwio.reshape(k, cout).astype(jnp.bfloat16))
        flat_args.append(b.reshape(1, cout).astype(jnp.float32))
        in_specs.append(pl.BlockSpec((k, cout), lambda n: (0, 0)))
        in_specs.append(pl.BlockSpec((1, cout), lambda n: (0, 0)))

    cout_last = _LAYER_DIMS[-1][3]
    scratch_shapes = [pltpu.VMEM((h + 2, w + 2, cin), jnp.float32)
                      for (h, w, cin, _) in _LAYER_DIMS]

    out = pl.pallas_call(
        functools.partial(_encoder_kernel, dims=_LAYER_DIMS),
        out_shape=jax.ShapeDtypeStruct((N, 1, cout_last), jnp.float32),
        grid=(N,),
        in_specs=in_specs,
        out_specs=pl.BlockSpec((None, 1, cout_last), lambda n: (n, 0, 0)),
        scratch_shapes=scratch_shapes,
        compiler_params=pltpu.CompilerParams(
            dimension_semantics=("parallel",)),
    )(*flat_args)

    # (N, 1, 8) -> (N, 8, 1, 1) to match the PyTorch module's NCHW output.
    return jnp.transpose(out.reshape(N, 1, 1, cout_last), (0, 3, 1, 2))


def reference_forward(x_nchw, params):
    """Pure-JAX (f32) reference: conv3x3 pad=1 -> SiLU -> maxpool 2x2, x4."""
    x = x_nchw
    for (w_hwio, b) in params:
        w_oihw = jnp.transpose(w_hwio, (3, 2, 0, 1))
        y = jax.lax.conv_general_dilated(
            x, w_oihw, window_strides=(1, 1), padding=((1, 1), (1, 1)),
            dimension_numbers=("NCHW", "OIHW", "NCHW"))
        y = y + b[None, :, None, None]
        y = y * jax.nn.sigmoid(y)
        y = jax.lax.reduce_window(y, -jnp.inf, jax.lax.max,
                                  (1, 1, 2, 2), (1, 1, 2, 2), "VALID")
        x = y
    return x


def init_params(key):
    chans = [1, 64, 32, 16, 8]
    params = []
    for i in range(4):
        key, kw, kb = jax.random.split(key, 3)
        cin, cout = chans[i], chans[i + 1]
        w = jax.random.normal(kw, (3, 3, cin, cout), jnp.float32) * 0.1
        b = jax.random.normal(kb, (cout,), jnp.float32) * 0.1
        params.append((w, b))
    return params


if __name__ == "__main__":
    key = jax.random.PRNGKey(0)
    key, kx = jax.random.split(key)
    # batch=2, 1 input channel, 16x16 image (4 pool stages -> 1x1 spatial).
    x = jax.random.normal(kx, (2, 1, 16, 16), jnp.float32)
    params = init_params(key)

    out = jax.block_until_ready(encoder_forward(x, params))
    ref = reference_forward(x, params)

    assert out.shape == (2, 8, 1, 1), out.shape
    # Kernel uses bf16 MXU operands + approx reciprocal -> looser tolerance than f32.
    assert bool(jnp.allclose(out, ref, rtol=2e-2, atol=2e-2)), "mismatch vs reference"

    print("KERNEL_OK")
</pallas_src>

<mosaic_0001>
module attributes {stable_mosaic.version = 11 : i64} {
  func.func @_encoder_kernel(%arg0: i32, %arg1: memref<1x16x16x1xf32, #tpu.memory_space<vmem>>, %arg2: memref<9x64xbf16, #tpu.memory_space<vmem>>, %arg3: memref<1x64xf32, #tpu.memory_space<vmem>>, %arg4: memref<576x32xbf16, #tpu.memory_space<vmem>>, %arg5: memref<1x32xf32, #tpu.memory_space<vmem>>, %arg6: memref<288x16xbf16, #tpu.memory_space<vmem>>, %arg7: memref<1x16xf32, #tpu.memory_space<vmem>>, %arg8: memref<144x8xbf16, #tpu.memory_space<vmem>>, %arg9: memref<1x8xf32, #tpu.memory_space<vmem>>, %arg10: memref<1x1x8xf32, #tpu.memory_space<vmem>>, %arg11: memref<18x18x1xf32, #tpu.memory_space<vmem>>, %arg12: memref<10x10x64xf32, #tpu.memory_space<vmem>>, %arg13: memref<6x6x32xf32, #tpu.memory_space<vmem>>, %arg14: memref<4x4x16xf32, #tpu.memory_space<vmem>>) attributes {dimension_semantics = [#tpu.dimension_semantics<parallel>], iteration_bounds = array<i64: 2>, scalar_prefetch = 0 : i64, scratch_operands = 4 : i64, tpu.core_type = #tpu.core_type<tc>, window_params = [{transform_indices = @transform_0, window_bounds = array<i64: 1, 16, 16, 1>}, {pipeline_mode = #tpu.pipeline_mode<synchronous>, transform_indices = @transform_1, window_bounds = array<i64: 9, 64>}, {pipeline_mode = #tpu.pipeline_mode<synchronous>, transform_indices = @transform_2, window_bounds = array<i64: 1, 64>}, {pipeline_mode = #tpu.pipeline_mode<synchronous>, transform_indices = @transform_3, window_bounds = array<i64: 576, 32>}, {pipeline_mode = #tpu.pipeline_mode<synchronous>, transform_indices = @transform_4, window_bounds = array<i64: 1, 32>}, {pipeline_mode = #tpu.pipeline_mode<synchronous>, transform_indices = @transform_5, window_bounds = array<i64: 288, 16>}, {pipeline_mode = #tpu.pipeline_mode<synchronous>, transform_indices = @transform_6, window_bounds = array<i64: 1, 16>}, {pipeline_mode = #tpu.pipeline_mode<synchronous>, transform_indices = @transform_7, window_bounds = array<i64: 144, 8>}, {pipeline_mode = #tpu.pipeline_mode<synchronous>, transform_indices = @transform_8, window_bounds = array<i64: 1, 8>}, {transform_indices = @transform_9, window_bounds = array<i64: 1, 1, 8>}]} {
    %c0 = arith.constant 0 : index
    %c0_0 = arith.constant 0 : index
    %c0_1 = arith.constant 0 : index
    %c0_2 = arith.constant 0 : index
    %0 = vector.load %arg1[%c0, %c0_0, %c0_1, %c0_2] : memref<1x16x16x1xf32, #tpu.memory_space<vmem>>, vector<1x16x16x1xf32>
    %1 = vector.shape_cast %0 : vector<1x16x16x1xf32> to vector<16x16x1xf32>
    %cst = arith.constant 0.000000e+00 : f32
    %2 = vector.broadcast %cst : f32 to vector<18x18x1xf32>
    %c0_3 = arith.constant 0 : index
    %c0_4 = arith.constant 0 : index
    %c0_5 = arith.constant 0 : index
    %3 = vector.load %arg11[%c0_3, %c0_4, %c0_5] : memref<18x18x1xf32, #tpu.memory_space<vmem>>, vector<18x18x1xf32>
    tpu.vector_store %arg11[%c0_3, %c0_4, %c0_5], %2 {strides = array<i32>} : memref<18x18x1xf32, #tpu.memory_space<vmem>>, vector<18x18x1xf32>,
    %c1 = arith.constant 1 : index
    %c1_6 = arith.constant 1 : index
    %c0_7 = arith.constant 0 : index
    %4 = vector.load %arg11[%c1, %c1_6, %c0_7] : memref<18x18x1xf32, #tpu.memory_space<vmem>>, vector<16x16x1xf32>
    tpu.vector_store %arg11[%c1, %c1_6, %c0_7], %1 {strides = array<i32>} : memref<18x18x1xf32, #tpu.memory_space<vmem>>, vector<16x16x1xf32>,
    %cst_8 = arith.constant 0.000000e+00 : f32
    %5 = vector.broadcast %cst_8 : f32 to vector<256x64xf32>
    %c0_9 = arith.constant 0 : index
    %c0_10 = arith.constant 0 : index
    %c0_11 = arith.constant 0 : index
    %6 = vector.load %arg11[%c0_9, %c0_10, %c0_11] : memref<18x18x1xf32, #tpu.memory_space<vmem>>, vector<16x16x1xf32>
    %7 = vector.shape_cast %6 : vector<16x16x1xf32> to vector<256x1xf32>
    %c0_12 = arith.constant 0 : index
    %c0_13 = arith.constant 0 : index
    %8 = vector.load %arg2[%c0_12, %c0_13] : memref<9x64xbf16, #tpu.memory_space<vmem>>, vector<1x64xbf16>
    %9 = arith.extf %8 : vector<1x64xbf16> to vector<1x64xf32>
    %10 = vector.broadcast %7 : vector<256x1xf32> to vector<256x64xf32>
    %11 = vector.broadcast %9 : vector<1x64xf32> to vector<256x64xf32>
    %12 = arith.mulf %10, %11 : vector<256x64xf32>
    %13 = arith.addf %5, %12 : vector<256x64xf32>
    %c0_14 = arith.constant 0 : index
    %c1_15 = arith.constant 1 : index
    %c0_16 = arith.constant 0 : index
    %14 = vector.load %arg11[%c0_14, %c1_15, %c0_16] : memref<18x18x1xf32, #tpu.memory_space<vmem>>, vector<16x16x1xf32>
    %15 = vector.shape_cast %14 : vector<16x16x1xf32> to vector<256x1xf32>
    %c1_17 = arith.constant 1 : index
    %c0_18 = arith.constant 0 : index
    %16 = vector.load %arg2[%c1_17, %c0_18] : memref<9x64xbf16, #tpu.memory_space<vmem>>, vector<1x64xbf16>
    %17 = arith.extf %16 : vector<1x64xbf16> to vector<1x64xf32>
    %18 = vector.broadcast %15 : vector<256x1xf32> to vector<256x64xf32>
    %19 = vector.broadcast %17 : vector<1x64xf32> to vector<256x64xf32>
    %20 = arith.mulf %18, %19 : vector<256x64xf32>
    %21 = arith.addf %13, %20 : vector<256x64xf32>
    %c0_19 = arith.constant 0 : index
    %c2 = arith.constant 2 : index
    %c0_20 = arith.constant 0 : index
    %22 = vector.load %arg11[%c0_19, %c2, %c0_20] : memref<18x18x1xf32, #tpu.memory_space<vmem>>, vector<16x16x1xf32>
    %23 = vector.shape_cast %22 : vector<16x16x1xf32> to vector<256x1xf32>
    %c2_21 = arith.constant 2 : index
    %c0_22 = arith.constant 0 : index
    %24 = vector.load %arg2[%c2_21, %c0_22] : memref<9x64xbf16, #tpu.memory_space<vmem>>, vector<1x64xbf16>
    %25 = arith.extf %24 : vector<1x64xbf16> to vector<1x64xf32>
    %26 = vector.broadcast %23 : vector<256x1xf32> to vector<256x64xf32>
    %27 = vector.broadcast %25 : vector<1x64xf32> to vector<256x64xf32>
    %28 = arith.mulf %26, %27 : vector<256x64xf32>
    %29 = arith.addf %21, %28 : vector<256x64xf32>
    %c1_23 = arith.constant 1 : index
    %c0_24 = arith.constant 0 : index
    %c0_25 = arith.constant 0 : index
    %30 = vector.load %arg11[%c1_23, %c0_24, %c0_25] : memref<18x18x1xf32, #tpu.memory_space<vmem>>, vector<16x16x1xf32>
    %31 = vector.shape_cast %30 : vector<16x16x1xf32> to vector<256x1xf32>
    %c3 = arith.constant 3 : index
    %c0_26 = arith.constant 0 : index
    %32 = vector.load %arg2[%c3, %c0_26] : memref<9x64xbf16, #tpu.memory_space<vmem>>, vector<1x64xbf16>
    %33 = arith.extf %32 : vector<1x64xbf16> to vector<1x64xf32>
    %34 = vector.broadcast %31 : vector<256x1xf32> to vector<256x64xf32>
    %35 = vector.broadcast %33 : vector<1x64xf32> to vector<256x64xf32>
    %36 = arith.mulf %34, %35 : vector<256x64xf32>
    %37 = arith.addf %29, %36 : vector<256x64xf32>
    %c1_27 = arith.constant 1 : index
    %c1_28 = arith.constant 1 : index
    %c0_29 = arith.constant 0 : index
    %38 = vector.load %arg11[%c1_27, %c1_28, %c0_29] : memref<18x18x1xf32, #tpu.memory_space<vmem>>, vector<16x16x1xf32>
    %39 = vector.shape_cast %38 : vector<16x16x1xf32> to vector<256x1xf32>
    %c4 = arith.constant 4 : index
    %c0_30 = arith.constant 0 : index
    %40 = vector.load %arg2[%c4, %c0_30] : memref<9x64xbf16, #tpu.memory_space<vmem>>, vector<1x64xbf16>
    %41 = arith.extf %40 : vector<1x64xbf16> to vector<1x64xf32>
    %42 = vector.broadcast %39 : vector<256x1xf32> to vector<256x64xf32>
    %43 = vector.broadcast %41 : vector<1x64xf32> to vector<256x64xf32>
    %44 = arith.mulf %42, %43 : vector<256x64xf32>
    %45 = arith.addf %37, %44 : vector<256x64xf32>
    %c1_31 = arith.constant 1 : index
    %c2_32 = arith.constant 2 : index
    %c0_33 = arith.constant 0 : index
    %46 = vector.load %arg11[%c1_31, %c2_32, %c0_33] : memref<18x18x1xf32, #tpu.memory_space<vmem>>, vector<16x16x1xf32>
    %47 = vector.shape_cast %46 : vector<16x16x1xf32> to vector<256x1xf32>
    %c5 = arith.constant 5 : index
    %c0_34 = arith.constant 0 : index
    %48 = vector.load %arg2[%c5, %c0_34] : memref<9x64xbf16, #tpu.memory_space<vmem>>, vector<1x64xbf16>
    %49 = arith.extf %48 : vector<1x64xbf16> to vector<1x64xf32>
    %50 = vector.broadcast %47 : vector<256x1xf32> to vector<256x64xf32>
    %51 = vector.broadcast %49 : vector<1x64xf32> to vector<256x64xf32>
    %52 = arith.mulf %50, %51 : vector<256x64xf32>
    %53 = arith.addf %45, %52 : vector<256x64xf32>
    %c2_35 = arith.constant 2 : index
    %c0_36 = arith.constant 0 : index
    %c0_37 = arith.constant 0 : index
    %54 = vector.load %arg11[%c2_35, %c0_36, %c0_37] : memref<18x18x1xf32, #tpu.memory_space<vmem>>, vector<16x16x1xf32>
    %55 = vector.shape_cast %54 : vector<16x16x1xf32> to vector<256x1xf32>
    %c6 = arith.constant 6 : index
    %c0_38 = arith.constant 0 : index
    %56 = vector.load %arg2[%c6, %c0_38] : memref<9x64xbf16, #tpu.memory_space<vmem>>, vector<1x64xbf16>
    %57 = arith.extf %56 : vector<1x64xbf16> to vector<1x64xf32>
    %58 = vector.broadcast %55 : vector<256x1xf32> to vector<256x64xf32>
    %59 = vector.broadcast %57 : vector<1x64xf32> to vector<256x64xf32>
    %60 = arith.mulf %58, %59 : vector<256x64xf32>
    %61 = arith.addf %53, %60 : vector<256x64xf32>
    %c2_39 = arith.constant 2 : index
    %c1_40 = arith.constant 1 : index
    %c0_41 = arith.constant 0 : index
    %62 = vector.load %arg11[%c2_39, %c1_40, %c0_41] : memref<18x18x1xf32, #tpu.memory_space<vmem>>, vector<16x16x1xf32>
    %63 = vector.shape_cast %62 : vector<16x16x1xf32> to vector<256x1xf32>
    %c7 = arith.constant 7 : index
    %c0_42 = arith.constant 0 : index
    %64 = vector.load %arg2[%c7, %c0_42] : memref<9x64xbf16, #tpu.memory_space<vmem>>, vector<1x64xbf16>
    %65 = arith.extf %64 : vector<1x64xbf16> to vector<1x64xf32>
    %66 = vector.broadcast %63 : vector<256x1xf32> to vector<256x64xf32>
    %67 = vector.broadcast %65 : vector<1x64xf32> to vector<256x64xf32>
    %68 = arith.mulf %66, %67 : vector<256x64xf32>
    %69 = arith.addf %61, %68 : vector<256x64xf32>
    %c2_43 = arith.constant 2 : index
    %c2_44 = arith.constant 2 : index
    %c0_45 = arith.constant 0 : index
    %70 = vector.load %arg11[%c2_43, %c2_44, %c0_45] : memref<18x18x1xf32, #tpu.memory_space<vmem>>, vector<16x16x1xf32>
    %71 = vector.shape_cast %70 : vector<16x16x1xf32> to vector<256x1xf32>
    %c8 = arith.constant 8 : index
    %c0_46 = arith.constant 0 : index
    %72 = vector.load %arg2[%c8, %c0_46] : memref<9x64xbf16, #tpu.memory_space<vmem>>, vector<1x64xbf16>
    %73 = arith.extf %72 : vector<1x64xbf16> to vector<1x64xf32>
    %74 = vector.broadcast %71 : vector<256x1xf32> to vector<256x64xf32>
    %75 = vector.broadcast %73 : vector<1x64xf32> to vector<256x64xf32>
    %76 = arith.mulf %74, %75 : vector<256x64xf32>
    %77 = arith.addf %69, %76 : vector<256x64xf32>
    %c0_47 = arith.constant 0 : index
    %c0_48 = arith.constant 0 : index
    %78 = vector.load %arg3[%c0_47, %c0_48] : memref<1x64xf32, #tpu.memory_space<vmem>>, vector<1x64xf32>
    %79 = vector.broadcast %78 : vector<1x64xf32> to vector<256x64xf32>
    %80 = arith.addf %77, %79 : vector<256x64xf32>
    %cst_49 = arith.constant 0.000000e+00 : f32
    %81 = vector.broadcast %cst_49 : f32 to vector<256x64xf32>
    %82 = arith.subf %81, %80 : vector<256x64xf32>
    %83 = math.exp %82 : vector<256x64xf32>
    %cst_50 = arith.constant 1.000000e+00 : f32
    %84 = vector.broadcast %cst_50 : f32 to vector<256x64xf32>
    %85 = arith.addf %84, %83 : vector<256x64xf32>
    %86 = tpu.reciprocal %85 {approx = true} : vector<256x64xf32> -> vector<256x64xf32>
    %87 = arith.mulf %80, %86 : vector<256x64xf32>
    %88 = vector.shape_cast %87 : vector<256x64xf32> to vector<128x2x64xf32>
    %89 = vector.extract_strided_slice %88 {offsets = [0, 0, 0], sizes = [128, 1, 64], strides = [1, 1, 1]} : vector<128x2x64xf32> to vector<128x1x64xf32>
    %90 = vector.shape_cast %89 : vector<128x1x64xf32> to vector<128x64xf32>
    %91 = vector.extract_strided_slice %88 {offsets = [0, 1, 0], sizes = [128, 1, 64], strides = [1, 1, 1]} : vector<128x2x64xf32> to vector<128x1x64xf32>
    %92 = vector.shape_cast %91 : vector<128x1x64xf32> to vector<128x64xf32>
    %93 = arith.maximumf %90, %92 : vector<128x64xf32>
    %94 = vector.shape_cast %93 : vector<128x64xf32> to vector<8x2x8x64xf32>
    %95 = vector.extract_strided_slice %94 {offsets = [0, 0, 0, 0], sizes = [8, 1, 8, 64], strides = [1, 1, 1, 1]} : vector<8x2x8x64xf32> to vector<8x1x8x64xf32>
    %96 = vector.shape_cast %95 : vector<8x1x8x64xf32> to vector<8x8x64xf32>
    %97 = vector.extract_strided_slice %94 {offsets = [0, 1, 0, 0], sizes = [8, 1, 8, 64], strides = [1, 1, 1, 1]} : vector<8x2x8x64xf32> to vector<8x1x8x64xf32>
    %98 = vector.shape_cast %97 : vector<8x1x8x64xf32> to vector<8x8x64xf32>
    %99 = arith.maximumf %96, %98 : vector<8x8x64xf32>
    %cst_51 = arith.constant 0.000000e+00 : f32
    %100 = vector.broadcast %cst_51 : f32 to vector<10x10x64xf32>
    %c0_52 = arith.constant 0 : index
    %c0_53 = arith.constant 0 : index
    %c0_54 = arith.constant 0 : index
    %101 = vector.load %arg12[%c0_52, %c0_53, %c0_54] : memref<10x10x64xf32, #tpu.memory_space<vmem>>, vector<10x10x64xf32>
    tpu.vector_store %arg12[%c0_52, %c0_53, %c0_54], %100 {strides = array<i32>} : memref<10x10x64xf32, #tpu.memory_space<vmem>>, vector<10x10x64xf32>,
    %c1_55 = arith.constant 1 : index
    %c1_56 = arith.constant 1 : index
    %c0_57 = arith.constant 0 : index
    %102 = vector.load %arg12[%c1_55, %c1_56, %c0_57] : memref<10x10x64xf32, #tpu.memory_space<vmem>>, vector<8x8x64xf32>
    tpu.vector_store %arg12[%c1_55, %c1_56, %c0_57], %99 {strides = array<i32>} : memref<10x10x64xf32, #tpu.memory_space<vmem>>, vector<8x8x64xf32>,
    %cst_58 = arith.constant 0.000000e+00 : f32
    %103 = vector.broadcast %cst_58 : f32 to vector<64x32xf32>
    %c0_59 = arith.constant 0 : index
    %c0_60 = arith.constant 0 : index
    %c0_61 = arith.constant 0 : index
    %104 = vector.load %arg12[%c0_59, %c0_60, %c0_61] : memref<10x10x64xf32, #tpu.memory_space<vmem>>, vector<8x8x64xf32>
    %105 = vector.shape_cast %104 : vector<8x8x64xf32> to vector<64x64xf32>
    %106 = arith.truncf %105 : vector<64x64xf32> to vector<64x64xbf16>
    %c0_62 = arith.constant 0 : index
    %c0_63 = arith.constant 0 : index
    %107 = vector.load %arg4[%c0_62, %c0_63] : memref<576x32xbf16, #tpu.memory_space<vmem>>, vector<64x32xbf16>
    %cst_64 = arith.constant dense<0.000000e+00> : vector<64x32xf32>
    %108 = tpu.matmul %106, %107, %cst_64 {dimension_numbers = #tpu.dot_dimension_numbers<[1], [0], [0], [1], [0, 0, 1, 1], [], []>} : vector<64x64xbf16>, vector<64x32xbf16>, vector<64x32xf32> -> vector<64x32xf32>
    %109 = arith.addf %103, %108 : vector<64x32xf32>
    %c0_65 = arith.constant 0 : index
    %c1_66 = arith.constant 1 : index
    %c0_67 = arith.constant 0 : index
    %110 = vector.load %arg12[%c0_65, %c1_66, %c0_67] : memref<10x10x64xf32, #tpu.memory_space<vmem>>, vector<8x8x64xf32>
    %111 = vector.shape_cast %110 : vector<8x8x64xf32> to vector<64x64xf32>
    %112 = arith.truncf %111 : vector<64x64xf32> to vector<64x64xbf16>
    %c64 = arith.constant 64 : index
    %c0_68 = arith.constant 0 : index
    %113 = vector.load %arg4[%c64, %c0_68] : memref<576x32xbf16, #tpu.memory_space<vmem>>, vector<64x32xbf16>
    %cst_69 = arith.constant dense<0.000000e+00> : vector<64x32xf32>
    %114 = tpu.matmul %112, %113, %cst_69 {dimension_numbers = #tpu.dot_dimension_numbers<[1], [0], [0], [1], [0, 0, 1, 1], [], []>} : vector<64x64xbf16>, vector<64x32xbf16>, vector<64x32xf32> -> vector<64x32xf32>
    %115 = arith.addf %109, %114 : vector<64x32xf32>
    %c0_70 = arith.constant 0 : index
    %c2_71 = arith.constant 2 : index
    %c0_72 = arith.constant 0 : index
    %116 = vector.load %arg12[%c0_70, %c2_71, %c0_72] : memref<10x10x64xf32, #tpu.memory_space<vmem>>, vector<8x8x64xf32>
    %117 = vector.shape_cast %116 : vector<8x8x64xf32> to vector<64x64xf32>
    %118 = arith.truncf %117 : vector<64x64xf32> to vector<64x64xbf16>
    %c128 = arith.constant 128 : index
    %c0_73 = arith.constant 0 : index
    %119 = vector.load %arg4[%c128, %c0_73] : memref<576x32xbf16, #tpu.memory_space<vmem>>, vector<64x32xbf16>
    %cst_74 = arith.constant dense<0.000000e+00> : vector<64x32xf32>
    %120 = tpu.matmul %118, %119, %cst_74 {dimension_numbers = #tpu.dot_dimension_numbers<[1], [0], [0], [1], [0, 0, 1, 1], [], []>} : vector<64x64xbf16>, vector<64x32xbf16>, vector<64x32xf32> -> vector<64x32xf32>
    %121 = arith.addf %115, %120 : vector<64x32xf32>
    %c1_75 = arith.constant 1 : index
    %c0_76 = arith.constant 0 : index
    %c0_77 = arith.constant 0 : index
    %122 = vector.load %arg12[%c1_75, %c0_76, %c0_77] : memref<10x10x64xf32, #tpu.memory_space<vmem>>, vector<8x8x64xf32>
    %123 = vector.shape_cast %122 : vector<8x8x64xf32> to vector<64x64xf32>
    %124 = arith.truncf %123 : vector<64x64xf32> to vector<64x64xbf16>
    %c192 = arith.constant 192 : index
    %c0_78 = arith.constant 0 : index
    %125 = vector.load %arg4[%c192, %c0_78] : memref<576x32xbf16, #tpu.memory_space<vmem>>, vector<64x32xbf16>
    %cst_79 = arith.constant dense<0.000000e+00> : vector<64x32xf32>
    %126 = tpu.matmul %124, %125, %cst_79 {dimension_numbers = #tpu.dot_dimension_numbers<[1], [0], [0], [1], [0, 0, 1, 1], [], []>} : vector<64x64xbf16>, vector<64x32xbf16>, vector<64x32xf32> -> vector<64x32xf32>
    %127 = arith.addf %121, %126 : vector<64x32xf32>
    %c1_80 = arith.constant 1 : index
    %c1_81 = arith.constant 1 : index
    %c0_82 = arith.constant 0 : index
    %128 = vector.load %arg12[%c1_80, %c1_81, %c0_82] : memref<10x10x64xf32, #tpu.memory_space<vmem>>, vector<8x8x64xf32>
    %129 = vector.shape_cast %128 : vector<8x8x64xf32> to vector<64x64xf32>
    %130 = arith.truncf %129 : vector<64x64xf32> to vector<64x64xbf16>
    %c256 = arith.constant 256 : index
    %c0_83 = arith.constant 0 : index
    %131 = vector.load %arg4[%c256, %c0_83] : memref<576x32xbf16, #tpu.memory_space<vmem>>, vector<64x32xbf16>
    %cst_84 = arith.constant dense<0.000000e+00> : vector<64x32xf32>
    %132 = tpu.matmul %130, %131, %cst_84 {dimension_numbers = #tpu.dot_dimension_numbers<[1], [0], [0], [1], [0, 0, 1, 1], [], []>} : vector<64x64xbf16>, vector<64x32xbf16>, vector<64x32xf32> -> vector<64x32xf32>
    %133 = arith.addf %127, %132 : vector<64x32xf32>
    %c1_85 = arith.constant 1 : index
    %c2_86 = arith.constant 2 : index
    %c0_87 = arith.constant 0 : index
    %134 = vector.load %arg12[%c1_85, %c2_86, %c0_87] : memref<10x10x64xf32, #tpu.memory_space<vmem>>, vector<8x8x64xf32>
    %135 = vector.shape_cast %134 : vector<8x8x64xf32> to vector<64x64xf32>
    %136 = arith.truncf %135 : vector<64x64xf32> to vector<64x64xbf16>
    %c320 = arith.constant 320 : index
    %c0_88 = arith.constant 0 : index
    %137 = vector.load %arg4[%c320, %c0_88] : memref<576x32xbf16, #tpu.memory_space<vmem>>, vector<64x32xbf16>
    %cst_89 = arith.constant dense<0.000000e+00> : vector<64x32xf32>
    %138 = tpu.matmul %136, %137, %cst_89 {dimension_numbers = #tpu.dot_dimension_numbers<[1], [0], [0], [1], [0, 0, 1, 1], [], []>} : vector<64x64xbf16>, vector<64x32xbf16>, vector<64x32xf32> -> vector<64x32xf32>
    %139 = arith.addf %133, %138 : vector<64x32xf32>
    %c2_90 = arith.constant 2 : index
    %c0_91 = arith.constant 0 : index
    %c0_92 = arith.constant 0 : index
    %140 = vector.load %arg12[%c2_90, %c0_91, %c0_92] : memref<10x10x64xf32, #tpu.memory_space<vmem>>, vector<8x8x64xf32>
    %141 = vector.shape_cast %140 : vector<8x8x64xf32> to vector<64x64xf32>
    %142 = arith.truncf %141 : vector<64x64xf32> to vector<64x64xbf16>
    %c384 = arith.constant 384 : index
    %c0_93 = arith.constant 0 : index
    %143 = vector.load %arg4[%c384, %c0_93] : memref<576x32xbf16, #tpu.memory_space<vmem>>, vector<64x32xbf16>
    %cst_94 = arith.constant dense<0.000000e+00> : vector<64x32xf32>
    %144 = tpu.matmul %142, %143, %cst_94 {dimension_numbers = #tpu.dot_dimension_numbers<[1], [0], [0], [1], [0, 0, 1, 1], [], []>} : vector<64x64xbf16>, vector<64x32xbf16>, vector<64x32xf32> -> vector<64x32xf32>
    %145 = arith.addf %139, %144 : vector<64x32xf32>
    %c2_95 = arith.constant 2 : index
    %c1_96 = arith.constant 1 : index
    %c0_97 = arith.constant 0 : index
    %146 = vector.load %arg12[%c2_95, %c1_96, %c0_97] : memref<10x10x64xf32, #tpu.memory_space<vmem>>, vector<8x8x64xf32>
    %147 = vector.shape_cast %146 : vector<8x8x64xf32> to vector<64x64xf32>
    %148 = arith.truncf %147 : vector<64x64xf32> to vector<64x64xbf16>
    %c448 = arith.constant 448 : index
    %c0_98 = arith.constant 0 : index
    %149 = vector.load %arg4[%c448, %c0_98] : memref<576x32xbf16, #tpu.memory_space<vmem>>, vector<64x32xbf16>
    %cst_99 = arith.constant dense<0.000000e+00> : vector<64x32xf32>
    %150 = tpu.matmul %148, %149, %cst_99 {dimension_numbers = #tpu.dot_dimension_numbers<[1], [0], [0], [1], [0, 0, 1, 1], [], []>} : vector<64x64xbf16>, vector<64x32xbf16>, vector<64x32xf32> -> vector<64x32xf32>
    %151 = arith.addf %145, %150 : vector<64x32xf32>
    %c2_100 = arith.constant 2 : index
    %c2_101 = arith.constant 2 : index
    %c0_102 = arith.constant 0 : index
    %152 = vector.load %arg12[%c2_100, %c2_101, %c0_102] : memref<10x10x64xf32, #tpu.memory_space<vmem>>, vector<8x8x64xf32>
    %153 = vector.shape_cast %152 : vector<8x8x64xf32> to vector<64x64xf32>
    %154 = arith.truncf %153 : vector<64x64xf32> to vector<64x64xbf16>
    %c512 = arith.constant 512 : index
    %c0_103 = arith.constant 0 : index
    %155 = vector.load %arg4[%c512, %c0_103] : memref<576x32xbf16, #tpu.memory_space<vmem>>, vector<64x32xbf16>
    %cst_104 = arith.constant dense<0.000000e+00> : vector<64x32xf32>
    %156 = tpu.matmul %154, %155, %cst_104 {dimension_numbers = #tpu.dot_dimension_numbers<[1], [0], [0], [1], [0, 0, 1, 1], [], []>} : vector<64x64xbf16>, vector<64x32xbf16>, vector<64x32xf32> -> vector<64x32xf32>
    %157 = arith.addf %151, %156 : vector<64x32xf32>
    %c0_105 = arith.constant 0 : index
    %c0_106 = arith.constant 0 : index
    %158 = vector.load %arg5[%c0_105, %c0_106] : memref<1x32xf32, #tpu.memory_space<vmem>>, vector<1x32xf32>
    %159 = vector.broadcast %158 : vector<1x32xf32> to vector<64x32xf32>
    %160 = arith.addf %157, %159 : vector<64x32xf32>
    %cst_107 = arith.constant 0.000000e+00 : f32
    %161 = vector.broadcast %cst_107 : f32 to vector<64x32xf32>
    %162 = arith.subf %161, %160 : vector<64x32xf32>
    %163 = math.exp %162 : vector<64x32xf32>
    %cst_108 = arith.constant 1.000000e+00 : f32
    %164 = vector.broadcast %cst_108 : f32 to vector<64x32xf32>
    %165 = arith.addf %164, %163 : vector<64x32xf32>
    %166 = tpu.reciprocal %165 {approx = true} : vector<64x32xf32> -> vector<64x32xf32>
    %167 = arith.mulf %160, %166 : vector<64x32xf32>
    %168 = vector.shape_cast %167 : vector<64x32xf32> to vector<32x2x32xf32>
    %169 = vector.extract_strided_slice %168 {offsets = [0, 0, 0], sizes = [32, 1, 32], strides = [1, 1, 1]} : vector<32x2x32xf32> to vector<32x1x32xf32>
    %170 = vector.shape_cast %169 : vector<32x1x32xf32> to vector<32x32xf32>
    %171 = vector.extract_strided_slice %168 {offsets = [0, 1, 0], sizes = [32, 1, 32], strides = [1, 1, 1]} : vector<32x2x32xf32> to vector<32x1x32xf32>
    %172 = vector.shape_cast %171 : vector<32x1x32xf32> to vector<32x32xf32>
    %173 = arith.maximumf %170, %172 : vector<32x32xf32>
    %174 = vector.shape_cast %173 : vector<32x32xf32> to vector<4x2x4x32xf32>
    %175 = vector.extract_strided_slice %174 {offsets = [0, 0, 0, 0], sizes = [4, 1, 4, 32], strides = [1, 1, 1, 1]} : vector<4x2x4x32xf32> to vector<4x1x4x32xf32>
    %176 = vector.shape_cast %175 : vector<4x1x4x32xf32> to vector<4x4x32xf32>
    %177 = vector.extract_strided_slice %174 {offsets = [0, 1, 0, 0], sizes = [4, 1, 4, 32], strides = [1, 1, 1, 1]} : vector<4x2x4x32xf32> to vector<4x1x4x32xf32>
    %178 = vector.shape_cast %177 : vector<4x1x4x32xf32> to vector<4x4x32xf32>
    %179 = arith.maximumf %176, %178 : vector<4x4x32xf32>
    %cst_109 = arith.constant 0.000000e+00 : f32
    %180 = vector.broadcast %cst_109 : f32 to vector<6x6x32xf32>
    %c0_110 = arith.constant 0 : index
    %c0_111 = arith.constant 0 : index
    %c0_112 = arith.constant 0 : index
    %181 = vector.load %arg13[%c0_110, %c0_111, %c0_112] : memref<6x6x32xf32, #tpu.memory_space<vmem>>, vector<6x6x32xf32>
    tpu.vector_store %arg13[%c0_110, %c0_111, %c0_112], %180 {strides = array<i32>} : memref<6x6x32xf32, #tpu.memory_space<vmem>>, vector<6x6x32xf32>,
    %c1_113 = arith.constant 1 : index
    %c1_114 = arith.constant 1 : index
    %c0_115 = arith.constant 0 : index
    %182 = vector.load %arg13[%c1_113, %c1_114, %c0_115] : memref<6x6x32xf32, #tpu.memory_space<vmem>>, vector<4x4x32xf32>
    tpu.vector_store %arg13[%c1_113, %c1_114, %c0_115], %179 {strides = array<i32>} : memref<6x6x32xf32, #tpu.memory_space<vmem>>, vector<4x4x32xf32>,
    %cst_116 = arith.constant 0.000000e+00 : f32
    %183 = vector.broadcast %cst_116 : f32 to vector<16x16xf32>
    %c0_117 = arith.constant 0 : index
    %c0_118 = arith.constant 0 : index
    %c0_119 = arith.constant 0 : index
    %184 = vector.load %arg13[%c0_117, %c0_118, %c0_119] : memref<6x6x32xf32, #tpu.memory_space<vmem>>, vector<4x4x32xf32>
    %185 = vector.shape_cast %184 : vector<4x4x32xf32> to vector<16x32xf32>
    %186 = arith.truncf %185 : vector<16x32xf32> to vector<16x32xbf16>
    %c0_120 = arith.constant 0 : index
    %c0_121 = arith.constant 0 : index
    %187 = vector.load %arg6[%c0_120, %c0_121] : memref<288x16xbf16, #tpu.memory_space<vmem>>, vector<32x16xbf16>
    %cst_122 = arith.constant dense<0.000000e+00> : vector<16x16xf32>
    %188 = tpu.matmul %186, %187, %cst_122 {dimension_numbers = #tpu.dot_dimension_numbers<[1], [0], [0], [1], [0, 0, 1, 1], [], []>} : vector<16x32xbf16>, vector<32x16xbf16>, vector<16x16xf32> -> vector<16x16xf32>
    %189 = arith.addf %183, %188 : vector<16x16xf32>
    %c0_123 = arith.constant 0 : index
    %c1_124 = arith.constant 1 : index
    %c0_125 = arith.constant 0 : index
    %190 = vector.load %arg13[%c0_123, %c1_124, %c0_125] : memref<6x6x32xf32, #tpu.memory_space<vmem>>, vector<4x4x32xf32>
    %191 = vector.shape_cast %190 : vector<4x4x32xf32> to vector<16x32xf32>
    %192 = arith.truncf %191 : vector<16x32xf32> to vector<16x32xbf16>
    %c32 = arith.constant 32 : index
    %c0_126 = arith.constant 0 : index
    %193 = vector.load %arg6[%c32, %c0_126] : memref<288x16xbf16, #tpu.memory_space<vmem>>, vector<32x16xbf16>
    %cst_127 = arith.constant dense<0.000000e+00> : vector<16x16xf32>
    %194 = tpu.matmul %192, %193, %cst_127 {dimension_numbers = #tpu.dot_dimension_numbers<[1], [0], [0], [1], [0, 0, 1, 1], [], []>} : vector<16x32xbf16>, vector<32x16xbf16>, vector<16x16xf32> -> vector<16x16xf32>
    %195 = arith.addf %189, %194 : vector<16x16xf32>
    %c0_128 = arith.constant 0 : index
    %c2_129 = arith.constant 2 : index
    %c0_130 = arith.constant 0 : index
    %196 = vector.load %arg13[%c0_128, %c2_129, %c0_130] : memref<6x6x32xf32, #tpu.memory_space<vmem>>, vector<4x4x32xf32>
    %197 = vector.shape_cast %196 : vector<4x4x32xf32> to vector<16x32xf32>
    %198 = arith.truncf %197 : vector<16x32xf32> to vector<16x32xbf16>
    %c64_131 = arith.constant 64 : index
    %c0_132 = arith.constant 0 : index
    %199 = vector.load %arg6[%c64_131, %c0_132] : memref<288x16xbf16, #tpu.memory_space<vmem>>, vector<32x16xbf16>
    %cst_133 = arith.constant dense<0.000000e+00> : vector<16x16xf32>
    %200 = tpu.matmul %198, %199, %cst_133 {dimension_numbers = #tpu.dot_dimension_numbers<[1], [0], [0], [1], [0, 0, 1, 1], [], []>} : vector<16x32xbf16>, vector<32x16xbf16>, vector<16x16xf32> -> vector<16x16xf32>
    %201 = arith.addf %195, %200 : vector<16x16xf32>
    %c1_134 = arith.constant 1 : index
    %c0_135 = arith.constant 0 : index
    %c0_136 = arith.constant 0 : index
    %202 = vector.load %arg13[%c1_134, %c0_135, %c0_136] : memref<6x6x32xf32, #tpu.memory_space<vmem>>, vector<4x4x32xf32>
    %203 = vector.shape_cast %202 : vector<4x4x32xf32> to vector<16x32xf32>
    %204 = arith.truncf %203 : vector<16x32xf32> to vector<16x32xbf16>
    %c96 = arith.constant 96 : index
    %c0_137 = arith.constant 0 : index
    %205 = vector.load %arg6[%c96, %c0_137] : memref<288x16xbf16, #tpu.memory_space<vmem>>, vector<32x16xbf16>
    %cst_138 = arith.constant dense<0.000000e+00> : vector<16x16xf32>
    %206 = tpu.matmul %204, %205, %cst_138 {dimension_numbers = #tpu.dot_dimension_numbers<[1], [0], [0], [1], [0, 0, 1, 1], [], []>} : vector<16x32xbf16>, vector<32x16xbf16>, vector<16x16xf32> -> vector<16x16xf32>
    %207 = arith.addf %201, %206 : vector<16x16xf32>
    %c1_139 = arith.constant 1 : index
    %c1_140 = arith.constant 1 : index
    %c0_141 = arith.constant 0 : index
    %208 = vector.load %arg13[%c1_139, %c1_140, %c0_141] : memref<6x6x32xf32, #tpu.memory_space<vmem>>, vector<4x4x32xf32>
    %209 = vector.shape_cast %208 : vector<4x4x32xf32> to vector<16x32xf32>
    %210 = arith.truncf %209 : vector<16x32xf32> to vector<16x32xbf16>
    %c128_142 = arith.constant 128 : index
    %c0_143 = arith.constant 0 : index
    %211 = vector.load %arg6[%c128_142, %c0_143] : memref<288x16xbf16, #tpu.memory_space<vmem>>, vector<32x16xbf16>
    %cst_144 = arith.constant dense<0.000000e+00> : vector<16x16xf32>
    %212 = tpu.matmul %210, %211, %cst_144 {dimension_numbers = #tpu.dot_dimension_numbers<[1], [0], [0], [1], [0, 0, 1, 1], [], []>} : vector<16x32xbf16>, vector<32x16xbf16>, vector<16x16xf32> -> vector<16x16xf32>
    %213 = arith.addf %207, %212 : vector<16x16xf32>
    %c1_145 = arith.constant 1 : index
    %c2_146 = arith.constant 2 : index
    %c0_147 = arith.constant 0 : index
    %214 = vector.load %arg13[%c1_145, %c2_146, %c0_147] : memref<6x6x32xf32, #tpu.memory_space<vmem>>, vector<4x4x32xf32>
    %215 = vector.shape_cast %214 : vector<4x4x32xf32> to vector<16x32xf32>
    %216 = arith.truncf %215 : vector<16x32xf32> to vector<16x32xbf16>
    %c160 = arith.constant 160 : index
    %c0_148 = arith.constant 0 : index
    %217 = vector.load %arg6[%c160, %c0_148] : memref<288x16xbf16, #tpu.memory_space<vmem>>, vector<32x16xbf16>
    %cst_149 = arith.constant dense<0.000000e+00> : vector<16x16xf32>
    %218 = tpu.matmul %216, %217, %cst_149 {dimension_numbers = #tpu.dot_dimension_numbers<[1], [0], [0], [1], [0, 0, 1, 1], [], []>} : vector<16x32xbf16>, vector<32x16xbf16>, vector<16x16xf32> -> vector<16x16xf32>
    %219 = arith.addf %213, %218 : vector<16x16xf32>
    %c2_150 = arith.constant 2 : index
    %c0_151 = arith.constant 0 : index
    %c0_152 = arith.constant 0 : index
    %220 = vector.load %arg13[%c2_150, %c0_151, %c0_152] : memref<6x6x32xf32, #tpu.memory_space<vmem>>, vector<4x4x32xf32>
    %221 = vector.shape_cast %220 : vector<4x4x32xf32> to vector<16x32xf32>
    %222 = arith.truncf %221 : vector<16x32xf32> to vector<16x32xbf16>
    %c192_153 = arith.constant 192 : index
    %c0_154 = arith.constant 0 : index
    %223 = vector.load %arg6[%c192_153, %c0_154] : memref<288x16xbf16, #tpu.memory_space<vmem>>, vector<32x16xbf16>
    %cst_155 = arith.constant dense<0.000000e+00> : vector<16x16xf32>
    %224 = tpu.matmul %222, %223, %cst_155 {dimension_numbers = #tpu.dot_dimension_numbers<[1], [0], [0], [1], [0, 0, 1, 1], [], []>} : vector<16x32xbf16>, vector<32x16xbf16>, vector<16x16xf32> -> vector<16x16xf32>
    %225 = arith.addf %219, %224 : vector<16x16xf32>
    %c2_156 = arith.constant 2 : index
    %c1_157 = arith.constant 1 : index
    %c0_158 = arith.constant 0 : index
    %226 = vector.load %arg13[%c2_156, %c1_157, %c0_158] : memref<6x6x32xf32, #tpu.memory_space<vmem>>, vector<4x4x32xf32>
    %227 = vector.shape_cast %226 : vector<4x4x32xf32> to vector<16x32xf32>
    %228 = arith.truncf %227 : vector<16x32xf32> to vector<16x32xbf16>
    %c224 = arith.constant 224 : index
    %c0_159 = arith.constant 0 : index
    %229 = vector.load %arg6[%c224, %c0_159] : memref<288x16xbf16, #tpu.memory_space<vmem>>, vector<32x16xbf16>
    %cst_160 = arith.constant dense<0.000000e+00> : vector<16x16xf32>
    %230 = tpu.matmul %228, %229, %cst_160 {dimension_numbers = #tpu.dot_dimension_numbers<[1], [0], [0], [1], [0, 0, 1, 1], [], []>} : vector<16x32xbf16>, vector<32x16xbf16>, vector<16x16xf32> -> vector<16x16xf32>
    %231 = arith.addf %225, %230 : vector<16x16xf32>
    %c2_161 = arith.constant 2 : index
    %c2_162 = arith.constant 2 : index
    %c0_163 = arith.constant 0 : index
    %232 = vector.load %arg13[%c2_161, %c2_162, %c0_163] : memref<6x6x32xf32, #tpu.memory_space<vmem>>, vector<4x4x32xf32>
    %233 = vector.shape_cast %232 : vector<4x4x32xf32> to vector<16x32xf32>
    %234 = arith.truncf %233 : vector<16x32xf32> to vector<16x32xbf16>
    %c256_164 = arith.constant 256 : index
    %c0_165 = arith.constant 0 : index
    %235 = vector.load %arg6[%c256_164, %c0_165] : memref<288x16xbf16, #tpu.memory_space<vmem>>, vector<32x16xbf16>
    %cst_166 = arith.constant dense<0.000000e+00> : vector<16x16xf32>
    %236 = tpu.matmul %234, %235, %cst_166 {dimension_numbers = #tpu.dot_dimension_numbers<[1], [0], [0], [1], [0, 0, 1, 1], [], []>} : vector<16x32xbf16>, vector<32x16xbf16>, vector<16x16xf32> -> vector<16x16xf32>
    %237 = arith.addf %231, %236 : vector<16x16xf32>
    %c0_167 = arith.constant 0 : index
    %c0_168 = arith.constant 0 : index
    %238 = vector.load %arg7[%c0_167, %c0_168] : memref<1x16xf32, #tpu.memory_space<vmem>>, vector<1x16xf32>
    %239 = vector.broadcast %238 : vector<1x16xf32> to vector<16x16xf32>
    %240 = arith.addf %237, %239 : vector<16x16xf32>
    %cst_169 = arith.constant 0.000000e+00 : f32
    %241 = vector.broadcast %cst_169 : f32 to vector<16x16xf32>
    %242 = arith.subf %241, %240 : vector<16x16xf32>
    %243 = math.exp %242 : vector<16x16xf32>
    %cst_170 = arith.constant 1.000000e+00 : f32
    %244 = vector.broadcast %cst_170 : f32 to vector<16x16xf32>
    %245 = arith.addf %244, %243 : vector<16x16xf32>
    %246 = tpu.reciprocal %245 {approx = true} : vector<16x16xf32> -> vector<16x16xf32>
    %247 = arith.mulf %240, %246 : vector<16x16xf32>
    %248 = vector.shape_cast %247 : vector<16x16xf32> to vector<8x2x16xf32>
    %249 = vector.extract_strided_slice %248 {offsets = [0, 0, 0], sizes = [8, 1, 16], strides = [1, 1, 1]} : vector<8x2x16xf32> to vector<8x1x16xf32>
    %250 = vector.shape_cast %249 : vector<8x1x16xf32> to vector<8x16xf32>
    %251 = vector.extract_strided_slice %248 {offsets = [0, 1, 0], sizes = [8, 1, 16], strides = [1, 1, 1]} : vector<8x2x16xf32> to vector<8x1x16xf32>
    %252 = vector.shape_cast %251 : vector<8x1x16xf32> to vector<8x16xf32>
    %253 = arith.maximumf %250, %252 : vector<8x16xf32>
    %254 = vector.shape_cast %253 : vector<8x16xf32> to vector<2x2x2x16xf32>
    %255 = vector.extract_strided_slice %254 {offsets = [0, 0, 0, 0], sizes = [2, 1, 2, 16], strides = [1, 1, 1, 1]} : vector<2x2x2x16xf32> to vector<2x1x2x16xf32>
    %256 = vector.shape_cast %255 : vector<2x1x2x16xf32> to vector<2x2x16xf32>
    %257 = vector.extract_strided_slice %254 {offsets = [0, 1, 0, 0], sizes = [2, 1, 2, 16], strides = [1, 1, 1, 1]} : vector<2x2x2x16xf32> to vector<2x1x2x16xf32>
    %258 = vector.shape_cast %257 : vector<2x1x2x16xf32> to vector<2x2x16xf32>
    %259 = arith.maximumf %256, %258 : vector<2x2x16xf32>
    %cst_171 = arith.constant 0.000000e+00 : f32
    %260 = vector.broadcast %cst_171 : f32 to vector<4x4x16xf32>
    %c0_172 = arith.constant 0 : index
    %c0_173 = arith.constant 0 : index
    %c0_174 = arith.constant 0 : index
    %261 = vector.load %arg14[%c0_172, %c0_173, %c0_174] : memref<4x4x16xf32, #tpu.memory_space<vmem>>, vector<4x4x16xf32>
    tpu.vector_store %arg14[%c0_172, %c0_173, %c0_174], %260 {strides = array<i32>} : memref<4x4x16xf32, #tpu.memory_space<vmem>>, vector<4x4x16xf32>,
    %c1_175 = arith.constant 1 : index
    %c1_176 = arith.constant 1 : index
    %c0_177 = arith.constant 0 : index
    %262 = vector.load %arg14[%c1_175, %c1_176, %c0_177] : memref<4x4x16xf32, #tpu.memory_space<vmem>>, vector<2x2x16xf32>
    tpu.vector_store %arg14[%c1_175, %c1_176, %c0_177], %259 {strides = array<i32>} : memref<4x4x16xf32, #tpu.memory_space<vmem>>, vector<2x2x16xf32>,
    %cst_178 = arith.constant 0.000000e+00 : f32
    %263 = vector.broadcast %cst_178 : f32 to vector<4x8xf32>
    %c0_179 = arith.constant 0 : index
    %c0_180 = arith.constant 0 : index
    %c0_181 = arith.constant 0 : index
    %264 = vector.load %arg14[%c0_179, %c0_180, %c0_181] : memref<4x4x16xf32, #tpu.memory_space<vmem>>, vector<2x2x16xf32>
    %265 = vector.shape_cast %264 : vector<2x2x16xf32> to vector<4x16xf32>
    %266 = arith.truncf %265 : vector<4x16xf32> to vector<4x16xbf16>
    %c0_182 = arith.constant 0 : index
    %c0_183 = arith.constant 0 : index
    %267 = vector.load %arg8[%c0_182, %c0_183] : memref<144x8xbf16, #tpu.memory_space<vmem>>, vector<16x8xbf16>
    %cst_184 = arith.constant dense<0.000000e+00> : vector<4x8xf32>
    %268 = tpu.matmul %266, %267, %cst_184 {dimension_numbers = #tpu.dot_dimension_numbers<[1], [0], [0], [1], [0, 0, 1, 1], [], []>} : vector<4x16xbf16>, vector<16x8xbf16>, vector<4x8xf32> -> vector<4x8xf32>
    %269 = arith.addf %263, %268 : vector<4x8xf32>
    %c0_185 = arith.constant 0 : index
    %c1_186 = arith.constant 1 : index
    %c0_187 = arith.constant 0 : index
    %270 = vector.load %arg14[%c0_185, %c1_186, %c0_187] : memref<4x4x16xf32, #tpu.memory_space<vmem>>, vector<2x2x16xf32>
    %271 = vector.shape_cast %270 : vector<2x2x16xf32> to vector<4x16xf32>
    %272 = arith.truncf %271 : vector<4x16xf32> to vector<4x16xbf16>
    %c16 = arith.constant 16 : index
    %c0_188 = arith.constant 0 : index
    %273 = vector.load %arg8[%c16, %c0_188] : memref<144x8xbf16, #tpu.memory_space<vmem>>, vector<16x8xbf16>
    %cst_189 = arith.constant dense<0.000000e+00> : vector<4x8xf32>
    %274 = tpu.matmul %272, %273, %cst_189 {dimension_numbers = #tpu.dot_dimension_numbers<[1], [0], [0], [1], [0, 0, 1, 1], [], []>} : vector<4x16xbf16>, vector<16x8xbf16>, vector<4x8xf32> -> vector<4x8xf32>
    %275 = arith.addf %269, %274 : vector<4x8xf32>
    %c0_190 = arith.constant 0 : index
    %c2_191 = arith.constant 2 : index
    %c0_192 = arith.constant 0 : index
    %276 = vector.load %arg14[%c0_190, %c2_191, %c0_192] : memref<4x4x16xf32, #tpu.memory_space<vmem>>, vector<2x2x16xf32>
    %277 = vector.shape_cast %276 : vector<2x2x16xf32> to vector<4x16xf32>
    %278 = arith.truncf %277 : vector<4x16xf32> to vector<4x16xbf16>
    %c32_193 = arith.constant 32 : index
    %c0_194 = arith.constant 0 : index
    %279 = vector.load %arg8[%c32_193, %c0_194] : memref<144x8xbf16, #tpu.memory_space<vmem>>, vector<16x8xbf16>
    %cst_195 = arith.constant dense<0.000000e+00> : vector<4x8xf32>
    %280 = tpu.matmul %278, %279, %cst_195 {dimension_numbers = #tpu.dot_dimension_numbers<[1], [0], [0], [1], [0, 0, 1, 1], [], []>} : vector<4x16xbf16>, vector<16x8xbf16>, vector<4x8xf32> -> vector<4x8xf32>
    %281 = arith.addf %275, %280 : vector<4x8xf32>
    %c1_196 = arith.constant 1 : index
    %c0_197 = arith.constant 0 : index
    %c0_198 = arith.constant 0 : index
    %282 = vector.load %arg14[%c1_196, %c0_197, %c0_198] : memref<4x4x16xf32, #tpu.memory_space<vmem>>, vector<2x2x16xf32>
    %283 = vector.shape_cast %282 : vector<2x2x16xf32> to vector<4x16xf32>
    %284 = arith.truncf %283 : vector<4x16xf32> to vector<4x16xbf16>
    %c48 = arith.constant 48 : index
    %c0_199 = arith.constant 0 : index
    %285 = vector.load %arg8[%c48, %c0_199] : memref<144x8xbf16, #tpu.memory_space<vmem>>, vector<16x8xbf16>
    %cst_200 = arith.constant dense<0.000000e+00> : vector<4x8xf32>
    %286 = tpu.matmul %284, %285, %cst_200 {dimension_numbers = #tpu.dot_dimension_numbers<[1], [0], [0], [1], [0, 0, 1, 1], [], []>} : vector<4x16xbf16>, vector<16x8xbf16>, vector<4x8xf32> -> vector<4x8xf32>
    %287 = arith.addf %281, %286 : vector<4x8xf32>
    %c1_201 = arith.constant 1 : index
    %c1_202 = arith.constant 1 : index
    %c0_203 = arith.constant 0 : index
    %288 = vector.load %arg14[%c1_201, %c1_202, %c0_203] : memref<4x4x16xf32, #tpu.memory_space<vmem>>, vector<2x2x16xf32>
    %289 = vector.shape_cast %288 : vector<2x2x16xf32> to vector<4x16xf32>
    %290 = arith.truncf %289 : vector<4x16xf32> to vector<4x16xbf16>
    %c64_204 = arith.constant 64 : index
    %c0_205 = arith.constant 0 : index
    %291 = vector.load %arg8[%c64_204, %c0_205] : memref<144x8xbf16, #tpu.memory_space<vmem>>, vector<16x8xbf16>
    %cst_206 = arith.constant dense<0.000000e+00> : vector<4x8xf32>
    %292 = tpu.matmul %290, %291, %cst_206 {dimension_numbers = #tpu.dot_dimension_numbers<[1], [0], [0], [1], [0, 0, 1, 1], [], []>} : vector<4x16xbf16>, vector<16x8xbf16>, vector<4x8xf32> -> vector<4x8xf32>
    %293 = arith.addf %287, %292 : vector<4x8xf32>
    %c1_207 = arith.constant 1 : index
    %c2_208 = arith.constant 2 : index
    %c0_209 = arith.constant 0 : index
    %294 = vector.load %arg14[%c1_207, %c2_208, %c0_209] : memref<4x4x16xf32, #tpu.memory_space<vmem>>, vector<2x2x16xf32>
    %295 = vector.shape_cast %294 : vector<2x2x16xf32> to vector<4x16xf32>
    %296 = arith.truncf %295 : vector<4x16xf32> to vector<4x16xbf16>
    %c80 = arith.constant 80 : index
    %c0_210 = arith.constant 0 : index
    %297 = vector.load %arg8[%c80, %c0_210] : memref<144x8xbf16, #tpu.memory_space<vmem>>, vector<16x8xbf16>
    %cst_211 = arith.constant dense<0.000000e+00> : vector<4x8xf32>
    %298 = tpu.matmul %296, %297, %cst_211 {dimension_numbers = #tpu.dot_dimension_numbers<[1], [0], [0], [1], [0, 0, 1, 1], [], []>} : vector<4x16xbf16>, vector<16x8xbf16>, vector<4x8xf32> -> vector<4x8xf32>
    %299 = arith.addf %293, %298 : vector<4x8xf32>
    %c2_212 = arith.constant 2 : index
    %c0_213 = arith.constant 0 : index
    %c0_214 = arith.constant 0 : index
    %300 = vector.load %arg14[%c2_212, %c0_213, %c0_214] : memref<4x4x16xf32, #tpu.memory_space<vmem>>, vector<2x2x16xf32>
    %301 = vector.shape_cast %300 : vector<2x2x16xf32> to vector<4x16xf32>
    %302 = arith.truncf %301 : vector<4x16xf32> to vector<4x16xbf16>
    %c96_215 = arith.constant 96 : index
    %c0_216 = arith.constant 0 : index
    %303 = vector.load %arg8[%c96_215, %c0_216] : memref<144x8xbf16, #tpu.memory_space<vmem>>, vector<16x8xbf16>
    %cst_217 = arith.constant dense<0.000000e+00> : vector<4x8xf32>
    %304 = tpu.matmul %302, %303, %cst_217 {dimension_numbers = #tpu.dot_dimension_numbers<[1], [0], [0], [1], [0, 0, 1, 1], [], []>} : vector<4x16xbf16>, vector<16x8xbf16>, vector<4x8xf32> -> vector<4x8xf32>
    %305 = arith.addf %299, %304 : vector<4x8xf32>
    %c2_218 = arith.constant 2 : index
    %c1_219 = arith.constant 1 : index
    %c0_220 = arith.constant 0 : index
    %306 = vector.load %arg14[%c2_218, %c1_219, %c0_220] : memref<4x4x16xf32, #tpu.memory_space<vmem>>, vector<2x2x16xf32>
    %307 = vector.shape_cast %306 : vector<2x2x16xf32> to vector<4x16xf32>
    %308 = arith.truncf %307 : vector<4x16xf32> to vector<4x16xbf16>
    %c112 = arith.constant 112 : index
    %c0_221 = arith.constant 0 : index
    %309 = vector.load %arg8[%c112, %c0_221] : memref<144x8xbf16, #tpu.memory_space<vmem>>, vector<16x8xbf16>
    %cst_222 = arith.constant dense<0.000000e+00> : vector<4x8xf32>
    %310 = tpu.matmul %308, %309, %cst_222 {dimension_numbers = #tpu.dot_dimension_numbers<[1], [0], [0], [1], [0, 0, 1, 1], [], []>} : vector<4x16xbf16>, vector<16x8xbf16>, vector<4x8xf32> -> vector<4x8xf32>
    %311 = arith.addf %305, %310 : vector<4x8xf32>
    %c2_223 = arith.constant 2 : index
    %c2_224 = arith.constant 2 : index
    %c0_225 = arith.constant 0 : index
    %312 = vector.load %arg14[%c2_223, %c2_224, %c0_225] : memref<4x4x16xf32, #tpu.memory_space<vmem>>, vector<2x2x16xf32>
    %313 = vector.shape_cast %312 : vector<2x2x16xf32> to vector<4x16xf32>
    %314 = arith.truncf %313 : vector<4x16xf32> to vector<4x16xbf16>
    %c128_226 = arith.constant 128 : index
    %c0_227 = arith.constant 0 : index
    %315 = vector.load %arg8[%c128_226, %c0_227] : memref<144x8xbf16, #tpu.memory_space<vmem>>, vector<16x8xbf16>
    %cst_228 = arith.constant dense<0.000000e+00> : vector<4x8xf32>
    %316 = tpu.matmul %314, %315, %cst_228 {dimension_numbers = #tpu.dot_dimension_numbers<[1], [0], [0], [1], [0, 0, 1, 1], [], []>} : vector<4x16xbf16>, vector<16x8xbf16>, vector<4x8xf32> -> vector<4x8xf32>
    %317 = arith.addf %311, %316 : vector<4x8xf32>
    %c0_229 = arith.constant 0 : index
    %c0_230 = arith.constant 0 : index
    %318 = vector.load %arg9[%c0_229, %c0_230] : memref<1x8xf32, #tpu.memory_space<vmem>>, vector<1x8xf32>
    %319 = vector.broadcast %318 : vector<1x8xf32> to vector<4x8xf32>
    %320 = arith.addf %317, %319 : vector<4x8xf32>
    %cst_231 = arith.constant 0.000000e+00 : f32
    %321 = vector.broadcast %cst_231 : f32 to vector<4x8xf32>
    %322 = arith.subf %321, %320 : vector<4x8xf32>
    %323 = math.exp %322 : vector<4x8xf32>
    %cst_232 = arith.constant 1.000000e+00 : f32
    %324 = vector.broadcast %cst_232 : f32 to vector<4x8xf32>
    %325 = arith.addf %324, %323 : vector<4x8xf32>
    %326 = tpu.reciprocal %325 {approx = true} : vector<4x8xf32> -> vector<4x8xf32>
    %327 = arith.mulf %320, %326 : vector<4x8xf32>
    %328 = vector.shape_cast %327 : vector<4x8xf32> to vector<2x2x8xf32>
    %329 = vector.extract_strided_slice %328 {offsets = [0, 0, 0], sizes = [2, 1, 8], strides = [1, 1, 1]} : vector<2x2x8xf32> to vector<2x1x8xf32>
    %330 = vector.shape_cast %329 : vector<2x1x8xf32> to vector<2x8xf32>
    %331 = vector.extract_strided_slice %328 {offsets = [0, 1, 0], sizes = [2, 1, 8], strides = [1, 1, 1]} : vector<2x2x8xf32> to vector<2x1x8xf32>
    %332 = vector.shape_cast %331 : vector<2x1x8xf32> to vector<2x8xf32>
    %333 = arith.maximumf %330, %332 : vector<2x8xf32>
    %334 = vector.shape_cast %333 : vector<2x8xf32> to vector<1x2x1x8xf32>
    %335 = vector.extract_strided_slice %334 {offsets = [0, 0, 0, 0], sizes = [1, 1, 1, 8], strides = [1, 1, 1, 1]} : vector<1x2x1x8xf32> to vector<1x1x1x8xf32>
    %336 = vector.shape_cast %335 : vector<1x1x1x8xf32> to vector<1x1x8xf32>
    %337 = vector.extract_strided_slice %334 {offsets = [0, 1, 0, 0], sizes = [1, 1, 1, 8], strides = [1, 1, 1, 1]} : vector<1x2x1x8xf32> to vector<1x1x1x8xf32>
    %338 = vector.shape_cast %337 : vector<1x1x1x8xf32> to vector<1x1x8xf32>
    %339 = arith.maximumf %336, %338 : vector<1x1x8xf32>
    %340 = vector.shape_cast %339 : vector<1x1x8xf32> to vector<1x8xf32>
    %c0_233 = arith.constant 0 : index
    %c0_234 = arith.constant 0 : index
    %c0_235 = arith.constant 0 : index
    %341 = vector.load %arg10[%c0_233, %c0_234, %c0_235] : memref<1x1x8xf32, #tpu.memory_space<vmem>>, vector<1x1x8xf32>
    %342 = vector.shape_cast %341 : vector<1x1x8xf32> to vector<1x8xf32>
    %343 = vector.shape_cast %340 : vector<1x8xf32> to vector<1x1x8xf32>
    tpu.vector_store %arg10[%c0_233, %c0_234, %c0_235], %343 {strides = array<i32>} : memref<1x1x8xf32, #tpu.memory_space<vmem>>, vector<1x1x8xf32>,
    return
  }
  func.func @transform_0(%arg0: i32) -> (i32, i32, i32, i32) {
    %c0_i32 = arith.constant 0 : i32
    %c0_i32_0 = arith.constant 0 : i32
    %c0_i32_1 = arith.constant 0 : i32
    %c0_i32_2 = arith.constant 0 : i32
    return %arg0, %c0_i32, %c0_i32_0, %c0_i32_1 : i32, i32, i32, i32
  }
  func.func @transform_1(%arg0: i32) -> (i32, i32) {
    %c0_i32 = arith.constant 0 : i32
    %c0_i32_0 = arith.constant 0 : i32
    %c0_i32_1 = arith.constant 0 : i32
    return %c0_i32, %c0_i32_0 : i32, i32
  }
  func.func @transform_2(%arg0: i32) -> (i32, i32) {
    %c0_i32 = arith.constant 0 : i32
    %c0_i32_0 = arith.constant 0 : i32
    %c0_i32_1 = arith.constant 0 : i32
    return %c0_i32, %c0_i32_0 : i32, i32
  }
  func.func @transform_3(%arg0: i32) -> (i32, i32) {
    %c0_i32 = arith.constant 0 : i32
    %c0_i32_0 = arith.constant 0 : i32
    %c0_i32_1 = arith.constant 0 : i32
    return %c0_i32, %c0_i32_0 : i32, i32
  }
  func.func @transform_4(%arg0: i32) -> (i32, i32) {
    %c0_i32 = arith.constant 0 : i32
    %c0_i32_0 = arith.constant 0 : i32
    %c0_i32_1 = arith.constant 0 : i32
    return %c0_i32, %c0_i32_0 : i32, i32
  }
  func.func @transform_5(%arg0: i32) -> (i32, i32) {
    %c0_i32 = arith.constant 0 : i32
    %c0_i32_0 = arith.constant 0 : i32
    %c0_i32_1 = arith.constant 0 : i32
    return %c0_i32, %c0_i32_0 : i32, i32
  }
  func.func @transform_6(%arg0: i32) -> (i32, i32) {
    %c0_i32 = arith.constant 0 : i32
    %c0_i32_0 = arith.constant 0 : i32
    %c0_i32_1 = arith.constant 0 : i32
    return %c0_i32, %c0_i32_0 : i32, i32
  }
  func.func @transform_7(%arg0: i32) -> (i32, i32) {
    %c0_i32 = arith.constant 0 : i32
    %c0_i32_0 = arith.constant 0 : i32
    %c0_i32_1 = arith.constant 0 : i32
    return %c0_i32, %c0_i32_0 : i32, i32
  }
  func.func @transform_8(%arg0: i32) -> (i32, i32) {
    %c0_i32 = arith.constant 0 : i32
    %c0_i32_0 = arith.constant 0 : i32
    %c0_i32_1 = arith.constant 0 : i32
    return %c0_i32, %c0_i32_0 : i32, i32
  }
  func.func @transform_9(%arg0: i32) -> (i32, i32, i32) {
    %c0_i32 = arith.constant 0 : i32
    %c0_i32_0 = arith.constant 0 : i32
    %c0_i32_1 = arith.constant 0 : i32
    return %arg0, %c0_i32, %c0_i32_0 : i32, i32, i32
  }
}

</mosaic_0001>

<bundles_post_ra>
// kernel: encoder_forward.1
= control target key start
LH: loop header
LB: loop body
LE: loop exit
PB: predicated region body
PF: predicated region fallthrough
CT: control target
= control target key end

     0   :  { %14 = vsyncpa [#allocation7], 0  ;;  %s9604_s0 = inlined_call_operand.vmem [shape: f32[2,16,16,1], index: 0, kind: input, shape index: {}]   ;;  %s9605_s1 = inlined_call_operand.vmem [shape: bf16[9,64], index: 1, kind: input, shape index: {}]   ;;  %s9606_s2 = inlined_call_operand.vmem [shape: f32[1,64], index: 2, kind: input, shape index: {}]   ;;  %s9607_s3 = inlined_call_operand.vmem [shape: bf16[576,32], index: 3, kind: input, shape index: {}]   ;;  %s9608_s4 = inlined_call_operand.vmem [shape: f32[1,32], index: 4, kind: input, shape index: {}]   ;;  %s9609_s5 = inlined_call_operand.vmem [shape: bf16[288,16], index: 5, kind: input, shape index: {}]   ;;  %s9610_s6 = inlined_call_operand.vmem [shape: f32[1,16], index: 6, kind: input, shape index: {}]   ;;  %s9611_s7 = inlined_call_operand.vmem [shape: bf16[144,8], index: 7, kind: input, shape index: {}]   ;;  %s9612_s8 = inlined_call_operand.vmem [shape: f32[1,8], index: 8, kind: input, shape index: {}]   ;;  %s9613_s9 = inlined_call_operand.hbm [shape: f32[2,1,8], index: 9, kind: output, shape index: {}]  }
   0x1   :  { %16 = vsyncpa [#allocation7 + $0x1], 0  ;;  %s7053_s30 = smov 0   ;;  %s7055_s10 = smov 0  }
   0x2   :  { %s7057_s11 = smov 0   ;;  %s7059_s12 = smov 0  }
   0x3 LB: > { %s7074_s13 = sadd.s32 4294967295, %s6999_s12   ;;  %s6167_s14 = sadd.s32 4294967294, %s6999_s12   ;;  %s6999_s12 = sphi %s7059_s12, %s9893_s12   ;;  %s6995_s11 = sphi %s7057_s11, %s9892_s11   ;;  %s6991_s10 = sphi %s7055_s10, %s9891_s10   ;;  %s6987_s30 = sphi %s7053_s30, %s9890_s30  }
   0x4   : > { %s7078_s15 = sadd.s32 1, %s6999_s12   ;;  %s223_s16 = sadd.s32 1, %s6995_s11 }
   0x5   : > { %s220_s17 = ssub.s32 %s6999_s12, %s7078_s15  ;;  %p233_p0 = scmp.ne.s32.totalorder %s6995_s11, %s6991_s10 }
   0x6   : > { %p221_p1 = scmp.eq.s32.totalorder %s220_s17, 0  ;;  %p234_p2 = scmp.eq.s32.totalorder %s7074_s13, 1 }
   0x7   : > { %p239_p3 = scmp.ne.s32.totalorder %s6991_s10, %s6987_s30  ;;  %p240_p4 = scmp.eq.s32.totalorder %s6167_s14, 1 }
   0x8   : > { %s7089_s18 = scalar_select %p221_p1, %s6995_s11, %s223_s16  }
   0x9   : > { %p7091_p5 = por %p234_p2, %p233_p0  ;;  %p7095_p6 = por %p240_p4, %p239_p3 }
   0xa   : > { %p6170_p7 = scmp.ge.s32.totalorder %s6999_s12, 1  ;;  %p290_p8 = scmp.lt.s32.totalorder %s6999_s12, 3 }
   0xc   : > { %p291_p9 = pnand %p6170_p7, %p290_p8 }
   0xe   : > { %294 = sbr.rel (%p291_p9) target bundleno = 1757 (0x6dd), region = 56 }
  0x13   : > { %vm363_vm0 = vcmask 7168   ;;  %v7001_v0 = vmov 0   ;;  %v9614_v1 = vmov 0.0   ;;  %p325_p10 = scmp.lt.s32.totalorder %s7074_s13, 1  ;;  %vm366_vm1 = vcmask 1024   ;;  %s323_s14 = sand.u32 1, %s6991_s10  }
  0x14   : > { %6756 = vset.pattern.permute.xlu0 %v7001_v0  ;;  %364 = vst.msk [vmem:[#allocation2] sm:$0xff] %vm363_vm0, %v9614_v1  ;;  %6758 = vset.pattern.permute.xlu2 %v7001_v0  ;;  %vm3804_vm2 = vcmask 523264   ;;  %vm3806_vm3 = vcmask 517120   ;;  %vm3954_vm4 = vcmask 1041409   ;;  %vm3956_vm5 = vcmask 1042434   ;;  %s6957_s29 = scalar_lea.hbm %s9613_s9, 2 }
  0x15   : > { %365 = vst.msk [vmem:[#allocation2 + $0x8] sm:$0xff] %vm363_vm0, %v9614_v1  ;;  %6757 = vset.pattern.permute.xlu1 %v7001_v0  ;;  %s326_s21 = scalar_select %p325_p10, %s7074_s13, 1  ;;  %vm3958_vm6 = vcmask 1043459   ;;  %vm3960_vm7 = vcmask 1044484   ;;  %vm3962_vm8 = vcmask 1045509   ;;  %vm3964_vm9 = vcmask 1046534  }
  0x16   : > { %368 = vst.msk [vmem:[#allocation2 + $0x18] sm:$0xff] %vm363_vm0, %v9614_v1  ;;  %vm3966_vm10 = vcmask 1047559   ;;  %vm5116_vm11 = vcmask 259072   ;;  %vm5172_vm12 = vcmask 257024   ;;  %vm5237_vm13 = vcmask 261120  }
  0x17   : > { %369 = vst.msk [vmem:[#allocation2 + $0x20] sm:$0xff] %vm363_vm0, %v9614_v1  ;;  %s6651_s22 = sshll.u32 %s326_s21, 8  ;;  %vm5738_vm14 = vcmask 125952   ;;  %vm5756_vm15 = vcmask 123904   ;;  %s6108_s21 = scalar_lea.hbm %s9613_s9, %s7074_s13 }
  0x18   : > { %371 = vst.msk [vmem:[#allocation2 + $0x30] sm:$0xff] %vm363_vm0, %v9614_v1  ;;  %s7168_s25 = scalar_lea.vmem %s9604_s0, %s6651_s22  ;;  %s324_s22 = scalar_lea.vmem [#allocation6], %s323_s14 }
  0x19   : > { %372 = vst.msk [vmem:[#allocation2 + $0x38] sm:$0xff] %vm363_vm0, %v9614_v1  ;;  %v333_v4 = vld [vmem:[%s7168_s25 + $0x10] sm:$0xff]  ;;  %v331_v5 = vld [vmem:[%s7168_s25] sm:$0xff]  ;;  %v334_v6 = vld [vmem:[%s7168_s25 + $0x18] sm:$0xff]  ;;  %s6110_s23 = sshll.u32 %s324_s22, 4  ;;  %s6112_s24 = sshll.u32 %s6108_s21, 4  ;;  %s6111_s23 = int_to_ptr.vmem [resolvable:$true] %s6110_s23  ;;  %s6113_s24 = int_to_ptr.hbm [resolvable:$true] %s6112_s24 }
  0x1a   : > { %374 = vst.msk [vmem:[#allocation2 + $0x48] sm:$0xff] %vm363_vm0, %v9614_v1  ;;  %v332_v10 = vld [vmem:[%s7168_s25 + $0x8] sm:$0xff]  ;;  %v335_v11 = vld [vmem:[%s7168_s25 + $0x20] sm:$0xff]  ;;  %v337_v12 = vld [vmem:[%s7168_s25 + $0x30] sm:$0xff]  ;;  %s6951_s26 = sshra.s32 %s6113_s24, 4  ;;  %s6952_s26 = int_to_ptr.hbm [resolvable:$true] %s6951_s26 }
  0x1b   : > { %v452_v2 = vld [vmem:[#allocation2] sm:$0xff]  ;;  %375 = vst.msk [vmem:[#allocation2 + $0x50] sm:$0xff] %vm363_vm0, %v9614_v1  ;;  %v338_v14 = vld [vmem:[%s7168_s25 + $0x38] sm:$0xff]  ;;  %v339_v15 = vld [vmem:[%s7168_s25 + $0x40] sm:$0xff]  ;;  %s6953_s27 = scalar_lea.hbm %s6952_s26, 1  ;;  %p6958_p0 = scmp.lt.s32.totalorder %s6952_s26, %s9613_s9 }
  0x1c   : > { %488 = vperm.xlu0 %6756, %v452_v2   ;;  %377 = vst.msk [vmem:[#allocation2 + $0x60] sm:$0xff] %vm363_vm0, %v9614_v1  ;;  %v453_v3 = vld [vmem:[#allocation2 + $0x8] sm:$0xff]  ;;  %v336_v13 = vld [vmem:[%s7168_s25 + $0x28] sm:$0xff]  ;;  %v343_v18 = vld [vmem:[%s7168_s25 + $0x60] sm:$0xff]  ;;  %p6954_p11 = scmp.ne.s32.totalorder %s6952_s26, %s6953_s27  ;;  %p6959_p1 = scmp.lt.s32.totalorder %s6957_s29, %s6953_s27 }
  0x1d   : > { %378 = vst.msk [vmem:[#allocation2 + $0x68] sm:$0xff] %vm363_vm0, %v9614_v1  ;;  %v340_v16 = vld [vmem:[%s7168_s25 + $0x48] sm:$0xff]  ;;  %v341_v17 = vld [vmem:[%s7168_s25 + $0x50] sm:$0xff]  ;;  %v342_v19 = vld [vmem:[%s7168_s25 + $0x58] sm:$0xff] }
  0x1e   : > { %380 = vst.msk [vmem:[#allocation2 + $0x78] sm:$0xff] %vm363_vm0, %v9614_v1  ;;  %v344_v21 = vld [vmem:[%s7168_s25 + $0x68] sm:$0xff]  ;;  %v345_v23 = vld [vmem:[%s7168_s25 + $0x70] sm:$0xff]  ;;  %v346_v25 = vld [vmem:[%s7168_s25 + $0x78] sm:$0xff]  ;;  %p6955_p12 = pnand %p6954_p11, %p7091_p5  ;;  %p6960_p2 = por %p6959_p1, %p6958_p0 }
  0x1f   : > { %381 = vst.msk [vmem:[#allocation2 + $0x80] sm:$0xff] %vm363_vm0, %v9614_v1  ;;  %v347_v26 = vld [vmem:[%s7168_s25 + $0x80] sm:$0xff]  ;;  %v349_v27 = vld [vmem:[%s7168_s25 + $0x90] sm:$0xff]  ;;  %v348_v28 = vld [vmem:[%s7168_s25 + $0x88] sm:$0xff] }
  0x20   : > { %383 = vst.msk [vmem:[#allocation2 + $0x90] sm:$0xff] %vm363_vm0, %v9614_v1  ;;  %v350_v30 = vld [vmem:[%s7168_s25 + $0x98] sm:$0xff]  ;;  %v351_v33 = vld [vmem:[%s7168_s25 + $0xa0] sm:$0xff]  ;;  %v352_v34 = vld [vmem:[%s7168_s25 + $0xa8] sm:$0xff]  ;;  %p6956_p13 = pneg %p6955_p12 }
  0x21   : > { %384 = vst.msk [vmem:[#allocation2 + $0x98] sm:$0xff] %vm363_vm0, %v9614_v1  ;;  %v353_v35 = vld [vmem:[%s7168_s25 + $0xb0] sm:$0xff]  ;;  %v355_v39 = vld [vmem:[%s7168_s25 + $0xc0] sm:$0xff]  ;;  %v354_v40 = vld [vmem:[%s7168_s25 + $0xb8] sm:$0xff] }
  0x22   : > { %386 = vst.msk [vmem:[#allocation2 + $0xa8] sm:$0xff] %vm363_vm0, %v9614_v1  ;;  %v356_v41 = vld [vmem:[%s7168_s25 + $0xc8] sm:$0xff]  ;;  %v357_v45 = vld [vmem:[%s7168_s25 + $0xd0] sm:$0xff]  ;;  %v358_v46 = vld [vmem:[%s7168_s25 + $0xd8] sm:$0xff]  ;;  %p6961_p3 = pnand %p6960_p2, %p6956_p13 }
  0x23   : > { %387 = vst.msk [vmem:[#allocation2 + $0xb0] sm:$0xff] %vm363_vm0, %v9614_v1  ;;  %v359_v47 = vld [vmem:[%s7168_s25 + $0xe0] sm:$0xff]  ;;  %v360_v51 = vld [vmem:[%s7168_s25 + $0xe8] sm:$0xff] }
  0x24   : > { %389 = vst.msk [vmem:[#allocation2 + $0xc0] sm:$0xff] %vm363_vm0, %v9614_v1  ;;  %493 = vperm.xlu0 %6756, %v453_v3   ;;  %v711_v63 = vld [vmem:[#allocation2 + $0x1] sm:$0xff] }
  0x25   : > { %390 = vst.msk [vmem:[#allocation2 + $0xc8] sm:$0xff] %vm363_vm0, %v9614_v1 }
  0x26   : > { %392 = vst.msk [vmem:[#allocation2 + $0xd8] sm:$0xff] %vm363_vm0, %v9614_v1 }
  0x27   : > { %393 = vst.msk [vmem:[#allocation2 + $0xe0] sm:$0xff] %vm363_vm0, %v9614_v1 }
  0x28   : > { %395 = vst.msk [vmem:[#allocation2 + $0xf0] sm:$0xff] %vm363_vm0, %v9614_v1 }
  0x29   : > { %396 = vst.msk [vmem:[#allocation2 + $0xf8] sm:$0xff] %vm363_vm0, %v9614_v1 }
  0x2a   : > { %398 = vst.msk [vmem:[#allocation2 + $0x108] sm:$0xff] %vm363_vm0, %v9614_v1 }
  0x2b   : > { %399 = vst.msk [vmem:[#allocation2 + $0x110] sm:$0xff] %vm363_vm0, %v9614_v1 }
  0x2c   : > { %401 = vst.msk [vmem:[#allocation2 + $0x120] sm:$0xff] %vm363_vm0, %v9614_v1 }
  0x2d   : > { %402 = vst.msk [vmem:[#allocation2 + $0x128] sm:$0xff] %vm363_vm0, %v9614_v1 }
  0x2e   : > { %404 = vst.msk [vmem:[#allocation2 + $0x138] sm:$0xff] %vm363_vm0, %v9614_v1 }
  0x2f   : > { %405 = vst.msk [vmem:[#allocation2 + $0x140] sm:$0xff] %vm363_vm0, %v9614_v1 }
  0x30   : > { %407 = vst.msk [vmem:[#allocation2 + $0x150] sm:$0xff] %vm363_vm0, %v9614_v1 }
  0x31   : > { %408 = vst.msk [vmem:[#allocation2 + $0x158] sm:$0xff] %vm363_vm0, %v9614_v1 }
  0x32   : > { %410 = vst.msk [vmem:[#allocation2 + $0x168] sm:$0xff] %vm363_vm0, %v9614_v1 }
  0x33   : > { %411 = vst.msk [vmem:[#allocation2 + $0x170] sm:$0xff] %vm363_vm0, %v9614_v1 }
  0x34   : > { %413 = vst.msk [vmem:[#allocation2 + $0x180] sm:$0xff] %vm363_vm0, %v9614_v1 }
  0x35   : > { %414 = vst.msk [vmem:[#allocation2 + $0x188] sm:$0xff] %vm363_vm0, %v9614_v1 }
  0x36   : > { %416 = vst.msk [vmem:[#allocation2 + $0x198] sm:$0xff] %vm363_vm0, %v9614_v1 }
  0x37   : > { %417 = vst.msk [vmem:[#allocation2 + $0x1a0] sm:$0xff] %vm363_vm0, %v9614_v1 }
  0x38   : > { %422 = vst.msk [vmem:[#allocation2 + $0x31] sm:$0xff] %vm363_vm0, %v333_v4 }
  0x39   : > { %420 = vst.msk [vmem:[#allocation2 + $0x19] sm:$0xff] %vm363_vm0, %v331_v5 }
  0x3a   : > { %373 = vst.msk [vmem:[#allocation2 + $0x40] sm:$0x3] %vm366_vm1, %v9614_v1 }
  0x3b   : > { %423 = vst.msk [vmem:[#allocation2 + $0x39] sm:$0xff] %vm363_vm0, %v334_v6 }
  0x3c   : > { %367 = vst.msk [vmem:[#allocation2 + $0x10] sm:$0x3] %vm366_vm1, %v9614_v1 }
  0x3d   : > { %370 = vst.msk [vmem:[#allocation2 + $0x28] sm:$0x3] %vm366_vm1, %v9614_v1 }
  0x3e   : > { %376 = vst.msk [vmem:[#allocation2 + $0x58] sm:$0x3] %vm366_vm1, %v9614_v1 }
  0x3f   : > { %v7194_v7 = vld [vmem:[#allocation2 + $0x30] sm:$0xff]  ;;  %379 = vst.msk [vmem:[#allocation2 + $0x70] sm:$0x3] %vm366_vm1, %v9614_v1 }
  0x40   : > { %508 = vperm.xlu2 %6758, %v7194_v7   ;;  %v7199_v8 = vld [vmem:[#allocation2 + $0x18] sm:$0xff]  ;;  %382 = vst.msk [vmem:[#allocation2 + $0x88] sm:$0x3] %vm366_vm1, %v9614_v1 }
  0x41   : > { %498 = vperm.xlu1 %6757, %v7199_v8   ;;  %385 = vst.msk [vmem:[#allocation2 + $0xa0] sm:$0x3] %vm366_vm1, %v9614_v1  ;;  %v7371_v5 = vld [vmem:[#allocation2 + $0x19] sm:$0xff]  ;;  %v7373_v6 = vld [vmem:[#allocation2 + $0x31] sm:$0xff] }
  0x42   : > { %388 = vst.msk [vmem:[#allocation2 + $0xb8] sm:$0x3] %vm366_vm1, %v9614_v1  ;;  %v7212_v9 = vld [vmem:[#allocation2 + $0x38] sm:$0xff] }
  0x43   : > { %391 = vst.msk [vmem:[#allocation2 + $0xd0] sm:$0x3] %vm366_vm1, %v9614_v1  ;;  %v712_v2 = vld [vmem:[#allocation2 + $0x9] sm:$0xff] }
  0x44   : > { %394 = vst.msk [vmem:[#allocation2 + $0xe8] sm:$0x3] %vm366_vm1, %v9614_v1 }
  0x45   : > { %397 = vst.msk [vmem:[#allocation2 + $0x100] sm:$0x3] %vm366_vm1, %v9614_v1 }
  0x46   : > { %400 = vst.msk [vmem:[#allocation2 + $0x118] sm:$0x3] %vm366_vm1, %v9614_v1 }
  0x47   : > { %403 = vst.msk [vmem:[#allocation2 + $0x130] sm:$0x3] %vm366_vm1, %v9614_v1 }
  0x48   : > { %513 = vperm.xlu2 %6758, %v7212_v9   ;;  %406 = vst.msk [vmem:[#allocation2 + $0x148] sm:$0x3] %vm366_vm1, %v9614_v1 }
  0x49   : > { %409 = vst.msk [vmem:[#allocation2 + $0x160] sm:$0x3] %vm366_vm1, %v9614_v1 }
  0x4a   : > { %412 = vst.msk [vmem:[#allocation2 + $0x178] sm:$0x3] %vm366_vm1, %v9614_v1 }
  0x4b   : > { %415 = vst.msk [vmem:[#allocation2 + $0x190] sm:$0x3] %vm366_vm1, %v9614_v1 }
  0x4c   : > { %418 = vst.msk [vmem:[#allocation2 + $0x1a8] sm:$0x3] %vm366_vm1, %v9614_v1  ;;  %vm6097_vm1 = vcmask 57344  }
  0x4d   : > { %421 = vst.msk [vmem:[#allocation2 + $0x21] sm:$0xff] %vm363_vm0, %v332_v10 }
  0x4e   : > { %424 = vst.msk [vmem:[#allocation2 + $0x49] sm:$0xff] %vm363_vm0, %v335_v11 }
  0x4f   : > { %426 = vst.msk [vmem:[#allocation2 + $0x61] sm:$0xff] %vm363_vm0, %v337_v12  ;;  %v7382_v12 = vld [vmem:[#allocation2 + $0x39] sm:$0xff] }
  0x50   : > { %425 = vst.msk [vmem:[#allocation2 + $0x51] sm:$0xff] %vm363_vm0, %v336_v13 }
  0x51   : > { %427 = vst.msk [vmem:[#allocation2 + $0x69] sm:$0xff] %vm363_vm0, %v338_v14 }
  0x52   : > { %428 = vst.msk [vmem:[#allocation2 + $0x79] sm:$0xff] %vm363_vm0, %v339_v15 }
  0x53   : > { %429 = vst.msk [vmem:[#allocation2 + $0x81] sm:$0xff] %vm363_vm0, %v340_v16 }
  0x54   : > { %v7248_v20 = vld [vmem:[#allocation2 + $0x20] sm:$0xff]  ;;  %430 = vst.msk [vmem:[#allocation2 + $0x91] sm:$0xff] %vm363_vm0, %v341_v17 }
  0x55   : > { %503 = vperm.xlu1 %6757, %v7248_v20   ;;  %v7253_v22 = vld [vmem:[#allocation2 + $0x48] sm:$0xff]  ;;  %432 = vst.msk [vmem:[#allocation2 + $0xa9] sm:$0xff] %vm363_vm0, %v343_v18 }
  0x56   : > { %518 = vperm.xlu0 %6756, %v7253_v22   ;;  %v7258_v24 = vld [vmem:[#allocation2 + $0x60] sm:$0xff]  ;;  %431 = vst.msk [vmem:[#allocation2 + $0x99] sm:$0xff] %vm363_vm0, %v342_v19  ;;  %v7375_v10 = vld [vmem:[#allocation2 + $0x49] sm:$0xff] }
  0x57   : > { %528 = vperm.xlu2 %6758, %v7258_v24   ;;  %433 = vst.msk [vmem:[#allocation2 + $0xb1] sm:$0xff] %vm363_vm0, %v344_v21  ;;  %v7269_v29 = vld [vmem:[#allocation2 + $0x50] sm:$0xff]  ;;  %v7365_v3 = vld [vmem:[#allocation2 + $0x21] sm:$0xff] }
  0x58   : > { %434 = vst.msk [vmem:[#allocation2 + $0xc1] sm:$0xff] %vm363_vm0, %v345_v23  ;;  %v7273_v31 = vld [vmem:[#allocation2 + $0x68] sm:$0xff]  ;;  %v7384_v13 = vld [vmem:[#allocation2 + $0x51] sm:$0xff] }
  0x59   : > { %435 = vst.msk [vmem:[#allocation2 + $0xc9] sm:$0xff] %vm363_vm0, %v346_v25  ;;  %v7289_v36 = vld [vmem:[#allocation2 + $0x78] sm:$0xff]  ;;  %v720_v14 = vld [vmem:[#allocation2 + $0x69] sm:$0xff]  ;;  %v719_v16 = vld [vmem:[#allocation2 + $0x61] sm:$0xff] }
  0x5a   : > { %436 = vst.msk [vmem:[#allocation2 + $0xd9] sm:$0xff] %vm363_vm0, %v347_v26  ;;  %v7276_v32 = vld [vmem:[#allocation2 + $0x80] sm:$0xff] }
  0x5b   : > { %438 = vst.msk [vmem:[#allocation2 + $0xf1] sm:$0xff] %vm363_vm0, %v349_v27  ;;  %v7291_v37 = vld [vmem:[#allocation2 + $0x90] sm:$0xff]  ;;  %v721_v17 = vld [vmem:[#allocation2 + $0x79] sm:$0xff]  ;;  %v722_v23 = vld [vmem:[#allocation2 + $0x81] sm:$0xff] }
  0x5c   : > { %437 = vst.msk [vmem:[#allocation2 + $0xe1] sm:$0xff] %vm363_vm0, %v348_v28  ;;  %v7293_v38 = vld [vmem:[#allocation2 + $0xa8] sm:$0xff]  ;;  %v723_v19 = vld [vmem:[#allocation2 + $0x91] sm:$0xff] }
  0x5d   : > { %523 = vperm.xlu1 %6757, %v7269_v29   ;;  %439 = vst.msk [vmem:[#allocation2 + $0xf9] sm:$0xff] %vm363_vm0, %v350_v30  ;;  %v7304_v42 = vld [vmem:[#allocation2 + $0x98] sm:$0xff] }
  0x5e   : > { %533 = vperm.xlu0 %6756, %v7273_v31   ;;  %440 = vst.msk [vmem:[#allocation2 + $0x109] sm:$0xff] %vm363_vm0, %v351_v33  ;;  %v7306_v43 = vld [vmem:[#allocation2 + $0xb0] sm:$0xff]  ;;  %v724_v25 = vld [vmem:[#allocation2 + $0x99] sm:$0xff] }
  0x5f   : > { %543 = vperm.xlu2 %6758, %v7276_v32   ;;  %441 = vst.msk [vmem:[#allocation2 + $0x111] sm:$0xff] %vm363_vm0, %v352_v34  ;;  %v7319_v48 = vld [vmem:[#allocation2 + $0xc0] sm:$0xff]  ;;  %v726_v26 = vld [vmem:[#allocation2 + $0xb1] sm:$0xff]  ;;  %v725_v33 = vld [vmem:[#allocation2 + $0xa9] sm:$0xff] }
  0x60   : > { %442 = vst.msk [vmem:[#allocation2 + $0x121] sm:$0xff] %vm363_vm0, %v353_v35  ;;  %v7308_v44 = vld [vmem:[#allocation2 + $0xc8] sm:$0xff] }
  0x61   : > { %444 = vst.msk [vmem:[#allocation2 + $0x139] sm:$0xff] %vm363_vm0, %v355_v39  ;;  %v7321_v49 = vld [vmem:[#allocation2 + $0xd8] sm:$0xff]  ;;  %v727_v34 = vld [vmem:[#allocation2 + $0xc1] sm:$0xff] }
  0x62   : > { %443 = vst.msk [vmem:[#allocation2 + $0x129] sm:$0xff] %vm363_vm0, %v354_v40  ;;  %v7323_v50 = vld [vmem:[#allocation2 + $0xf0] sm:$0xff]  ;;  %v729_v35 = vld [vmem:[#allocation2 + $0xd9] sm:$0xff] }
  0x63   : > { %445 = vst.msk [vmem:[#allocation2 + $0x141] sm:$0xff] %vm363_vm0, %v356_v41  ;;  %v7330_v52 = vld [vmem:[#allocation2 + $0xe0] sm:$0xff] }
  0x64   : > { %446 = vst.msk [vmem:[#allocation2 + $0x151] sm:$0xff] %vm363_vm0, %v357_v45  ;;  %v7332_v53 = vld [vmem:[#allocation2 + $0xf8] sm:$0xff]  ;;  %v728_v45 = vld [vmem:[#allocation2 + $0xc9] sm:$0xff] }
  0x65   : > { %538 = vperm.xlu1 %6757, %v7289_v36   ;;  %447 = vst.msk [vmem:[#allocation2 + $0x159] sm:$0xff] %vm363_vm0, %v358_v46  ;;  %v7339_v55 = vld [vmem:[#allocation2 + $0x108] sm:$0xff] }
  0x66   : > { %548 = vperm.xlu0 %6756, %v7291_v37   ;;  %448 = vst.msk [vmem:[#allocation2 + $0x169] sm:$0xff] %vm363_vm0, %v359_v47  ;;  %v7334_v54 = vld [vmem:[#allocation2 + $0x110] sm:$0xff]  ;;  %v730_v46 = vld [vmem:[#allocation2 + $0xe1] sm:$0xff]  ;;  %v732_v47 = vld [vmem:[#allocation2 + $0xf9] sm:$0xff] }
  0x67   : > { %558 = vperm.xlu2 %6758, %v7293_v38   ;;  %449 = vst.msk [vmem:[#allocation2 + $0x171] sm:$0xff] %vm363_vm0, %v360_v51  ;;  %v7341_v56 = vld [vmem:[#allocation2 + $0x120] sm:$0xff] }
  0x68   : > { %v7343_v57 = vld [vmem:[#allocation2 + $0x138] sm:$0xff] }
  0x69   : > { %v7348_v58 = vld [vmem:[#allocation2 + $0x128] sm:$0xff] }
  0x6a   : > { %v7350_v59 = vld [vmem:[#allocation2 + $0x140] sm:$0xff] }
  0x6b   : > { %v7357_v61 = vld [vmem:[#allocation2 + $0x150] sm:$0xff] }
  0x6c   : > { %v7352_v60 = vld [vmem:[#allocation2 + $0x158] sm:$0xff] }
  0x6d   : > { %553 = vperm.xlu1 %6757, %v7304_v42   ;;  %v7359_v62 = vld [vmem:[#allocation2 + $0x168] sm:$0xff] }
  0x6e   : > { %563 = vperm.xlu0 %6756, %v7306_v43   ;;  %v7363_v0 = vld [vmem:[#allocation2 + $0x170] sm:$0xff] }
  0x6f   : > { %573 = vperm.xlu2 %6758, %v7308_v44  }
  0x75   : > { %568 = vperm.xlu1 %6757, %v7319_v48  }
  0x76   : > { %578 = vperm.xlu0 %6756, %v7321_v49  }
  0x77   : > { %588 = vperm.xlu2 %6758, %v7323_v50  }
  0x7d   : > { %583 = vperm.xlu1 %6757, %v7330_v52  }
  0x7e   : > { %593 = vperm.xlu0 %6756, %v7332_v53  }
  0x7f   : > { %603 = vperm.xlu2 %6758, %v7334_v54  }
  0x85   : > { %598 = vperm.xlu1 %6757, %v7339_v55  }
  0x86   : > { %608 = vperm.xlu0 %6756, %v7341_v56  }
  0x87   : > { %618 = vperm.xlu2 %6758, %v7343_v57  }
  0x8d   : > { %613 = vperm.xlu1 %6757, %v7348_v58  }
  0x8e   : > { %623 = vperm.xlu0 %6756, %v7350_v59   ;;  %v7390_v18 = vpop.permute.xlu0 %488 }
  0x8f   : > { %633 = vperm.xlu2 %6758, %v7352_v60  }
  0x95   : > { %628 = vperm.xlu1 %6757, %v7357_v61  }
  0x96   : > { %638 = vperm.xlu0 %6756, %v7359_v62   ;;  %v7396_v28 = vpop.permute.xlu0 %493 }
  0x97   : > { %745 = vperm.xlu2 %6758, %v711_v63   ;;  %9636 = vst [vmem:[#allocation13_spill] sm:$0xff] %v7396_v28 }
  0x9a   : > { %v7368_v4 = vpop.permute.xlu2 %508 }
  0x9b   : > { %9632 = vst [vmem:[#allocation9_spill] sm:$0xff] %v7368_v4 }
  0x9d   : > { %643 = vperm.xlu1 %6757, %v7363_v0  }
  0x9e   : > { %750 = vperm.xlu0 %6756, %v712_v2  }
  0x9f   : > { %760 = vperm.xlu2 %6758, %v7365_v3  }
  0xa2   : > { %v7380_v11 = vpop.permute.xlu2 %513 }
  0xa3   : > { %9633 = vst [vmem:[#allocation10_spill] sm:$0xff] %v7380_v11  ;;  %v984_v11 = vld [vmem:[#allocation2 + $0xc2] sm:$0xff] }
  0xa5   : > { %755 = vperm.xlu1 %6757, %v7371_v5  }
  0xa6   : > { %765 = vperm.xlu0 %6756, %v7373_v6  }
  0xa7   : > { %775 = vperm.xlu2 %6758, %v7375_v10  }
  0xad   : > { %770 = vperm.xlu1 %6757, %v7382_v12  }
  0xae   : > { %780 = vperm.xlu0 %6756, %v7384_v13  }
  0xaf   : > { %790 = vperm.xlu2 %6758, %v720_v14   ;;  %v731_v14 = vld [vmem:[#allocation2 + $0xf1] sm:$0xff] }
  0xb1   : > { %v7388_v15 = vpop.permute.xlu2 %528 }
  0xb2   : > { %9634 = vst [vmem:[#allocation11_spill] sm:$0xff] %v7388_v15  ;;  %v987_v15 = vld [vmem:[#allocation2 + $0xe2] sm:$0xff] }
  0xb3   : > { %v7394_v27 = vpop.permute.xlu1 %498 }
  0xb5   : > { %785 = vperm.xlu1 %6757, %v719_v16   ;;  %v733_v16 = vld [vmem:[#allocation2 + $0x109] sm:$0xff] }
  0xb6   : > { %795 = vperm.xlu0 %6756, %v721_v17   ;;  %v735_v17 = vld [vmem:[#allocation2 + $0x121] sm:$0xff] }
  0xb7   : > { %805 = vperm.xlu2 %6758, %v723_v19  }
  0xb9   : > { %v7392_v21 = vpop.permute.xlu2 %543 }
  0xba   : > { %9635 = vst [vmem:[#allocation12_spill] sm:$0xff] %v7392_v21 }
  0xbd   : > { %800 = vperm.xlu1 %6757, %v722_v23  }
  0xbe   : > { %810 = vperm.xlu0 %6756, %v724_v25  }
  0xbf   : > { %820 = vperm.xlu2 %6758, %v726_v26   ;;  %v734_v26 = vld [vmem:[#allocation2 + $0x111] sm:$0xff] }
  0xc1   : > { %v7398_v30 = vpop.permute.xlu2 %558 }
  0xc2   : > { %9637 = vst [vmem:[#allocation14_spill] sm:$0xff] %v7398_v30  ;;  %v7480_v30 = vld [vmem:[#allocation2 + $0x82] sm:$0xff] }
  0xc5   : > { %815 = vperm.xlu1 %6757, %v725_v33   ;;  %v736_v33 = vld [vmem:[#allocation2 + $0x129] sm:$0xff] }
  0xc6   : > { %825 = vperm.xlu0 %6756, %v727_v34   ;;  %v738_v34 = vld [vmem:[#allocation2 + $0x141] sm:$0xff] }
  0xc7   : > { %v7400_v39 = vpop.permute.xlu1 %503  ;;  %835 = vperm.xlu2 %6758, %v729_v35  }
  0xc8   : > { %9638 = vst [vmem:[#allocation15_spill] sm:$0xff] %v7400_v39  ;;  %v7402_v40 = vpop.permute.xlu0 %518  ;;  %v988_v39 = vld [vmem:[#allocation2 + $0xf2] sm:$0xff] }
  0xc9   : > { %9639 = vst [vmem:[#allocation16_spill] sm:$0xff] %v7402_v40  ;;  %v7404_v41 = vpop.permute.xlu2 %573 }
  0xca   : > { %9640 = vst [vmem:[#allocation17_spill] sm:$0xff] %v7404_v41  ;;  %v7465_v41 = vld [vmem:[#allocation2 + $0x62] sm:$0xff] }
  0xcd   : > { %830 = vperm.xlu1 %6757, %v728_v45  }
  0xce   : > { %840 = vperm.xlu0 %6756, %v730_v46  }
  0xcf   : > { %v7406_v51 = vpop.permute.xlu1 %523  ;;  %850 = vperm.xlu2 %6758, %v732_v47   ;;  %v737_v47 = vld [vmem:[#allocation2 + $0x139] sm:$0xff] }
  0xd0   : > { %9641 = vst [vmem:[#allocation18_spill] sm:$0xff] %v7406_v51  ;;  %v7408_v63 = vpop.permute.xlu0 %533 }
  0xd1   : > { %9642 = vst [vmem:[#allocation19_spill] sm:$0xff] %v7408_v63  ;;  %v7410_v2 = vpop.permute.xlu2 %588 }
  0xd2   : > { %9643 = vst [vmem:[#allocation20_spill] sm:$0xff] %v7410_v2 }
  0xd5   : > { %845 = vperm.xlu1 %6757, %v731_v14   ;;  %v739_v14 = vld [vmem:[#allocation2 + $0x151] sm:$0xff] }
  0xd6   : > { %855 = vperm.xlu0 %6756, %v733_v16   ;;  %v741_v16 = vld [vmem:[#allocation2 + $0x169] sm:$0xff] }
  0xd7   : > { %v7412_v19 = vpop.permute.xlu1 %538  ;;  %865 = vperm.xlu2 %6758, %v735_v17  }
  0xd8   : > { %9644 = vst [vmem:[#allocation21_spill] sm:$0xff] %v7412_v19  ;;  %v7414_v23 = vpop.permute.xlu0 %548 }
  0xd9   : > { %9645 = vst [vmem:[#allocation22_spill] sm:$0xff] %v7414_v23  ;;  %v7416_v25 = vpop.permute.xlu2 %603  ;;  %v7482_v23 = vld [vmem:[#allocation2 + $0x9a] sm:$0xff] }
  0xda   : > { %9646 = vst [vmem:[#allocation23_spill] sm:$0xff] %v7416_v25 }
  0xdd   : > { %860 = vperm.xlu1 %6757, %v734_v26   ;;  %v740_v26 = vld [vmem:[#allocation2 + $0x159] sm:$0xff] }
  0xde   : > { %870 = vperm.xlu0 %6756, %v736_v33   ;;  %v742_v33 = vld [vmem:[#allocation2 + $0x171] sm:$0xff] }
  0xdf   : > { %v7418_v35 = vpop.permute.xlu1 %553  ;;  %880 = vperm.xlu2 %6758, %v738_v34  }
  0xe0   : > { %9647 = vst [vmem:[#allocation24_spill] sm:$0xff] %v7418_v35  ;;  %v7420_v45 = vpop.permute.xlu0 %563  ;;  %v969_v35 = vld [vmem:[#allocation2 + $0xa] sm:$0xff] }
  0xe1   : > { %9648 = vst [vmem:[#allocation25_spill] sm:$0xff] %v7420_v45  ;;  %v7422_v46 = vpop.permute.xlu2 %618 }
  0xe2   : > { %9649 = vst [vmem:[#allocation26_spill] sm:$0xff] %v7422_v46 }
  0xe5   : > { %875 = vperm.xlu1 %6757, %v737_v47   ;;  %v968_v47 = vld [vmem:[#allocation2 + $0x2] sm:$0xff] }
  0xe6   : > { %885 = vperm.xlu0 %6756, %v739_v14   ;;  %v7436_v14 = vld [vmem:[#allocation2 + $0x1a] sm:$0xff] }
  0xe7   : > { %v7424_v17 = vpop.permute.xlu1 %568  ;;  %895 = vperm.xlu2 %6758, %v741_v16   ;;  %v7438_v16 = vld [vmem:[#allocation2 + $0x32] sm:$0xff] }
  0xe8   : > { %9650 = vst [vmem:[#allocation27_spill] sm:$0xff] %v7424_v17  ;;  %v7426_v1 = vpop.permute.xlu0 %578  ;;  %v7467_v17 = vld [vmem:[#allocation2 + $0x7a] sm:$0xff] }
  0xe9   : > { %9651 = vst [vmem:[#allocation28_spill] sm:$0xff] %v7426_v1  ;;  %v7428_v25 = vpop.permute.xlu2 %633 }
  0xea   : > { %9652 = vst [vmem:[#allocation29_spill] sm:$0xff] %v7428_v25 }
  0xed   : > { %890 = vperm.xlu1 %6757, %v740_v26  }
  0xee   : > { %900 = vperm.xlu0 %6756, %v742_v33  }
  0xef   : > { %v7430_v34 = vpop.permute.xlu1 %583  ;;  %1009 = vperm.xlu2 %6758, %v969_v35   ;;  %v7448_v35 = vld [vmem:[#allocation2 + $0x22] sm:$0xff] }
  0xf0   : > { %9653 = vst [vmem:[#allocation30_spill] sm:$0xff] %v7430_v34  ;;  %v7432_v46 = vpop.permute.xlu0 %593  ;;  %v7452_v34 = vld [vmem:[#allocation2 + $0x52] sm:$0xff] }
  0xf1   : > { %9654 = vst [vmem:[#allocation31_spill] sm:$0xff] %v7432_v46  ;;  %v7434_v45 = vpop.permute.xlu2 %745  ;;  %v7450_v46 = vld [vmem:[#allocation2 + $0x3a] sm:$0xff] }
  0xf5   : > { %1004 = vperm.xlu1 %6757, %v968_v47  }
  0xf6   : > { %1014 = vperm.xlu0 %6756, %v7436_v14  }
  0xf7   : > { %v7441_v25 = vpop.permute.xlu1 %598  ;;  %1024 = vperm.xlu2 %6758, %v7438_v16  }
  0xf8   : > { %9655 = vst [vmem:[#allocation32_spill] sm:$0xff] %v7441_v25  ;;  %v7444_v26 = vpop.permute.xlu0 %608 }
  0xf9   : > { %9656 = vst [vmem:[#allocation33_spill] sm:$0xff] %v7444_v26  ;;  %v7446_v33 = vpop.permute.xlu2 %760  ;;  %v7463_v26 = vld [vmem:[#allocation2 + $0x4a] sm:$0xff] }
  0xfa   : > { %9657 = vst [vmem:[#allocation34_spill] sm:$0xff] %v7446_v33  ;;  %v990_v33 = vld [vmem:[#allocation2 + $0x10a] sm:$0xff] }
  0xfd   : > { %1019 = vperm.xlu1 %6757, %v7448_v35  }
  0xfe   : > { %1029 = vperm.xlu0 %6756, %v7450_v46  }
  0xff   : > { %v7456_v47 = vpop.permute.xlu1 %613  ;;  %1039 = vperm.xlu2 %6758, %v7452_v34  }
 0x100   : > { %9658 = vst [vmem:[#allocation35_spill] sm:$0xff] %v7456_v47  ;;  %v7459_v25 = vpop.permute.xlu0 %623 }
 0x101   : > { %9659 = vst [vmem:[#allocation36_spill] sm:$0xff] %v7459_v25  ;;  %v7461_v2 = vpop.permute.xlu2 %775  ;;  %v7478_v25 = vld [vmem:[#allocation2 + $0x6a] sm:$0xff] }
 0x102   : > { %9660 = vst [vmem:[#allocation37_spill] sm:$0xff] %v7461_v2  ;;  %v985_v2 = vld [vmem:[#allocation2 + $0xca] sm:$0xff] }
 0x105   : > { %1034 = vperm.xlu1 %6757, %v7463_v26  }
 0x106   : > { %1044 = vperm.xlu0 %6756, %v7465_v41  }
 0x107   : > { %v7471_v1 = vpop.permute.xlu1 %628  ;;  %1054 = vperm.xlu2 %6758, %v7467_v17  }
 0x108   : > { %9661 = vst [vmem:[#allocation38_spill] sm:$0xff] %v7471_v1  ;;  %v7474_v47 = vpop.permute.xlu0 %638 }
 0x109   : > { %9662 = vst [vmem:[#allocation39_spill] sm:$0xff] %v7474_v47  ;;  %v7476_v51 = vpop.permute.xlu2 %790  ;;  %v7493_v47 = vld [vmem:[#allocation2 + $0x92] sm:$0xff] }
 0x10a   : > { %9663 = vst [vmem:[#allocation40_spill] sm:$0xff] %v7476_v51  ;;  %v982_v51 = vld [vmem:[#allocation2 + $0xaa] sm:$0xff] }
 0x10d   : > { %1049 = vperm.xlu1 %6757, %v7478_v25  }
 0x10e   : > { %1059 = vperm.xlu0 %6756, %v7480_v30  }
 0x10f   : > { %v7486_v63 = vpop.permute.xlu1 %643  ;;  %1069 = vperm.xlu2 %6758, %v7482_v23  }
 0x110   : > { %9664 = vst [vmem:[#allocation41_spill] sm:$0xff] %v7486_v63  ;;  %v7489_v1 = vpop.permute.xlu0 %750  ;;  %v983_v63 = vld [vmem:[#allocation2 + $0xb2] sm:$0xff] }
 0x111   : > { %9665 = vst [vmem:[#allocation42_spill] sm:$0xff] %v7489_v1  ;;  %v7491_v21 = vpop.permute.xlu2 %805 }
 0x112   : > { %9666 = vst [vmem:[#allocation43_spill] sm:$0xff] %v7491_v21 }
 0x115   : > { %1064 = vperm.xlu1 %6757, %v7493_v47  }
 0x116   : > { %1074 = vperm.xlu0 %6756, %v982_v51   ;;  %v986_v51 = vld [vmem:[#allocation2 + $0xda] sm:$0xff] }
 0x117   : > { %v7496_v4 = vpop.permute.xlu1 %755  ;;  %1084 = vperm.xlu2 %6758, %v984_v11  }
 0x118   : > { %v7498_v19 = vpop.permute.xlu0 %765 }
 0x119   : > { %9667 = vst [vmem:[#allocation44_spill] sm:$0xff] %v7498_v19  ;;  %v7500_v40 = vpop.permute.xlu2 %820 }
 0x11a   : > { %9668 = vst [vmem:[#allocation45_spill] sm:$0xff] %v7500_v40 }
 0x11d   : > { %1079 = vperm.xlu1 %6757, %v983_v63   ;;  %v989_v63 = vld [vmem:[#allocation2 + $0xfa] sm:$0xff] }
 0x11e   : > { %1089 = vperm.xlu0 %6756, %v985_v2   ;;  %v991_v2 = vld [vmem:[#allocation2 + $0x112] sm:$0xff] }
 0x11f   : > { %v7502_v21 = vpop.permute.xlu1 %770  ;;  %1099 = vperm.xlu2 %6758, %v987_v15  }
 0x120   : > { %9669 = vst [vmem:[#allocation46_spill] sm:$0xff] %v7502_v21  ;;  %v7504_v28 = vpop.permute.xlu0 %780  ;;  %v993_v21 = vld [vmem:[#allocation2 + $0x12a] sm:$0xff] }
 0x121   : > { %9670 = vst [vmem:[#allocation47_spill] sm:$0xff] %v7504_v28  ;;  %v7506_v1 = vpop.permute.xlu2 %835 }
 0x122   : > { %9671 = vst [vmem:[#allocation48_spill] sm:$0xff] %v7506_v1 }
 0x125   : > { %1094 = vperm.xlu1 %6757, %v986_v51   ;;  %v994_v51 = vld [vmem:[#allocation2 + $0x13a] sm:$0xff] }
 0x126   : > { %1104 = vperm.xlu0 %6756, %v988_v39   ;;  %v992_v39 = vld [vmem:[#allocation2 + $0x122] sm:$0xff] }
 0x127   : > { %v7508_v11 = vpop.permute.xlu1 %785  ;;  %1114 = vperm.xlu2 %6758, %v990_v33  }
 0x128   : > { %9672 = vst [vmem:[#allocation49_spill] sm:$0xff] %v7508_v11  ;;  %v7510_v40 = vpop.permute.xlu0 %795  ;;  %v996_v11 = vld [vmem:[#allocation2 + $0x152] sm:$0xff] }
 0x129   : > { %9673 = vst [vmem:[#allocation50_spill] sm:$0xff] %v7510_v40  ;;  %v7512_v19 = vpop.permute.xlu2 %850 }
 0x12a   : > { %9674 = vst [vmem:[#allocation51_spill] sm:$0xff] %v7512_v19 }
 0x12d   : > { %1109 = vperm.xlu1 %6757, %v989_v63   ;;  %v995_v63 = vld [vmem:[#allocation2 + $0x142] sm:$0xff] }
 0x12e   : > { %1119 = vperm.xlu0 %6756, %v991_v2   ;;  %v997_v2 = vld [vmem:[#allocation2 + $0x15a] sm:$0xff] }
 0x12f   : > { %v7514_v15 = vpop.permute.xlu1 %800  ;;  %1129 = vperm.xlu2 %6758, %v993_v21  }
 0x130   : > { %9675 = vst [vmem:[#allocation52_spill] sm:$0xff] %v7514_v15  ;;  %v7516_v1 = vpop.permute.xlu0 %810  ;;  %v999_v15 = vld [vmem:[#allocation2 + $0x172] sm:$0xff] }
 0x131   : > { %9676 = vst [vmem:[#allocation53_spill] sm:$0xff] %v7516_v1  ;;  %v7518_v28 = vpop.permute.xlu2 %865 }
 0x132   : > { %9677 = vst [vmem:[#allocation54_spill] sm:$0xff] %v7518_v28 }
 0x135   : > { %1124 = vperm.xlu1 %6757, %v992_v39   ;;  %v998_v39 = vld [vmem:[#allocation2 + $0x16a] sm:$0xff] }
 0x136   : > { %1134 = vperm.xlu0 %6756, %v994_v51  }
 0x137   : > { %v7520_v33 = vpop.permute.xlu1 %815  ;;  %1144 = vperm.xlu2 %6758, %v996_v11  }
 0x138   : > { %v7522_v19 = vpop.permute.xlu0 %825 }
 0x139   : > { %v7524_v40 = vpop.permute.xlu2 %880 }
 0x13a   : > { %9678 = vst [vmem:[#allocation55_spill] sm:$0xff] %v7524_v40 }
 0x13d   : > { %1139 = vperm.xlu1 %6757, %v995_v63  }
 0x13e   : > { %1149 = vperm.xlu0 %6756, %v997_v2  }
 0x13f   : > { %v7526_v21 = vpop.permute.xlu1 %830  ;;  %1159 = vperm.xlu2 %6758, %v999_v15  }
 0x140   : > { %9679 = vst [vmem:[#allocation56_spill] sm:$0xff] %v7526_v21  ;;  %v7528_v28 = vpop.permute.xlu0 %840 }
 0x141   : > { %9680 = vst [vmem:[#allocation57_spill] sm:$0xff] %v7528_v28  ;;  %v7530_v1 = vpop.permute.xlu2 %895 }
 0x142   : > { %9681 = vst [vmem:[#allocation58_spill] sm:$0xff] %v7530_v1 }
 0x145   : > { %1154 = vperm.xlu1 %6757, %v998_v39  }
 0x146   : > { %1261 = vperm.xlu0 %6756, %v7199_v8  }
 0x147   : > { %v7533_v11 = vpop.permute.xlu1 %845  ;;  %1271 = vperm.xlu2 %6758, %v7194_v7  }
 0x148   : > { %9682 = vst [vmem:[#allocation59_spill] sm:$0xff] %v7533_v11  ;;  %v7536_v51 = vpop.permute.xlu0 %855 }
 0x149   : > { %9683 = vst [vmem:[#allocation60_spill] sm:$0xff] %v7536_v51  ;;  %v7538_v40 = vpop.permute.xlu2 %1009  ;;  %v2525_v51 = vld [vmem:[#allocation2 + $0x92] sm:$0xff] }
 0x14d   : > { %1266 = vperm.xlu1 %6757, %v7248_v20  }
 0x14e   : > { %1276 = vperm.xlu0 %6756, %v7212_v9  }
 0x14f   : > { %v7542_v15 = vpop.permute.xlu1 %860  ;;  %1286 = vperm.xlu2 %6758, %v7269_v29  }
 0x150   : > { %9684 = vst [vmem:[#allocation61_spill] sm:$0xff] %v7542_v15  ;;  %v7545_v63 = vpop.permute.xlu0 %870 }
 0x151   : > { %9685 = vst [vmem:[#allocation62_spill] sm:$0xff] %v7545_v63  ;;  %v7547_v2 = vpop.permute.xlu2 %1024  ;;  %v1494_v63 = vld [vmem:[#allocation2 + $0x91] sm:$0xff] }
 0x155   : > { %1281 = vperm.xlu1 %6757, %v7253_v22  }
 0x156   : > { %1291 = vperm.xlu0 %6756, %v7258_v24  }
 0x157   : > { %v7551_v7 = vpop.permute.xlu1 %875  ;;  %1301 = vperm.xlu2 %6758, %v7289_v36   ;;  %v361_v36 = vld [vmem:[%s7168_s25 + $0xf0] sm:$0xff] }
 0x158   : > { %9686 = vst [vmem:[#allocation63_spill] sm:$0xff] %v7551_v7  ;;  %v7554_v8 = vpop.permute.xlu0 %885 }
 0x159   : > { %9687 = vst [vmem:[#allocation64_spill] sm:$0xff] %v7554_v8  ;;  %v7556_v9 = vpop.permute.xlu2 %1039  ;;  %v2004_v8 = vld [vmem:[#allocation2 + $0x50] sm:$0xff] }
 0x15a   : > { %450 = vst.msk [vmem:[#allocation2 + $0x181] sm:$0xff] %vm363_vm0, %v361_v36 }
 0x15d   : > { %1296 = vperm.xlu1 %6757, %v7273_v31  }
 0x15e   : > { %1306 = vperm.xlu0 %6756, %v7276_v32  }
 0x15f   : > { %v7560_v20 = vpop.permute.xlu1 %890  ;;  %1316 = vperm.xlu2 %6758, %v7304_v42  }
 0x160   : > { %9688 = vst [vmem:[#allocation65_spill] sm:$0xff] %v7560_v20  ;;  %v7563_v22 = vpop.permute.xlu0 %900 }
 0x161   : > { %9689 = vst [vmem:[#allocation66_spill] sm:$0xff] %v7563_v22  ;;  %v7565_v24 = vpop.permute.xlu2 %1054 }
 0x165   : > { %1311 = vperm.xlu1 %6757, %v7291_v37  }
 0x166   : > { %1321 = vperm.xlu0 %6756, %v7293_v38  }
 0x167   : > { %v7569_v29 = vpop.permute.xlu1 %1004  ;;  %1331 = vperm.xlu2 %6758, %v7319_v48   ;;  %v362_v48 = vld [vmem:[%s7168_s25 + $0xf8] sm:$0xff]  ;;  %s6100_s25 = scalar_lea.sflag [#allocation7], %s323_s14 }
 0x168   : > { %v7572_v31 = vpop.permute.xlu0 %1014  ;;  %451 = vst.msk [vmem:[#allocation2 + $0x189] sm:$0xff] %vm363_vm0, %v362_v48  ;;  %vm5789_vm0 = vcmask 130048  }
 0x169   : > { %v7574_v32 = vpop.permute.xlu2 %1069 }
 0x16a   : > { %9690 = vst [vmem:[#allocation67_spill] sm:$0xff] %v7574_v32 }
 0x16d   : > { %1326 = vperm.xlu1 %6757, %v7306_v43  }
 0x16e   : > { %1336 = vperm.xlu0 %6756, %v7308_v44  }
 0x16f   : > { %v7579_v42 = vpop.permute.xlu1 %1019  ;;  %1346 = vperm.xlu2 %6758, %v7330_v52  }
 0x170   : > { %v7583_v37 = vpop.permute.xlu0 %1029 }
 0x171   : > { %v7585_v38 = vpop.permute.xlu2 %1084 }
 0x175   : > { %1341 = vperm.xlu1 %6757, %v7321_v49  }
 0x176   : > { %1351 = vperm.xlu0 %6756, %v7323_v50  }
 0x177   : > { %v7591_v43 = vpop.permute.xlu1 %1034  ;;  %1361 = vperm.xlu2 %6758, %v7339_v55  }
 0x178   : > { %v7594_v44 = vpop.permute.xlu0 %1044 }
 0x179   : > { %v7596_v52 = vpop.permute.xlu2 %1099 }
 0x17a   : > { %9691 = vst [vmem:[#allocation68_spill] sm:$0xff] %v7596_v52 }
 0x17d   : > { %1356 = vperm.xlu1 %6757, %v7332_v53  }
 0x17e   : > { %1366 = vperm.xlu0 %6756, %v7334_v54  }
 0x17f   : > { %v7600_v39 = vpop.permute.xlu1 %1049  ;;  %1376 = vperm.xlu2 %6758, %v7348_v58  }
 0x180   : > { %9692 = vst [vmem:[#allocation69_spill] sm:$0xff] %v7600_v39  ;;  %v7603_v49 = vpop.permute.xlu0 %1059 }
 0x181   : > { %9693 = vst [vmem:[#allocation70_spill] sm:$0xff] %v7603_v49  ;;  %v7605_v36 = vpop.permute.xlu2 %1114 }
 0x182   : > { %9694 = vst [vmem:[#allocation71_spill] sm:$0xff] %v7605_v36  ;;  %v2011_v36 = vld [vmem:[#allocation2 + $0xa8] sm:$0xff] }
 0x185   : > { %1371 = vperm.xlu1 %6757, %v7341_v56  }
 0x186   : > { %1381 = vperm.xlu0 %6756, %v7343_v57   ;;  %v1257_v57 = vld [vmem:[#allocation2 + $0x180] sm:$0xff] }
 0x187   : > { %v7609_v50 = vpop.permute.xlu1 %1064  ;;  %1391 = vperm.xlu2 %6758, %v7357_v61  }
 0x188   : > { %9695 = vst [vmem:[#allocation72_spill] sm:$0xff] %v7609_v50  ;;  %v7612_v55 = vpop.permute.xlu0 %1074 }
 0x189   : > { %9696 = vst [vmem:[#allocation73_spill] sm:$0xff] %v7612_v55  ;;  %v7614_v53 = vpop.permute.xlu2 %1129 }
 0x18a   : > { %9697 = vst [vmem:[#allocation74_spill] sm:$0xff] %v7614_v53 }
 0x18d   : > { %1386 = vperm.xlu1 %6757, %v7350_v59  }
 0x18e   : > { %1396 = vperm.xlu0 %6756, %v7352_v60   ;;  %v1258_v60 = vld [vmem:[#allocation2 + $0x188] sm:$0xff] }
 0x18f   : > { %v7618_v54 = vpop.permute.xlu1 %1079  ;;  %1406 = vperm.xlu2 %6758, %v7363_v0  }
 0x190   : > { %9698 = vst [vmem:[#allocation75_spill] sm:$0xff] %v7618_v54  ;;  %v7621_v58 = vpop.permute.xlu0 %1089 }
 0x191   : > { %9699 = vst [vmem:[#allocation76_spill] sm:$0xff] %v7621_v58  ;;  %v7623_v56 = vpop.permute.xlu2 %1144  ;;  %v2005_v58 = vld [vmem:[#allocation2 + $0x60] sm:$0xff] }
 0x192   : > { %9700 = vst [vmem:[#allocation77_spill] sm:$0xff] %v7623_v56 }
 0x195   : > { %1401 = vperm.xlu1 %6757, %v7359_v62  }
 0x196   : > { %1411 = vperm.xlu0 %6756, %v1257_v57  }
 0x197   : > { %v7626_v61 = vpop.permute.xlu1 %1094  ;;  %1520 = vperm.xlu2 %6758, %v7371_v5  }
 0x198   : > { %9701 = vst [vmem:[#allocation78_spill] sm:$0xff] %v7626_v61  ;;  %v7629_v48 = vpop.permute.xlu0 %1104  ;;  %v2522_v61 = vld [vmem:[#allocation2 + $0x6a] sm:$0xff] }
 0x199   : > { %9702 = vst [vmem:[#allocation79_spill] sm:$0xff] %v7629_v48  ;;  %v7631_v59 = vpop.permute.xlu2 %1159  ;;  %v7717_v48 = vld [vmem:[#allocation2 + $0x69] sm:$0xff] }
 0x19a   : > { %9703 = vst [vmem:[#allocation80_spill] sm:$0xff] %v7631_v59 }
 0x19d   : > { %1416 = vperm.xlu1 %6757, %v1258_v60  }
 0x19e   : > { %1525 = vperm.xlu0 %6756, %v7365_v3   ;;  %v2003_v3 = vld [vmem:[#allocation2 + $0x48] sm:$0xff] }
 0x19f   : > { %v7634_v0 = vpop.permute.xlu1 %1109  ;;  %1535 = vperm.xlu2 %6758, %v7382_v12  }
 0x1a0   : > { %9704 = vst [vmem:[#allocation81_spill] sm:$0xff] %v7634_v0  ;;  %v7637_v56 = vpop.permute.xlu0 %1119  ;;  %v2001_v0 = vld [vmem:[#allocation2 + $0x30] sm:$0xff] }
 0x1a1   : > { %9705 = vst [vmem:[#allocation82_spill] sm:$0xff] %v7637_v56  ;;  %v7639_v62 = vpop.permute.xlu2 %1271 }
 0x1a5   : > { %1530 = vperm.xlu1 %6757, %v7373_v6  }
 0x1a6   : > { %1540 = vperm.xlu0 %6756, %v7375_v10  }
 0x1a7   : > { %v7643_v5 = vpop.permute.xlu1 %1124  ;;  %1777 = vperm.xlu2 %6758, %v7436_v14  }
 0x1a8   : > { %9706 = vst [vmem:[#allocation83_spill] sm:$0xff] %v7643_v5  ;;  %v7646_v57 = vpop.permute.xlu0 %1134 }
 0x1a9   : > { %9707 = vst [vmem:[#allocation84_spill] sm:$0xff] %v7646_v57  ;;  %v7648_v60 = vpop.permute.xlu2 %1286 }
 0x1aa   : > { %9708 = vst [vmem:[#allocation85_spill] sm:$0xff] %v7648_v60 }
 0x1ad   : > { %1545 = vperm.xlu1 %6757, %v7384_v13  }
 0x1ae   : > { %1787 = vperm.xlu0 %6756, %v7438_v16  }
 0x1af   : > { %v7652_v59 = vpop.permute.xlu1 %1139  ;;  %2047 = vperm.xlu2 %6758, %v2003_v3  }
 0x1b0   : > { %9709 = vst [vmem:[#allocation86_spill] sm:$0xff] %v7652_v59  ;;  %v7654_v56 = vpop.permute.xlu0 %1149 }
 0x1b1   : > { %9710 = vst [vmem:[#allocation87_spill] sm:$0xff] %v7654_v56  ;;  %v7656_v22 = vpop.permute.xlu2 %1301 }
 0x1b5   : > { %2037 = vperm.xlu1 %6757, %v2001_v0  }
 0x1b6   : > { %1782 = vperm.xlu0 %6756, %v7448_v35   ;;  %v2002_v35 = vld [vmem:[#allocation2 + $0x38] sm:$0xff] }
 0x1b7   : > { %v7659_v14 = vpop.permute.xlu1 %1154  ;;  %2294 = vperm.xlu2 %6758, %v7373_v6  }
 0x1b8   : > { %9711 = vst [vmem:[#allocation88_spill] sm:$0xff] %v7659_v14  ;;  %v7662_v53 = vpop.permute.xlu0 %1261 }
 0x1b9   : > { %v7664_v20 = vpop.permute.xlu2 %1316 }
 0x1ba   : > { %9712 = vst [vmem:[#allocation89_spill] sm:$0xff] %v7664_v20  ;;  %v2524_v20 = vld [vmem:[#allocation2 + $0x82] sm:$0xff] }
 0x1bd   : > { %1792 = vperm.xlu1 %6757, %v7450_v46  }
 0x1be   : > { %2304 = vperm.xlu0 %6756, %v7375_v10  }
 0x1bf   : > { %v7668_v3 = vpop.permute.xlu1 %1266  ;;  %2052 = vperm.xlu2 %6758, %v2004_v8  }
 0x1c0   : > { %v7670_v56 = vpop.permute.xlu0 %1276 }
 0x1c1   : > { %v7672_v0 = vpop.permute.xlu2 %1331 }
 0x1c2   : > { %9713 = vst [vmem:[#allocation90_spill] sm:$0xff] %v7672_v0 }
 0x1c5   : > { %2042 = vperm.xlu1 %6757, %v2002_v35  }
 0x1c6   : > { %2553 = vperm.xlu0 %6756, %v7438_v16   ;;  %v1490_v16 = vld [vmem:[#allocation2 + $0x61] sm:$0xff] }
 0x1c7   : > { %v7675_v6 = vpop.permute.xlu1 %1281  ;;  %2299 = vperm.xlu2 %6758, %v7382_v12  }
 0x1c8   : > { %v7678_v14 = vpop.permute.xlu0 %1291 }
 0x1c9   : > { %v7680_v59 = vpop.permute.xlu2 %1346 }
 0x1ca   : > { %9714 = vst [vmem:[#allocation91_spill] sm:$0xff] %v7680_v59 }
 0x1cd   : > { %2563 = vperm.xlu1 %6757, %v7463_v26  }
 0x1ce   : > { %2309 = vperm.xlu0 %6756, %v7384_v13   ;;  %v1492_v13 = vld [vmem:[#allocation2 + $0x79] sm:$0xff] }
 0x1cf   : > { %v7684_v10 = vpop.permute.xlu1 %1296  ;;  %2568 = vperm.xlu2 %6758, %v7452_v34  }
 0x1d0   : > { %9715 = vst [vmem:[#allocation92_spill] sm:$0xff] %v7684_v10  ;;  %v7687_v8 = vpop.permute.xlu0 %1306  ;;  %v7811_v10 = vld [vmem:[#allocation2 + $0xb1] sm:$0xff] }
 0x1d1   : > { %9716 = vst [vmem:[#allocation93_spill] sm:$0xff] %v7687_v8  ;;  %v7689_v35 = vpop.permute.xlu2 %1361 }
 0x1d2   : > { %9717 = vst [vmem:[#allocation94_spill] sm:$0xff] %v7689_v35 }
 0x1d5   : > { %2558 = vperm.xlu1 %6757, %v7450_v46   ;;  %v7706_v46 = vld [vmem:[#allocation2 + $0x81] sm:$0xff] }
 0x1d6   : > { %1550 = vperm.xlu0 %6756, %v1490_v16  }
 0x1d7   : > { %v7692_v12 = vpop.permute.xlu1 %1311  ;;  %1570 = vperm.xlu2 %6758, %v1494_v63  }
 0x1d8   : > { %v7694_v15 = vpop.permute.xlu0 %1321 }
 0x1d9   : > { %9718 = vst [vmem:[#allocation95_spill] sm:$0xff] %v7694_v15  ;;  %v7696_v1 = vpop.permute.xlu2 %1376 }
 0x1da   : > { %9719 = vst [vmem:[#allocation96_spill] sm:$0xff] %v7696_v1 }
 0x1dd   : > { %1560 = vperm.xlu1 %6757, %v1492_v13  }
 0x1de   : > { %1797 = vperm.xlu0 %6756, %v7463_v26  }
 0x1df   : > { %v7699_v57 = vpop.permute.xlu1 %1326  ;;  %1817 = vperm.xlu2 %6758, %v7467_v17   ;;  %v7719_v17 = vld [vmem:[#allocation2 + $0x99] sm:$0xff] }
 0x1e0   : > { %9720 = vst [vmem:[#allocation97_spill] sm:$0xff] %v7699_v57  ;;  %v7702_v35 = vpop.permute.xlu0 %1336  ;;  %v2009_v57 = vld [vmem:[#allocation2 + $0x90] sm:$0xff] }
 0x1e1   : > { %9721 = vst [vmem:[#allocation98_spill] sm:$0xff] %v7702_v35  ;;  %v7704_v59 = vpop.permute.xlu2 %1391  ;;  %v2007_v35 = vld [vmem:[#allocation2 + $0x78] sm:$0xff] }
 0x1e2   : > { %9722 = vst [vmem:[#allocation99_spill] sm:$0xff] %v7704_v59 }
 0x1e5   : > { %1807 = vperm.xlu1 %6757, %v7465_v41  }
 0x1e6   : > { %1827 = vperm.xlu0 %6756, %v7493_v47  }
 0x1e7   : > { %v7710_v5 = vpop.permute.xlu1 %1341  ;;  %1565 = vperm.xlu2 %6758, %v7706_v46  }
 0x1e8   : > { %9723 = vst [vmem:[#allocation100_spill] sm:$0xff] %v7710_v5  ;;  %v7713_v1 = vpop.permute.xlu0 %1351  ;;  %v2033_v5 = vld [vmem:[%s9605_s1] sm:$0x8] }
 0x1e9   : > { %9724 = vst [vmem:[#allocation101_spill] sm:$0xff] %v7713_v1  ;;  %v7715_v26 = vpop.permute.xlu2 %1406  ;;  %v2034_v0 = vunpack.c.l.bf16 %v2033_v5 }
 0x1ea   : > { %9725 = vst [vmem:[#allocation102_spill] sm:$0xff] %v7715_v26 }
 0x1eb   : > { %v7841_v49 = vperm.slane %v2034_v0, 7 }
 0x1ed   : > { %1555 = vperm.xlu1 %6757, %v7717_v48  }
 0x1ee   : > { %1575 = vperm.xlu0 %6756, %v7719_v17  }
 0x1ef   : > { %v7723_v41 = vpop.permute.xlu1 %1356  ;;  %2067 = vperm.xlu2 %6758, %v2007_v35  }
 0x1f0   : > { %9726 = vst [vmem:[#allocation103_spill] sm:$0xff] %v7723_v41  ;;  %v7725_v47 = vpop.permute.xlu0 %1366  ;;  %v2523_v41 = vld [vmem:[#allocation2 + $0x7a] sm:$0xff] }
 0x1f1   : > { %9727 = vst [vmem:[#allocation104_spill] sm:$0xff] %v7725_v47  ;;  %v7727_v59 = vpop.permute.xlu2 %1520 }
 0x1f5   : > { %2057 = vperm.xlu1 %6757, %v2005_v58  }
 0x1f6   : > { %2077 = vperm.xlu0 %6756, %v2009_v57  }
 0x1f7   : > { %v7729_v26 = vpop.permute.xlu1 %1371  ;;  %1802 = vperm.xlu2 %6758, %v7452_v34  }
 0x1f8   : > { %9728 = vst [vmem:[#allocation105_spill] sm:$0xff] %v7729_v26  ;;  %v7732_v7 = vpop.permute.xlu0 %1381  ;;  %v2012_v26 = vld [vmem:[#allocation2 + $0xb0] sm:$0xff] }
 0x1f9   : > { %9729 = vst [vmem:[#allocation106_spill] sm:$0xff] %v7732_v7  ;;  %v7734_v54 = vpop.permute.xlu2 %1535 }
 0x1fd   : > { %2087 = vperm.xlu1 %6757, %v2011_v36   ;;  %v7751_v36 = vld [vmem:[#allocation2 + $0xa9] sm:$0xff] }
 0x1fe   : > { %1812 = vperm.xlu0 %6756, %v7478_v25   ;;  %v2008_v25 = vld [vmem:[#allocation2 + $0x80] sm:$0xff] }
 0x1ff   : > { %v7737_v35 = vpop.permute.xlu1 %1386  ;;  %1832 = vperm.xlu2 %6758, %v7482_v23  }
 0x200   : > { %9730 = vst [vmem:[#allocation107_spill] sm:$0xff] %v7737_v35  ;;  %v7740_v47 = vpop.permute.xlu0 %1396 }
 0x201   : > { %9731 = vst [vmem:[#allocation108_spill] sm:$0xff] %v7740_v47  ;;  %v7742_v58 = vpop.permute.xlu2 %1777 }
 0x205   : > { %1822 = vperm.xlu1 %6757, %v7480_v30  }
 0x206   : > { %2314 = vperm.xlu0 %6756, %v1490_v16   ;;  %v2006_v16 = vld [vmem:[#allocation2 + $0x68] sm:$0xff] }
 0x207   : > { %v7745_v34 = vpop.permute.xlu1 %1401  ;;  %2334 = vperm.xlu2 %6758, %v1494_v63   ;;  %v2521_v63 = vld [vmem:[#allocation2 + $0x62] sm:$0xff] }
 0x208   : > { %9732 = vst [vmem:[#allocation109_spill] sm:$0xff] %v7745_v34  ;;  %v7747_v57 = vpop.permute.xlu0 %1411  ;;  %v2010_v34 = vld [vmem:[#allocation2 + $0x98] sm:$0xff] }
 0x209   : > { %9733 = vst [vmem:[#allocation110_spill] sm:$0xff] %v7747_v57  ;;  %v7749_v7 = vpop.permute.xlu2 %2047 }
 0x20d   : > { %2324 = vperm.xlu1 %6757, %v1492_v13  }
 0x20e   : > { %2344 = vperm.xlu0 %6756, %v7751_v36  }
 0x20f   : > { %v7754_v23 = vpop.permute.xlu1 %1416  ;;  %2072 = vperm.xlu2 %6758, %v2008_v25   ;;  %v484_v25 = vld [vmem:[%s9605_s1] sm:$0x1] }
 0x210   : > { %9734 = vst [vmem:[#allocation111_spill] sm:$0xff] %v7754_v23  ;;  %v7756_v47 = vpop.permute.xlu0 %1525  ;;  %v7766_v23 = vld [vmem:[#allocation2 + $0xaa] sm:$0xff] }
 0x211   : > { %v7758_v30 = vpop.permute.xlu2 %2294 }
 0x215   : > { %2062 = vperm.xlu1 %6757, %v2006_v16  }
 0x216   : > { %2082 = vperm.xlu0 %6756, %v2010_v34   ;;  %v1000_v34 = vld [vmem:[%s9605_s1] sm:$0x2] }
 0x217   : > { %v7760_v57 = vpop.permute.xlu1 %1530  ;;  %2573 = vperm.xlu2 %6758, %v2521_v63   ;;  %v485_v63 = vunpack.c.l.bf16 %v484_v25 }
 0x218   : > { %v7762_v35 = vpop.permute.xlu0 %1540 }
 0x219   : > { %v7764_v13 = vpop.permute.xlu2 %2052  ;;  %v7782_v11 = vperm.slane %v485_v63, 1  ;;  %v7784_v28 = vperm.slane %v485_v63, 0 }
 0x21b   : > { %9736 = vst [vmem:[#allocation113_spill] sm:$0xff] %v7782_v11  ;;  %v904_v1 = vmul.f32 %v7782_v11, %v7434_v45 }
 0x21c   : > { %9737 = vst [vmem:[#allocation114_spill] sm:$0xff] %v7784_v28 }
 0x21d   : > { %2092 = vperm.xlu1 %6757, %v2012_v26   ;;  %v1516_v26 = vld [vmem:[%s9605_s1] sm:$0x4] }
 0x21e   : > { %2583 = vperm.xlu0 %6756, %v2523_v41   ;;  %v1001_v41 = vunpack.c.l.bf16 %v1000_v34  ;;  %v1517_v21 = vunpack.c.l.bf16 %v1516_v26  ;;  %v647_v34 = vmul.f32 %v7784_v28, %v7390_v18 }
 0x21f   : > { %v7771_v52 = vpop.permute.xlu1 %1545  ;;  %2603 = vperm.xlu2 %6758, %v7766_v23  }
 0x220   : > { %9735 = vst [vmem:[#allocation112_spill] sm:$0xff] %v7771_v52  ;;  %v1788_v16 = vpop.permute.xlu0 %1787  ;;  %v7789_v25 = vperm.slane %v1001_v41, 2  ;;  %v7803_v45 = vperm.slane %v1517_v21, 4  ;;  %v936_v26 = vadd.f32 %v904_v1, %v647_v34  ;;  %v7809_v8 = vperm.slane %v1517_v21, 5 }
 0x221   : > { %v7777_v32 = vpop.permute.xlu2 %2299  ;;  %v649_v34 = vmul.f32 %v7784_v28, %v7394_v27 }
 0x222   : > { %9738 = vst [vmem:[#allocation115_spill] sm:$0xff] %v7789_v25  ;;  %v1936_v21 = vmul.f32 %v7809_v8, %v7742_v58  ;;  %v1166_v55 = vmul.f32 %v7789_v25, %v7579_v42 }
 0x225   : > { %2593 = vperm.xlu1 %6757, %v2525_v51   ;;  %v1163_v51 = vmul.f32 %v7789_v25, %v7569_v29  ;;  %v1679_v29 = vmul.f32 %v7803_v45, %v7727_v59  ;;  %v1165_v59 = vmul.f32 %v7789_v25, %v7572_v31 }
 0x226   : > { %2319 = vperm.xlu0 %6756, %v7717_v48   ;;  %v7801_v48 = vperm.slane %v1001_v41, 3  ;;  %v906_v41 = vmul.f32 %v7782_v11, %v7496_v4  ;;  %v2549_v4 = vld [vmem:[%s9605_s1 + $0x4] sm:$0x1] }
 0x227   : > { %v2038_v52 = vpop.permute.xlu1 %2037  ;;  %2339 = vperm.xlu2 %6758, %v7719_v17   ;;  %v1195_v18 = vadd.f32 %v1163_v51, %v936_v26  ;;  %v9740_v51 = vld [vmem:[#allocation34_spill] sm:$0xff] }
 0x228   : > { %v7795_v15 = vpop.permute.xlu0 %1782  ;;  %9739 = vst [vmem:[#allocation116_spill] sm:$0xff] %v7801_v48  ;;  %v1420_v17 = vmul.f32 %v7801_v48, %v7662_v53  ;;  %v7821_v53 = vperm.slane %v2034_v0, 6  ;;  %v907_v26 = vmul.f32 %v7782_v11, %v9740_v51  ;;  %v938_v27 = vadd.f32 %v906_v41, %v649_v34 }
 0x229   : > { %v7805_v63 = vpop.permute.xlu2 %2568  ;;  %v1422_v31 = vmul.f32 %v7801_v48, %v7639_v62  ;;  %v2550_v51 = vunpack.c.l.bf16 %v2549_v4  ;;  %v1423_v41 = vmul.f32 %v7801_v48, %v7670_v56  ;;  %v1682_v0 = vmul.f32 %v7803_v45, %v7734_v54 }
 0x22a   : > { %v1452_v1 = vadd.f32 %v1420_v17, %v1195_v18  ;;  %v2196_v58 = vmul.f32 %v7821_v53, %v2038_v52  ;;  %v1681_v52 = vmul.f32 %v7803_v45, %v7760_v57 }
 0x22c   : > { %v1711_v17 = vadd.f32 %v1679_v29, %v1452_v1  ;;  %v2526_v29 = vld [vmem:[#allocation2 + $0x9a] sm:$0xff]  ;;  %v1197_v1 = vadd.f32 %v1165_v59, %v938_v27  ;;  %v7852_v59 = vperm.slane %v2550_v51, 0  ;;  %v7870_v27 = vld [vmem:[#allocation2 + $0xb2] sm:$0xff] }
 0x22d   : > { %2329 = vperm.xlu1 %6757, %v7706_v46   ;;  %v7872_v51 = vld [vmem:[#allocation2 + $0xc1] sm:$0xff] }
 0x22e   : > { %2349 = vperm.xlu0 %6756, %v7811_v10   ;;  %v1968_v50 = vadd.f32 %v1936_v21, %v1711_v17  ;;  %v1454_v62 = vadd.f32 %v1422_v31, %v1197_v1  ;;  %v2453_v21 = vmul.f32 %v7841_v49, %v7758_v30  ;;  %v1164_v17 = vmul.f32 %v7789_v25, %v7538_v40 }
 0x22f   : > { %v1793_v5 = vpop.permute.xlu1 %1792  ;;  %2588 = vperm.xlu2 %6758, %v2524_v20   ;;  %v9741_v20 = vld [vmem:[#allocation15_spill] sm:$0xff]  ;;  %v1421_v1 = vmul.f32 %v7801_v48, %v7668_v3 }
 0x230   : > { %v2305_v46 = vpop.permute.xlu0 %2304  ;;  %v650_v60 = vmul.f32 %v7784_v28, %v9741_v20  ;;  %v2228_v34 = vadd.f32 %v2196_v58, %v1968_v50  ;;  %v1938_v20 = vmul.f32 %v7809_v8, %v1788_v16  ;;  %v1713_v56 = vadd.f32 %v1681_v52, %v1454_v62 }
 0x231   : > { %v7833_v18 = vpop.permute.xlu2 %1570  ;;  %v1939_v16 = vmul.f32 %v7809_v8, %v1793_v5  ;;  %v2198_v52 = vmul.f32 %v7821_v53, %v7749_v7  ;;  %v2199_v7 = vmul.f32 %v7821_v53, %v7764_v13 }
 0x232   : > { %v939_v39 = vadd.f32 %v907_v26, %v650_v60  ;;  %v9742_v60 = vld [vmem:[#allocation42_spill] sm:$0xff]  ;;  %v9743_v26 = vld [vmem:[#allocation13_spill] sm:$0xff]  ;;  %v1970_v58 = vadd.f32 %v1938_v20, %v1713_v56 }
 0x233   : > { %v905_v50 = vmul.f32 %v7782_v11, %v9742_v60  ;;  %v1937_v60 = vmul.f32 %v7809_v8, %v7795_v15 }
 0x234   : > { %v1198_v42 = vadd.f32 %v1166_v55, %v939_v39  ;;  %v7861_v39 = vld [vmem:[%s9606_s2] ss:$0 sm:$0xff]  ;;  %v2485_v55 = vadd.f32 %v2453_v21, %v2228_v34 }
 0x235   : > { %2578 = vperm.xlu1 %6757, %v2522_v61   ;;  %v7879_v34 = vld [vmem:[#allocation2 + $0xf1] sm:$0xff] }
 0x236   : > { %2598 = vperm.xlu0 %6756, %v2526_v29   ;;  %v1455_v4 = vadd.f32 %v1423_v41, %v1198_v42  ;;  %v2455_v41 = vmul.f32 %v7841_v49, %v2305_v46  ;;  %v1680_v42 = vmul.f32 %v7803_v45, %v7756_v47 }
 0x237   : > { %v2043_v57 = vpop.permute.xlu1 %2042  ;;  %1580 = vperm.xlu2 %6758, %v7751_v36   ;;  %v648_v36 = vmul.f32 %v7784_v28, %v9743_v26 }
 0x238   : > { %v2554_v61 = vpop.permute.xlu0 %2553  ;;  %v1714_v5 = vadd.f32 %v1682_v0, %v1455_v4  ;;  %v2230_v0 = vadd.f32 %v2198_v52, %v1970_v58  ;;  %v9745_v52 = vld [vmem:[#allocation49_spill] sm:$0xff] }
 0x239   : > { %v2712_v54 = vmul.f32 %v7852_v59, %v2554_v61  ;;  %v7864_v30 = vpop.permute.xlu2 %1817  ;;  %v937_v29 = vadd.f32 %v905_v50, %v648_v36  ;;  %v7899_v36 = vld [vmem:[#allocation2 + $0xd9] sm:$0xff] }
 0x23a   : > { %v1971_v62 = vadd.f32 %v1939_v16, %v1714_v5  ;;  %v2487_v50 = vadd.f32 %v2455_v41, %v2230_v0  ;;  %v912_v41 = vmul.f32 %v7782_v11, %v9745_v52 }
 0x23b   : > { %v2744_v31 = vadd.f32 %v2712_v54, %v2485_v55  ;;  %v1196_v20 = vadd.f32 %v1164_v17, %v937_v29  ;;  %v2197_v54 = vmul.f32 %v7821_v53, %v2043_v57  ;;  %v2715_v17 = vmul.f32 %v7852_v59, %v7805_v63 }
 0x23c   : > { %v2231_v4 = vadd.f32 %v2199_v7, %v1971_v62 }
 0x23d   : > { %v7882_v40 = vadd.f32 %v7861_v39, %v2744_v31  ;;  %2608 = vperm.xlu1 %6757, %v7870_v27   ;;  %v1453_v21 = vadd.f32 %v1421_v1, %v1196_v20  ;;  %v7906_v31 = vld [vmem:[#allocation2 + $0xda] sm:$0xff]  ;;  %v2454_v20 = vmul.f32 %v7841_v49, %v7777_v32 }
 0x23e   : > { %1590 = vperm.xlu0 %6756, %v7872_v51  }
 0x23f   : > { %v2812_v3 = vsub.f32 0.0, %v7882_v40  ;;  %v2564_v46 = vpop.permute.xlu1 %2563  ;;  %1610 = vperm.xlu2 %6758, %v7879_v34   ;;  %v1712_v13 = vadd.f32 %v1680_v42, %v1453_v21 }
 0x240   : > { %v2714_v56 = vmul.f32 %v7852_v59, %v2564_v46  ;;  %v2310_v61 = vpop.permute.xlu0 %2309  ;;  %v1171_v46 = vmul.f32 %v7789_v25, %v7594_v44  ;;  %v7937_v44 = vld [vmem:[#allocation2 + $0xf2] sm:$0xff] }
 0x241   : > { %v2844_v47 = vmul.f32 1.442695, %v2812_v3  ;;  %v2456_v16 = vmul.f32 %v7841_v49, %v2310_v61  ;;  %v7896_v55 = vpop.permute.xlu2 %1565  ;;  %v1969_v58 = vadd.f32 %v1937_v60, %v1712_v13  ;;  %v9746_v3 = vld [vmem:[#allocation11_spill] sm:$0xff]  ;;  %v9747_v60 = vmov 0.0  }
 0x242   : > { %9744 = vst [vmem:[#allocation34_spill] sm:$0xff] %v7896_v55  ;;  %v2746_v26 = vadd.f32 %v2714_v56, %v2487_v50  ;;  %v1428_v13 = vmul.f32 %v7801_v48, %v7656_v22  ;;  %v6659_v22 = vld [vmem:[%s9607_s3 + $0x38] sm:$0xff] }
 0x243   : > { %6763 = vpow2.f32 %v2844_v47  ;;  %v2488_v15 = vadd.f32 %v2456_v16, %v2231_v4  ;;  %v2229_v1 = vadd.f32 %v2197_v54, %v1969_v58  ;;  %3808 = vst.msk [vmem:[#allocation3 + $0x10] sm:$0xff] %vm3804_vm2, %v9747_v60  ;;  %v7933_v47 = vld [vmem:[#allocation2 + $0xc2] sm:$0xff]  ;;  %v9750_v58 = vld [vmem:[#allocation50_spill] sm:$0xff]  ;;  %4114 = vmatpush.bf16.msra.mxu0 %v6659_v22 }
 0x244   : > { %v7904_v5 = vadd.f32 %v7861_v39, %v2746_v26  ;;  %3809 = vst.msk [vmem:[#allocation3 + $0x18] sm:$0x3] %vm3806_vm3, %v9747_v60  ;;  %v7943_v26 = vld [vmem:[#allocation2 + $0xc9] sm:$0xff] }
 0x245   : > { %v2747_v29 = vadd.f32 %v2715_v17, %v2488_v15  ;;  %1600 = vperm.xlu1 %6757, %v7899_v36   ;;  %v2486_v56 = vadd.f32 %v2454_v20, %v2229_v1  ;;  %3805 = vst.msk [vmem:[#allocation3] sm:$0xff] %vm3804_vm2, %v9747_v60  ;;  %v9749_v17 = vld [vmem:[#allocation37_spill] sm:$0xff] }
 0x246   : > { %v2814_v57 = vsub.f32 0.0, %v7904_v5  ;;  %1837 = vperm.xlu0 %6756, %v7766_v23   ;;  %v655_v23 = vmul.f32 %v7784_v28, %v9746_v3  ;;  %3807 = vst.msk [vmem:[#allocation3 + $0x8] sm:$0x3] %vm3806_vm3, %v9747_v60  ;;  %v910_v15 = vmul.f32 %v7782_v11, %v9749_v17  ;;  %v6655_v1 = vld [vmem:[%s9607_s3 + $0x18] sm:$0xff]  ;;  %v1169_v3 = vmul.f32 %v7789_v25, %v7591_v43  ;;  %v6658_v17 = vld [vmem:[%s9607_s3 + $0x30] sm:$0xff] }
 0x247   : > { %v7914_v63 = vadd.f32 %v7861_v39, %v2747_v29  ;;  %v2559_v62 = vpop.permute.xlu1 %2558  ;;  %1857 = vperm.xlu2 %6758, %v7906_v31   ;;  %9748 = vst [vmem:[#allocation15_spill] sm:$0xff] %v7943_v26  ;;  %v914_v29 = vmul.f32 %v7782_v11, %v9750_v58  ;;  %4179 = vmatpush.bf16.msra.mxu1 %v6655_v1  ;;  %v6654_v58 = vld [vmem:[%s9607_s3 + $0x10] sm:$0xff] }
 0x248   : > { %v2848_v42 = vmul.f32 1.442695, %v2814_v57  ;;  %v7919_v0 = vpop.permute.xlu0 %1550  ;;  %v2713_v61 = vmul.f32 %v7852_v59, %v2559_v62  ;;  %v944_v16 = vadd.f32 %v912_v41, %v655_v23  ;;  %3810 = vst.msk [vmem:[#allocation3 + $0x20] sm:$0xff] %vm3804_vm2, %v9747_v60  ;;  %v6663_v57 = vld [vmem:[%s9607_s3 + $0x58] sm:$0xff]  ;;  %4115 = vmatpush.bf16.msra.mxu0 %v6658_v17 }
 0x249   : > { %v6764_v7 = vpop.eup %6763  ;;  %v2815_v21 = vsub.f32 0.0, %v7914_v63  ;;  %v7928_v50 = vpop.permute.xlu2 %2067  ;;  %3811 = vst.msk [vmem:[#allocation3 + $0x28] sm:$0x3] %vm3806_vm3, %v9747_v60  ;;  %v9751_v62 = vld [vmem:[#allocation16_spill] sm:$0xff]  ;;  %4264 = vmatpush.bf16.msra.mxu2 %v6663_v57 }
 0x24a   : > { %v2908_v32 = vadd.f32 1.0, %v6764_v7  ;;  %6765 = vpow2.f32 %v2848_v42  ;;  %v2745_v54 = vadd.f32 %v2713_v61, %v2486_v56  ;;  %v1203_v52 = vadd.f32 %v1171_v46, %v944_v16  ;;  %v9752_v42 = vld [vmem:[#allocation21_spill] sm:$0xff]  ;;  %3812 = vst.msk [vmem:[#allocation3 + $0x30] sm:$0xff] %vm3804_vm2, %v9747_v60  ;;  %v6662_v57 = vld [vmem:[%s9607_s3 + $0x50] sm:$0xff] }
 0x24b   : > { %v2850_v4 = vmul.f32 1.442695, %v2815_v21  ;;  %v653_v20 = vmul.f32 %v7784_v28, %v9751_v62  ;;  %v657_v7 = vmul.f32 %v7784_v28, %v9752_v42  ;;  %3813 = vst.msk [vmem:[#allocation3 + $0x38] sm:$0x3] %vm3806_vm3, %v9747_v60  ;;  %v1173_v16 = vmul.f32 %v7789_v25, %v7565_v24  ;;  %4180 = vmatpush.bf16.msra.mxu1 %v6654_v58 }
 0x24c   : > { %6767 = vrcp.f32 %v2908_v32  ;;  %v7962_v41 = vadd.f32 %v7861_v39, %v2745_v54  ;;  %v1460_v21 = vadd.f32 %v1428_v13, %v1203_v52  ;;  %3814 = vst.msk [vmem:[#allocation3 + $0x40] sm:$0xff] %vm3804_vm2, %v9747_v60  ;;  %v1944_v24 = vmul.f32 %v7809_v8, %v7864_v30  ;;  %v6657_v30 = vld [vmem:[%s9607_s3 + $0x28] sm:$0xff] }
 0x24d   : > { %6769 = vpow2.f32 %v2850_v4  ;;  %1847 = vperm.xlu1 %6757, %v7933_v47   ;;  %v942_v43 = vadd.f32 %v910_v15, %v653_v20  ;;  %v946_v4 = vadd.f32 %v914_v29, %v657_v7  ;;  %v1426_v15 = vmul.f32 %v7801_v48, %v7678_v14  ;;  %3815 = vst.msk [vmem:[#allocation3 + $0x48] sm:$0x3] %vm3806_vm3, %v9747_v60  ;;  %v8010_v14 = vld [vmem:[#allocation2 + $0xe1] sm:$0xff] }
 0x24e   : > { %1867 = vperm.xlu0 %6756, %v7937_v44   ;;  %v2813_v32 = vsub.f32 0.0, %v7962_v41  ;;  %v1430_v20 = vmul.f32 %v7801_v48, %v7692_v12  ;;  %3816 = vst.msk [vmem:[#allocation3 + $0x50] sm:$0xff] %vm3804_vm2, %v9747_v60  ;;  %v1685_v12 = vmul.f32 %v7803_v45, %v7919_v0  ;;  %4265 = vmatpush.bf16.msra.mxu2 %v6662_v57 }
 0x24f   : > { %v1561_v23 = vpop.permute.xlu1 %1560  ;;  %1595 = vperm.xlu2 %6758, %v7943_v26   ;;  %v1201_v62 = vadd.f32 %v1169_v3, %v942_v43  ;;  %3817 = vst.msk [vmem:[#allocation3 + $0x58] sm:$0x3] %vm3806_vm3, %v9747_v60  ;;  %4116 = vmatpush.bf16.msra.mxu0 %v6657_v30  ;;  %v8062_v30 = vld [vmem:[#allocation2 + $0xf9] sm:$0xff] }
 0x250   : > { %v6766_v46 = vpop.eup %6765  ;;  %v1687_v56 = vmul.f32 %v7803_v45, %v1561_v23  ;;  %v7980_v61 = vpop.permute.xlu0 %1797  ;;  %v2846_v29 = vmul.f32 1.442695, %v2813_v32  ;;  %v6653_v23 = vld [vmem:[%s9607_s3 + $0x8] sm:$0xff]  ;;  %v1689_v32 = vmul.f32 %v7803_v45, %v7833_v18  ;;  %3818 = vst.msk [vmem:[#allocation3 + $0x60] sm:$0xff] %vm3804_vm2, %v9747_v60 }
 0x251   : > { %v2910_v54 = vadd.f32 1.0, %v6766_v46  ;;  %v7986_v13 = vpop.permute.xlu2 %1802  ;;  %v6661_v46 = vld [vmem:[%s9607_s3 + $0x48] sm:$0xff]  ;;  %v1458_v0 = vadd.f32 %v1426_v15, %v1201_v62  ;;  %3819 = vst.msk [vmem:[#allocation3 + $0x68] sm:$0x3] %vm3806_vm3, %v9747_v60  ;;  %4181 = vmatpush.bf16.msra.mxu1 %v6653_v23 }
 0x252   : > { %9753 = vst [vmem:[#allocation42_spill] sm:$0xff] %v7986_v13  ;;  %v6768_v22 = vpop.eup %6767  ;;  %v1719_v1 = vadd.f32 %v1687_v56, %v1460_v21  ;;  %v1205_v21 = vadd.f32 %v1173_v16, %v946_v4  ;;  %4266 = vmatpush.bf16.msra.mxu2 %v6661_v46  ;;  %v2015_v46 = vld [vmem:[#allocation2 + $0xd8] sm:$0xff] }
 0x253   : > { %v6770_v52 = vpop.eup %6769  ;;  %v8006_v42 = vmul.f32 %v6768_v22, %v7882_v40  ;;  %6771 = vrcp.f32 %v2910_v54  ;;  %v2013_v40 = vld [vmem:[#allocation2 + $0xc0] sm:$0xff]  ;;  %3820 = vst.msk [vmem:[#allocation3 + $0x70] sm:$0xff] %vm3804_vm2, %v9747_v60 }
 0x254   : > { %v2911_v7 = vadd.f32 1.0, %v6770_v52  ;;  %6773 = vpow2.f32 %v2846_v29  ;;  %v8019_v3 = vadd.f32 %v1944_v24, %v1719_v1  ;;  %v1462_v56 = vadd.f32 %v1430_v20, %v1205_v21  ;;  %3821 = vst.msk [vmem:[#allocation3 + $0x78] sm:$0x3] %vm3806_vm3, %v9747_v60  ;;  %v6656_v24 = vld [vmem:[%s9607_s3 + $0x20] sm:$0xff]  ;;  %v2019_v21 = vld [vmem:[#allocation2 + $0x108] sm:$0xff] }
 0x255   : > { %1585 = vperm.xlu1 %6757, %v7811_v10   ;;  %v3036_v43 = vrot.slane %v8006_v42, 2  ;;  %v1717_v10 = vadd.f32 %v1685_v12, %v1458_v0  ;;  %v3037_v58 = vrot.slane %v8006_v42, 4  ;;  %3822 = vst.msk [vmem:[#allocation3 + $0x80] sm:$0xff] %vm3804_vm2, %v9747_v60  ;;  %v6652_v29 = vld [vmem:[%s9607_s3] sm:$0xff]  ;;  %v3038_v52 = vrot.slane %v8006_v42, 6  ;;  %4117 = vmatpush.bf16.msra.mxu0 %v6656_v24 }
 0x256   : > { %9754 = vst [vmem:[#allocation13_spill] sm:$0xff] %v8019_v3  ;;  %6775 = vrcp.f32 %v2911_v7  ;;  %1605 = vperm.xlu0 %6756, %v8010_v14   ;;  %v1721_v17 = vadd.f32 %v1689_v32, %v1462_v56  ;;  %v6660_v1 = vld [vmem:[%s9607_s3 + $0x40] sm:$0xff]  ;;  %v6173_v7 = vrot.slane %v8006_v42, 9  ;;  %4182 = vmatpush.bf16.msra.mxu1 %v6652_v29  ;;  %v9760_v3 = vld [vmem:[#allocation44_spill] sm:$0xff] }
 0x257   : > { %v1808_v4 = vpop.permute.xlu1 %1807  ;;  %2097 = vperm.xlu2 %6758, %v2013_v40   ;;  %3823 = vst.msk [vmem:[#allocation3 + $0x88] sm:$0x3] %vm3806_vm3, %v9747_v60  ;;  %v6174_v12 = vrot.slane %v3036_v43, 9  ;;  %4267 = vmatpush.bf16.msra.mxu2 %v6660_v1 }
 0x258   : > { %v1942_v18 = vmul.f32 %v7809_v8, %v1808_v4  ;;  %v1828_v16 = vpop.permute.xlu0 %1827  ;;  %9756 = vst [vmem:[#allocation11_spill] sm:$0xff] %v8062_v30 }
 0x259   : > { %v6772_v54 = vpop.eup %6771  ;;  %v1946_v22 = vmul.f32 %v7809_v8, %v1828_v16  ;;  %v8045_v15 = vpop.permute.xlu2 %1832  ;;  %3824 = vst.msk [vmem:[#allocation3 + $0x90] sm:$0xff] %vm3804_vm2, %v9747_v60 }
 0x25a   : > { %9755 = vst [vmem:[#allocation49_spill] sm:$0xff] %v8045_v15  ;;  %v6774_v57 = vpop.eup %6773  ;;  %v2974_v62 = vmul.f32 %v6772_v54, %v7904_v5  ;;  %v8060_v20 = vadd.f32 %v1942_v18, %v1717_v10  ;;  %v6175_v10 = vrot.slane %v3037_v58, 9  ;;  %v3612_v15 = vmax.f32 %v8006_v42, %v6173_v7 }
 0x25b   : > { %v2909_v40 = vadd.f32 1.0, %v6774_v57  ;;  %v8067_v23 = vadd.f32 %v1946_v22, %v1721_v17  ;;  %3825 = vst.msk [vmem:[#allocation3 + $0x98] sm:$0x3] %vm3806_vm3, %v9747_v60  ;;  %v6176_v22 = vrot.slane %v3038_v52, 9  ;;  %v3613_v60 = vmax.f32 %v3036_v43, %v6174_v12 }
 0x25c   : > { %v6776_v5 = vpop.eup %6775  ;;  %v3042_v32 = vrot.slane %v2974_v62, 2  ;;  %v3043_v0 = vrot.slane %v2974_v62, 4  ;;  %v3044_v56 = vrot.slane %v2974_v62, 6  ;;  %v6181_v4 = vrot.slane %v2974_v62, 9 }
 0x25d   : > { %v2975_v18 = vmul.f32 %v6776_v5, %v7914_v63  ;;  %6777 = vrcp.f32 %v2909_v40  ;;  %1615 = vperm.xlu1 %6757, %v8062_v30   ;;  %v3614_v63 = vmax.f32 %v3037_v58, %v6175_v10  ;;  %v3615_v43 = vmax.f32 %v3038_v52, %v6176_v22  ;;  %v8083_v58 = vld [vmem:[#allocation2 + $0xe2] sm:$0xff] }
 0x25e   : > { %v6182_v16 = vrot.slane %v3042_v32, 9  ;;  %v6183_v54 = vrot.slane %v3043_v0, 9  ;;  %v3620_v17 = vmax.f32 %v2974_v62, %v6181_v4  ;;  %2107 = vperm.xlu0 %6756, %v2015_v46   ;;  %v6184_v24 = vrot.slane %v3044_v56, 9  ;;  %v2017_v4 = vld [vmem:[#allocation2 + $0xf0] sm:$0xff]  ;;  %9761 = vst [vmem:[#allocation21_spill] sm:$0xff] %v8083_v58 }
 0x25f   : > { %v8073_v57 = vpop.permute.xlu1 %1555  ;;  %2127 = vperm.xlu2 %6758, %v2019_v21   ;;  %v3045_v40 = vrot.slane %v2975_v18, 2  ;;  %v3046_v5 = vrot.slane %v2975_v18, 4  ;;  %v3047_v55 = vrot.slane %v2975_v18, 6  ;;  %v908_v21 = vmul.f32 %v7782_v11, %v9760_v3 }
 0x260   : > { %9757 = vst [vmem:[#allocation37_spill] sm:$0xff] %v8073_v57  ;;  %v3621_v29 = vmax.f32 %v3042_v32, %v6182_v16  ;;  %v3622_v1 = vmax.f32 %v3043_v0, %v6183_v54  ;;  %v8076_v13 = vpop.permute.xlu0 %1575  ;;  %v3740_v62 = vmax.f32 %v3612_v15, %v3620_v17  ;;  %v3623_v57 = vmax.f32 %v3044_v56, %v6184_v24 }
 0x261   : > { %9758 = vst [vmem:[#allocation50_spill] sm:$0xff] %v8076_v13  ;;  %v8078_v30 = vpop.permute.xlu2 %2334  ;;  %v6185_v32 = vrot.slane %v2975_v18, 9  ;;  %v6186_v0 = vrot.slane %v3045_v40, 9  ;;  %v6187_v10 = vrot.slane %v3046_v5, 9  ;;  %v6188_v16 = vrot.slane %v3047_v55, 9 }
 0x262   : > { %9759 = vst [vmem:[#allocation16_spill] sm:$0xff] %v8078_v30  ;;  %v3741_v46 = vmax.f32 %v3613_v60, %v3621_v29  ;;  %v3742_v42 = vmax.f32 %v3614_v63, %v3622_v1  ;;  %v3890_v60 = vperm.slane %v3740_v62, 0  ;;  %v3743_v3 = vmax.f32 %v3615_v43, %v3623_v57  ;;  %v8092_v30 = vld [vmem:[#allocation2 + $0xca] sm:$0xff] }
 0x263   : > { %v6778_v26 = vpop.eup %6777  ;;  %v3624_v63 = vmax.f32 %v2975_v18, %v6185_v32  ;;  %v3625_v62 = vmax.f32 %v3045_v40, %v6186_v0 }
 0x264   : > { %v3891_v7 = vperm.slane %v3741_v46, 0  ;;  %v2973_v12 = vmul.f32 %v6778_v26, %v7962_v41  ;;  %v3892_v52 = vperm.slane %v3742_v42, 0  ;;  %v3626_v46 = vmax.f32 %v3046_v5, %v6187_v10 }
 0x265   : > { %2117 = vperm.xlu1 %6757, %v2017_v4  }
 0x266   : > { %v3039_v15 = vrot.slane %v2973_v12, 2  ;;  %v3040_v54 = vrot.slane %v2973_v12, 4  ;;  %v3041_v17 = vrot.slane %v2973_v12, 6  ;;  %1842 = vperm.xlu0 %6756, %v7870_v27   ;;  %v6177_v56 = vrot.slane %v2973_v12, 9 }
 0x267   : > { %v2058_v22 = vpop.permute.xlu1 %2057  ;;  %1862 = vperm.xlu2 %6758, %v8083_v58   ;;  %v3955_v26 = vsel %vm3954_vm4, %v3891_v7, %v3890_v60  ;;  %v3627_v27 = vmax.f32 %v3047_v55, %v6188_v16  ;;  %v8095_v58 = vld [vmem:[#allocation2 + $0xfa] sm:$0xff]  ;;  %v1167_v55 = vmul.f32 %v7789_v25, %v7547_v2 }
 0x268   : > { %v6178_v41 = vrot.slane %v3039_v15, 9  ;;  %v6179_v24 = vrot.slane %v3040_v54, 9  ;;  %v6180_v29 = vrot.slane %v3041_v17, 9  ;;  %v8088_v1 = vpop.permute.xlu0 %2077  ;;  %v3616_v4 = vmax.f32 %v2973_v12, %v6177_v56  ;;  %v9763_v12 = vld [vmem:[#allocation9_spill] sm:$0xff] }
 0x269   : > { %9762 = vst [vmem:[#allocation44_spill] sm:$0xff] %v8088_v1  ;;  %v8090_v13 = vpop.permute.xlu2 %2072  ;;  %v3957_v7 = vsel %vm3956_vm5, %v3892_v52, %v3955_v26  ;;  %v3893_v1 = vperm.slane %v3743_v3, 0  ;;  %v651_v32 = vmul.f32 %v7784_v28, %v9763_v12 }
 0x26a   : > { %v3617_v57 = vmax.f32 %v3039_v15, %v6178_v41  ;;  %v3618_v42 = vmax.f32 %v3040_v54, %v6179_v24  ;;  %v3619_v43 = vmax.f32 %v3041_v17, %v6180_v29  ;;  %v3744_v60 = vmax.f32 %v3616_v4, %v3624_v63  ;;  %v2014_v63 = vld [vmem:[#allocation2 + $0xc8] sm:$0xff] }
 0x26b   : > { %v3959_v10 = vsel %vm3958_vm6, %v3893_v1, %v3957_v7  ;;  %v940_v54 = vadd.f32 %v908_v21, %v651_v32  ;;  %v1424_v17 = vmul.f32 %v7801_v48, %v7675_v6  ;;  %v1683_v24 = vmul.f32 %v7803_v45, %v7762_v35 }
 0x26c   : > { %v3745_v18 = vmax.f32 %v3617_v57, %v3625_v62  ;;  %v3746_v40 = vmax.f32 %v3618_v42, %v3626_v46  ;;  %v3747_v5 = vmax.f32 %v3619_v43, %v3627_v27  ;;  %v3894_v0 = vperm.slane %v3744_v60, 0  ;;  %v4054_v57 = vld [vmem:[#allocation3 + $0x1] sm:$0xff] }
 0x26d   : > { %1852 = vperm.xlu1 %6757, %v8092_v30   ;;  %v1199_v41 = vadd.f32 %v1167_v55, %v940_v54  ;;  %v2200_v46 = vmul.f32 %v7821_v53, %v2058_v22  ;;  %v4034_v42 = vld [vmem:[#allocation3] sm:$0xff] }
 0x26e   : > { %v3895_v16 = vperm.slane %v3745_v18, 0  ;;  %v3896_v15 = vperm.slane %v3746_v40, 0  ;;  %1872 = vperm.xlu0 %6756, %v8095_v58   ;;  %v3961_v3 = vsel %vm3960_vm7, %v3894_v0, %v3959_v10  ;;  %v3897_v2 = vperm.slane %v3747_v5, 0  ;;  %v4204_v43 = vld [vmem:[#allocation3 + $0x2] sm:$0xff]  ;;  %v8128_v55 = vld [vmem:[#allocation2 + $0x109] sm:$0xff]  ;;  %v2016_v0 = vld [vmem:[#allocation2 + $0xe0] sm:$0xff] }
 0x26f   : > { %v2088_v52 = vpop.permute.xlu1 %2087  ;;  %2364 = vperm.xlu2 %6758, %v7899_v36   ;;  %v1456_v1 = vadd.f32 %v1424_v17, %v1199_v41  ;;  %v1940_v36 = vmul.f32 %v7809_v8, %v7980_v61  ;;  %v2020_v10 = vld [vmem:[#allocation2 + $0x110] sm:$0xff] }
 0x270   : > { %v3963_v56 = vsel %vm3962_vm8, %v3895_v16, %v3961_v3  ;;  %v8109_v26 = vpop.permute.xlu0 %1812  ;;  %v2206_v16 = vmul.f32 %v7821_v53, %v2088_v52 }
 0x271   : > { %v3965_v21 = vsel %vm3964_vm9, %v3896_v15, %v3963_v56  ;;  %v2574_v29 = vpop.permute.xlu2 %2573  ;;  %v1715_v62 = vadd.f32 %v1683_v24, %v1456_v1 }
 0x272   : > { %v3967_v6 = vsel %vm3966_vm10, %v3897_v2, %v3965_v21  ;;  %v2716_v18 = vmul.f32 %v7852_v59, %v2574_v29  ;;  %v2238_v2 = vadd.f32 %v2206_v16, %v8067_v23  ;;  %v2018_v29 = vld [vmem:[#allocation2 + $0xf8] sm:$0xff] }
 0x273   : > { %4026 = vst.msk [vmem:[#allocation3 + $0x11] sm:$0xff] %vm3804_vm2, %v3967_v6  ;;  %v1972_v35 = vadd.f32 %v1940_v36, %v1715_v62  ;;  %v9764_v36 = vld [vmem:[#allocation10_spill] sm:$0xff]  ;;  %v9765_v62 = vld [vmem:[#allocation12_spill] sm:$0xff] }
 0x275   : > { %2354 = vperm.xlu1 %6757, %v7872_v51   ;;  %v2232_v7 = vadd.f32 %v2200_v46, %v1972_v35  ;;  %v658_v46 = vmul.f32 %v7784_v28, %v9765_v62  ;;  %v9766_v35 = vld [vmem:[#allocation40_spill] sm:$0xff] }
 0x276   : > { %2374 = vperm.xlu0 %6756, %v7879_v34   ;;  %v913_v23 = vmul.f32 %v7782_v11, %v9766_v35 }
 0x277   : > { %v8121_v4 = vpop.permute.xlu1 %1822  ;;  %2102 = vperm.xlu2 %6758, %v2014_v63   ;;  %v652_v63 = vmul.f32 %v7784_v28, %v9764_v36 }
 0x278   : > { %v2315_v27 = vpop.permute.xlu0 %2314 }
 0x279   : > { %v2457_v60 = vmul.f32 %v7841_v49, %v2315_v27  ;;  %v2604_v61 = vpop.permute.xlu2 %2603  ;;  %v9767_v27 = vld [vmem:[#allocation43_spill] sm:$0xff] }
 0x27a   : > { %v4055_v40 = vld [vmem:[#allocation3 + $0x11] sm:$0xff]  ;;  %v2722_v24 = vmul.f32 %v7852_v59, %v2604_v61 }
 0x27b   : > { %v8125_v22 = vld [vmem:[#allocation3 + $0x10] sm:$0xff]  ;;  %v2489_v5 = vadd.f32 %v2457_v60, %v2232_v7  ;;  %v4062_v34 = vpack.c.bf16 %v4055_v40, %v4054_v57  ;;  %v916_v57 = vmul.f32 %v7782_v11, %v9767_v27  ;;  %v9770_v40 = vld [vmem:[#allocation48_spill] sm:$0xff] }
 0x27c   : > { %v4205_v51 = vld [vmem:[#allocation3 + $0x12] sm:$0xff]  ;;  %v4042_v12 = vpack.c.bf16 %v8125_v22, %v4034_v42  ;;  %v9768_v42 = vld [vmem:[#allocation46_spill] sm:$0xff] }
 0x27d   : > { %v4212_v32 = vpack.c.bf16 %v4205_v51, %v4204_v43  ;;  %v2748_v15 = vadd.f32 %v2716_v18, %v2489_v5  ;;  %6317 = vmatmul.msk.bf16.vlgmr.msra.gmra.mxu0 %vm3804_vm2, %v4062_v34  ;;  %2384 = vperm.xlu1 %6757, %v8128_v55   ;;  %v909_v43 = vmul.f32 %v7782_v11, %v9768_v42  ;;  %v9769_v61 = vld [vmem:[#allocation47_spill] sm:$0xff]  ;;  %v9771_v5 = vld [vmem:[#allocation52_spill] sm:$0xff] }
 0x27e   : > { %6337 = vmatmul.msk.bf16.vlgmr.msra.gmra.mxu1 %vm3804_vm2, %v4042_v12  ;;  %2112 = vperm.xlu0 %6756, %v2016_v0   ;;  %v911_v18 = vmul.f32 %v7782_v11, %v9769_v61  ;;  %v922_v51 = vmul.f32 %v7782_v11, %v9770_v40  ;;  %v915_v34 = vmul.f32 %v7782_v11, %v9771_v5  ;;  %v8188_v40 = vld [vmem:[#allocation2 + $0x10a] sm:$0xff] }
 0x27f   : > { %6357 = vmatmul.msk.bf16.vlgmr.msra.gmra.mxu2 %vm3804_vm2, %v4212_v32  ;;  %v8136_v54 = vadd.f32 %v7861_v39, %v2748_v15  ;;  %v2325_v17 = vpop.permute.xlu1 %2324  ;;  %2132 = vperm.xlu2 %6758, %v2020_v10   ;;  %v9772_v32 = vld [vmem:[#allocation19_spill] sm:$0xff]  ;;  %v941_v35 = vadd.f32 %v909_v43, %v652_v63  ;;  %v1168_v63 = vmul.f32 %v7789_v25, %v7583_v37 }
 0x280   : > { %v2345_v3 = vpop.permute.xlu0 %2344  ;;  %v656_v0 = vmul.f32 %v7784_v28, %v9772_v32  ;;  %v947_v61 = vadd.f32 %v915_v34, %v658_v46  ;;  %v2202_v32 = vmul.f32 %v7821_v53, %v7928_v50  ;;  %v1179_v46 = vmul.f32 %v7789_v25, %v7585_v38  ;;  %v9779_v50 = vld [vmem:[#allocation70_spill] sm:$0xff]  ;;  %v9781_v38 = vld [vmem:[#allocation73_spill] sm:$0xff] }
 0x281   : > { %v2816_v52 = vsub.f32 0.0, %v8136_v54  ;;  %v2463_v56 = vmul.f32 %v7841_v49, %v2345_v3  ;;  %v8141_v41 = vpop.permute.xlu2 %2339  ;;  %v9774_v3 = vld [vmem:[#allocation14_spill] sm:$0xff] }
 0x282   : > { %v9782_v34 = vld [vmem:[#allocation78_spill] sm:$0xff] }
 0x283   : > { %v2495_v21 = vadd.f32 %v2463_v56, %v2238_v2  ;;  %v2852_v6 = vmul.f32 1.442695, %v2816_v52  ;;  %v661_v2 = vmul.f32 %v7784_v28, %v9774_v3  ;;  %v9775_v52 = vld [vmem:[#allocation18_spill] sm:$0xff] }
 0x284   : > { %v654_v56 = vmul.f32 %v7784_v28, %v9775_v52 }
 0x285   : > { %v2754_v1 = vadd.f32 %v2722_v24, %v2495_v21  ;;  %2122 = vperm.xlu1 %6757, %v2018_v29   ;;  %6779 = vpow2.f32 %v2852_v6  ;;  %v9776_v24 = vld [vmem:[#allocation28_spill] sm:$0xff]  ;;  %v920_v29 = vmul.f32 %v7782_v11, %v7522_v19  ;;  %v9777_v6 = vld [vmem:[#allocation27_spill] sm:$0xff] }
 0x286   : > { %2613 = vperm.xlu0 %6756, %v7933_v47   ;;  %v9773_v47 = vld [vmem:[#allocation22_spill] sm:$0xff]  ;;  %v665_v21 = vmul.f32 %v7784_v28, %v9776_v24  ;;  %v943_v27 = vadd.f32 %v911_v18, %v654_v56  ;;  %v2234_v18 = vadd.f32 %v2202_v32, %v8060_v20  ;;  %v9784_v20 = vld [vmem:[#allocation85_spill] sm:$0xff] }
 0x287   : > { %v8155_v7 = vadd.f32 %v7861_v39, %v2754_v1  ;;  %v8158_v60 = vpop.permute.xlu1 %2062  ;;  %2633 = vperm.xlu2 %6758, %v7937_v44   ;;  %v659_v10 = vmul.f32 %v7784_v28, %v9773_v47  ;;  %v918_v44 = vmul.f32 %v7782_v11, %v7520_v33  ;;  %v663_v1 = vmul.f32 %v7784_v28, %v9777_v6 }
 0x288   : > { %v8167_v12 = vpop.permute.xlu0 %2082  ;;  %v945_v33 = vadd.f32 %v913_v23, %v656_v0  ;;  %v954_v42 = vadd.f32 %v922_v51, %v665_v21  ;;  %v2459_v47 = vmul.f32 %v7841_v49, %v2325_v17  ;;  %v1170_v23 = vmul.f32 %v7789_v25, %v7556_v9  ;;  %v9780_v9 = vld [vmem:[#allocation72_spill] sm:$0xff] }
 0x289   : > { %v2822_v16 = vsub.f32 0.0, %v8155_v7  ;;  %v8176_v15 = vpop.permute.xlu2 %2588  ;;  %v948_v36 = vadd.f32 %v916_v57, %v659_v10  ;;  %v950_v5 = vadd.f32 %v918_v44, %v661_v2  ;;  %v952_v3 = vadd.f32 %v920_v29, %v663_v1  ;;  %v9778_v57 = vld [vmem:[#allocation69_spill] sm:$0xff]  ;;  %v9783_v10 = vld [vmem:[#allocation44_spill] sm:$0xff] }
 0x28a   : > { %v1172_v43 = vmul.f32 %v7789_v25, %v9778_v57  ;;  %v1174_v17 = vmul.f32 %v7789_v25, %v9779_v50  ;;  %v1175_v37 = vmul.f32 %v7789_v25, %v9780_v9  ;;  %v1181_v0 = vmul.f32 %v7789_v25, %v9782_v34  ;;  %v9785_v1 = vld [vmem:[#allocation89_spill] sm:$0xff]  ;;  %v9786_v9 = vld [vmem:[#allocation92_spill] sm:$0xff] }
 0x28b   : > { %v2864_v62 = vmul.f32 1.442695, %v2822_v16  ;;  %v6780_v19 = vpop.eup %6779  ;;  %v2204_v44 = vmul.f32 %v7821_v53, %v9783_v10  ;;  %v1425_v2 = vmul.f32 %v7801_v48, %v9784_v20  ;;  %v2491_v56 = vadd.f32 %v2459_v47, %v2234_v18  ;;  %v9787_v18 = vld [vmem:[#allocation13_spill] sm:$0xff] }
 0x28c   : > { %v2912_v52 = vadd.f32 1.0, %v6780_v19  ;;  %v1202_v21 = vadd.f32 %v1170_v23, %v943_v27  ;;  %v1200_v29 = vadd.f32 %v1168_v63, %v941_v35  ;;  %v1211_v6 = vadd.f32 %v1179_v46, %v952_v3  ;;  %v9788_v27 = vld [vmem:[#allocation90_spill] sm:$0xff]  ;;  %v9790_v63 = vld [vmem:[#allocation16_spill] sm:$0xff] }
 0x28d   : > { %6781 = vpow2.f32 %v2864_v62  ;;  %2623 = vperm.xlu1 %6757, %v7906_v31   ;;  %v1177_v31 = vmul.f32 %v7789_v25, %v9781_v38  ;;  %v1431_v62 = vmul.f32 %v7801_v48, %v9785_v1  ;;  %v1204_v57 = vadd.f32 %v1172_v43, %v945_v33  ;;  %v9792_v43 = vld [vmem:[#allocation93_spill] sm:$0xff]  ;;  %v9795_v1 = vld [vmem:[#allocation100_spill] sm:$0xff] }
 0x28e   : > { %2643 = vperm.xlu0 %6756, %v8188_v40   ;;  %v1206_v50 = vadd.f32 %v1174_v17, %v947_v61  ;;  %v1427_v38 = vmul.f32 %v7801_v48, %v9786_v9  ;;  %v1207_v10 = vadd.f32 %v1175_v37, %v948_v36  ;;  %v8226_v47 = vadd.f32 %v1181_v0, %v954_v42  ;;  %v9789_v61 = vld [vmem:[#allocation37_spill] sm:$0xff]  ;;  %v9791_v42 = vld [vmem:[#allocation15_spill] sm:$0xff]  ;;  %v9797_v9 = vld [vmem:[#allocation34_spill] sm:$0xff] }
 0x28f   : > { %v8206_v51 = vpop.permute.xlu1 %2092  ;;  %2369 = vperm.xlu2 %6758, %v8010_v14   ;;  %v1209_v19 = vadd.f32 %v1177_v31, %v950_v5  ;;  %v1457_v20 = vadd.f32 %v1425_v2, %v1200_v29  ;;  %v1434_v35 = vmul.f32 %v7801_v48, %v9788_v27  ;;  %6783 = vrcp.f32 %v2912_v52  ;;  %v9793_v37 = vld [vmem:[#allocation95_spill] sm:$0xff] }
 0x290   : > { %v2584_v16 = vpop.permute.xlu0 %2583  ;;  %v1463_v33 = vadd.f32 %v1431_v62, %v1206_v50  ;;  %v1686_v23 = vmul.f32 %v7803_v45, %v9789_v61  ;;  %v2461_v36 = vmul.f32 %v7841_v49, %v9790_v63  ;;  %v1459_v46 = vadd.f32 %v1427_v38, %v1202_v21  ;;  %v9794_v0 = vld [vmem:[#allocation11_spill] sm:$0xff] }
 0x291   : > { %v2718_v14 = vmul.f32 %v7852_v59, %v2584_v16  ;;  %v8220_v24 = vpop.permute.xlu2 %1580  ;;  %v2236_v16 = vadd.f32 %v2204_v44, %v9787_v18  ;;  %v1429_v17 = vmul.f32 %v7801_v48, %v9792_v43  ;;  %v1432_v31 = vmul.f32 %v7801_v48, %v9793_v37 }
 0x292   : > { %v1943_v2 = vmul.f32 %v7809_v8, %v8109_v26  ;;  %v8249_v29 = vadd.f32 %v1434_v35, %v1209_v19  ;;  %v1436_v62 = vmul.f32 %v7801_v48, %v9795_v1  ;;  %v1718_v26 = vadd.f32 %v1686_v23, %v1459_v46  ;;  %v9798_v19 = vld [vmem:[#allocation42_spill] sm:$0xff]  ;;  %v9802_v1 = vld [vmem:[#allocation21_spill] sm:$0xff] }
 0x293   : > { %v6782_v32 = vpop.eup %6781  ;;  %v2750_v34 = vadd.f32 %v2718_v14, %v2491_v56  ;;  %v2493_v56 = vadd.f32 %v2461_v36, %v2236_v16  ;;  %v1461_v27 = vadd.f32 %v1429_v17, %v1204_v57  ;;  %v8259_v61 = vadd.f32 %v1432_v31, %v1207_v10  ;;  %v8265_v36 = vld [vmem:[#allocation2 + $0x111] sm:$0xff] }
 0x294   : > { %v2918_v5 = vadd.f32 1.0, %v6782_v32  ;;  %v9796_v32 = vld [vmem:[#allocation112_spill] sm:$0xff]  ;;  %v1941_v35 = vmul.f32 %v7809_v8, %v9798_v19  ;;  %v1945_v63 = vmul.f32 %v7809_v8, %v8121_v4  ;;  %v1975_v37 = vadd.f32 %v1943_v2, %v1718_v26  ;;  %v9800_v57 = vld [vmem:[#allocation101_spill] sm:$0xff] }
 0x295   : > { %v8232_v3 = vadd.f32 %v7861_v39, %v2750_v34  ;;  %2359 = vperm.xlu1 %6757, %v9791_v42   ;;  %v1684_v50 = vmul.f32 %v7803_v45, %v9796_v32  ;;  %v6784_v16 = vpop.eup %6783  ;;  %v9799_v42 = vld [vmem:[#allocation50_spill] sm:$0xff]  ;;  %v1438_v10 = vmul.f32 %v7801_v48, %v9800_v57  ;;  %v2205_v4 = vmul.f32 %v7821_v53, %v8167_v12 }
 0x296   : > { %2379 = vperm.xlu0 %6756, %v9794_v0   ;;  %6785 = vrcp.f32 %v2918_v5  ;;  %v1690_v43 = vmul.f32 %v7803_v45, %v9799_v42  ;;  %v8272_v5 = vld [vmem:[#allocation2 + $0x112] sm:$0xff]  ;;  %v8278_v31 = vadd.f32 %v1436_v62, %v1211_v6  ;;  %v2203_v0 = vmul.f32 %v7821_v53, %v8090_v13 }
 0x297   : > { %v2594_v44 = vpop.permute.xlu1 %2593  ;;  %2618 = vperm.xlu2 %6758, %v8092_v30   ;;  %v2818_v52 = vsub.f32 0.0, %v8232_v3  ;;  %v1688_v30 = vmul.f32 %v7803_v45, %v9797_v9  ;;  %v1716_v46 = vadd.f32 %v1684_v50, %v1457_v20  ;;  %v2201_v9 = vmul.f32 %v7821_v53, %v8158_v60  ;;  %v8312_v57 = vld [vmem:[#allocation2 + $0x139] sm:$0xff] }
 0x298   : > { %v2720_v14 = vmul.f32 %v7852_v59, %v2594_v44  ;;  %v2320_v21 = vpop.permute.xlu0 %2319  ;;  %v8283_v44 = vmul.f32 %v6784_v16, %v8136_v54  ;;  %v1722_v62 = vadd.f32 %v1690_v43, %v1463_v33  ;;  %v2235_v32 = vadd.f32 %v2203_v0, %v1975_v37 }
 0x299   : > { %v8257_v38 = vpop.permute.xlu2 %1610  ;;  %v2856_v34 = vmul.f32 1.442695, %v2818_v52  ;;  %v1720_v17 = vadd.f32 %v1688_v30, %v1461_v27  ;;  %v1973_v52 = vadd.f32 %v1941_v35, %v1716_v46  ;;  %v2719_v26 = vmul.f32 %v7852_v59, %v8176_v15 }
 0x29a   : > { %v2752_v18 = vadd.f32 %v2720_v14, %v2493_v56  ;;  %v9801_v56 = vld [vmem:[#allocation49_spill] sm:$0xff]  ;;  %v3048_v33 = vrot.slane %v8283_v44, 2  ;;  %v3049_v27 = vrot.slane %v8283_v44, 4  ;;  %v3050_v35 = vrot.slane %v8283_v44, 6 }
 0x29b   : > { %6787 = vpow2.f32 %v2856_v34  ;;  %v1947_v20 = vmul.f32 %v7809_v8, %v9801_v56  ;;  %v1977_v14 = vadd.f32 %v1945_v63, %v1720_v17  ;;  %v2207_v34 = vmul.f32 %v7821_v53, %v8206_v51 }
 0x29c   : > { %v8270_v23 = vadd.f32 %v7861_v39, %v2752_v18  ;;  %v6786_v6 = vpop.eup %6785  ;;  %v2462_v15 = vmul.f32 %v7841_v49, %v8141_v41  ;;  %v6189_v51 = vrot.slane %v8283_v44, 9  ;;  %v2458_v43 = vmul.f32 %v7841_v49, %v2320_v21 }
 0x29d   : > { %2389 = vperm.xlu1 %6757, %v8265_v36   ;;  %v2237_v30 = vadd.f32 %v2205_v4, %v1977_v14  ;;  %v8306_v60 = vmul.f32 %v6786_v6, %v8155_v7  ;;  %v1979_v42 = vadd.f32 %v1947_v20, %v1722_v62  ;;  %v8315_v46 = vadd.f32 %v1438_v10, %v8226_v47 }
 0x29e   : > { %v2820_v2 = vsub.f32 0.0, %v8270_v23  ;;  %2628 = vperm.xlu0 %6756, %v9802_v1   ;;  %v2233_v17 = vadd.f32 %v2201_v9, %v1973_v52  ;;  %v6190_v7 = vrot.slane %v3048_v33, 9  ;;  %v6191_v0 = vrot.slane %v3049_v27, 9 }
 0x29f   : > { %v2330_v12 = vpop.permute.xlu1 %2329  ;;  %2648 = vperm.xlu2 %6758, %v8272_v5   ;;  %v2494_v4 = vadd.f32 %v2462_v15, %v2237_v30  ;;  %v6192_v56 = vrot.slane %v3050_v35, 9  ;;  %v3066_v21 = vrot.slane %v8306_v60, 2  ;;  %v3067_v20 = vrot.slane %v8306_v60, 4 }
 0x2a0   : > { %v2860_v13 = vmul.f32 1.442695, %v2820_v2  ;;  %v2460_v54 = vmul.f32 %v7841_v49, %v2330_v12  ;;  %v8292_v50 = vpop.permute.xlu0 %2349  ;;  %v2239_v2 = vadd.f32 %v2207_v34, %v1979_v42  ;;  %v8325_v47 = vmul.f32 %v7803_v45, %v8220_v24  ;;  %v8358_v42 = vld [vmem:[#allocation2 + $0x122] sm:$0xff] }
 0x2a1   : > { %v8300_v18 = vpop.permute.xlu2 %1857  ;;  %v6788_v16 = vpop.eup %6787  ;;  %v2490_v14 = vadd.f32 %v2458_v43, %v2233_v17  ;;  %v3068_v6 = vrot.slane %v8306_v60, 6  ;;  %v6213_v24 = vrot.slane %v8306_v60, 9  ;;  %v6215_v34 = vrot.slane %v3067_v20, 9 }
 0x2a2   : > { %6789 = vpow2.f32 %v2860_v13  ;;  %v2492_v19 = vadd.f32 %v2460_v54, %v2235_v32  ;;  %v2914_v63 = vadd.f32 1.0, %v6788_v16  ;;  %v8339_v32 = vmax.f32 %v3048_v33, %v6190_v7  ;;  %v8351_v33 = vld [vmem:[%s9606_s2] ss:$0 sm:$0xff] }
 0x2a3   : > { %v8341_v54 = vmax.f32 %v3049_v27, %v6191_v0  ;;  %v8345_v15 = vmax.f32 %v3050_v35, %v6192_v56  ;;  %v6216_v43 = vrot.slane %v3068_v6, 9 }
 0x2a4   : > { %v2751_v37 = vadd.f32 %v2719_v26, %v2492_v19  ;;  %6791 = vrcp.f32 %v2914_v63  ;;  %v6214_v26 = vrot.slane %v3066_v21, 9  ;;  %v8343_v19 = vld [vmem:[#allocation2 + $0x121] sm:$0xff] }
 0x2a5   : > { %2638 = vperm.xlu1 %6757, %v8095_v58  }
 0x2a6   : > { %v8318_v41 = vadd.f32 %v7861_v39, %v2751_v37  ;;  %1620 = vperm.xlu0 %6756, %v8128_v55   ;;  %v8330_v39 = vmax.f32 %v8283_v44, %v6189_v51  ;;  %v8356_v51 = vld [vmem:[#allocation2 + $0x151] sm:$0xff]  ;;  %v8361_v37 = vmax.f32 %v8306_v60, %v6213_v24  ;;  %v8369_v56 = vmax.f32 %v3066_v21, %v6214_v26 }
 0x2a7   : > { %v2579_v10 = vpop.permute.xlu1 %2578  ;;  %1640 = vperm.xlu2 %6758, %v8312_v57   ;;  %v6667_v21 = vld [vmem:[%s9607_s3 + $0x78] sm:$0xff] }
 0x2a8   : > { %v6790_v52 = vpop.eup %6789  ;;  %v2819_v58 = vsub.f32 0.0, %v8318_v41  ;;  %v2717_v1 = vmul.f32 %v7852_v59, %v2579_v10  ;;  %v2599_v12 = vpop.permute.xlu0 %2598  ;;  %v8371_v10 = vmax.f32 %v3067_v20, %v6215_v34  ;;  %4357 = vmatpush.bf16.msra.mxu3 %v6667_v21 }
 0x2a9   : > { %v2916_v62 = vadd.f32 1.0, %v6790_v52  ;;  %v2721_v55 = vmul.f32 %v7852_v59, %v2599_v12  ;;  %v8337_v13 = vpop.permute.xlu2 %1595 }
 0x2aa   : > { %9803 = vst [vmem:[#allocation9_spill] sm:$0xff] %v8337_v13  ;;  %v2858_v44 = vmul.f32 1.442695, %v2819_v58  ;;  %v2749_v9 = vadd.f32 %v2717_v1, %v2490_v14  ;;  %v6792_v30 = vpop.eup %6791 }
 0x2ab   : > { %6793 = vrcp.f32 %v2916_v62  ;;  %v2753_v16 = vadd.f32 %v2721_v55, %v2494_v4  ;;  %v2978_v63 = vmul.f32 %v6792_v30, %v8232_v3  ;;  %v2464_v3 = vmul.f32 %v7841_v49, %v8292_v50 }
 0x2ac   : > { %6795 = vpow2.f32 %v2858_v44  ;;  %v8354_v27 = vadd.f32 %v8351_v33, %v2749_v9  ;;  %v8382_v62 = vmax.f32 %v3068_v6, %v6216_v43 }
 0x2ad   : > { %v8366_v35 = vadd.f32 %v8351_v33, %v2753_v16  ;;  %v3054_v17 = vrot.slane %v2978_v63, 2  ;;  %v3055_v4 = vrot.slane %v2978_v63, 4  ;;  %v3056_v7 = vrot.slane %v2978_v63, 6  ;;  %1630 = vperm.xlu1 %6757, %v8343_v19  }
 0x2ae   : > { %v6197_v0 = vrot.slane %v2978_v63, 9  ;;  %v2817_v52 = vsub.f32 0.0, %v8354_v27  ;;  %1650 = vperm.xlu0 %6756, %v8356_v51   ;;  %v2496_v55 = vadd.f32 %v2464_v3, %v2239_v2 }
 0x2af   : > { %v2821_v60 = vsub.f32 0.0, %v8366_v35  ;;  %v2609_v50 = vpop.permute.xlu1 %2608  ;;  %1887 = vperm.xlu2 %6758, %v8358_v42   ;;  %v6198_v14 = vrot.slane %v3054_v17, 9  ;;  %v6199_v58 = vrot.slane %v3055_v4, 9  ;;  %v6200_v1 = vrot.slane %v3056_v7, 9 }
 0x2b0   : > { %v3636_v12 = vmax.f32 %v2978_v63, %v6197_v0  ;;  %v8377_v24 = vpop.permute.xlu0 %1590  ;;  %v2854_v44 = vmul.f32 1.442695, %v2817_v52  ;;  %v2723_v9 = vmul.f32 %v7852_v59, %v2609_v50  ;;  %v8392_v52 = vld [vmem:[#allocation2 + $0x13a] sm:$0xff] }
 0x2b1   : > { %v6794_v20 = vpop.eup %6793  ;;  %v8385_v30 = vpop.permute.xlu2 %2097  ;;  %v3637_v34 = vmax.f32 %v3054_v17, %v6198_v14  ;;  %v3638_v16 = vmax.f32 %v3055_v4, %v6199_v58  ;;  %v3639_v13 = vmax.f32 %v3056_v7, %v6200_v1  ;;  %v2862_v25 = vmul.f32 1.442695, %v2821_v60  ;;  %v6666_v17 = vld [vmem:[%s9607_s3 + $0x70] sm:$0xff] }
 0x2b2   : > { %v6796_v26 = vpop.eup %6795  ;;  %v3748_v63 = vmax.f32 %v8330_v39, %v3636_v12  ;;  %v2980_v0 = vmul.f32 %v6794_v20, %v8270_v23  ;;  %6797 = vpow2.f32 %v2854_v44  ;;  %v2755_v3 = vadd.f32 %v2723_v9, %v2496_v55  ;;  %4358 = vmatpush.bf16.msra.mxu3 %v6666_v17 }
 0x2b3   : > { %v2915_v48 = vadd.f32 1.0, %v6796_v26  ;;  %v3749_v6 = vmax.f32 %v8339_v32, %v3637_v34  ;;  %v3750_v2 = vmax.f32 %v8341_v54, %v3638_v16  ;;  %v3751_v43 = vmax.f32 %v8345_v15, %v3639_v13 }
 0x2b4   : > { %v3060_v39 = vrot.slane %v2980_v0, 2  ;;  %v3061_v4 = vrot.slane %v2980_v0, 4  ;;  %v3062_v7 = vrot.slane %v2980_v0, 6  ;;  %v6205_v23 = vrot.slane %v2980_v0, 9 }
 0x2b5   : > { %v3898_v50 = vperm.slane %v3748_v63, 0  ;;  %v3899_v14 = vperm.slane %v3749_v6, 0  ;;  %v3900_v60 = vperm.slane %v3750_v2, 0  ;;  %6799 = vrcp.f32 %v2915_v48  ;;  %1877 = vperm.xlu1 %6757, %v8188_v40   ;;  %v6665_v40 = vld [vmem:[%s9607_s3 + $0x68] sm:$0xff] }
 0x2b6   : > { %v6206_v32 = vrot.slane %v3060_v39, 9  ;;  %v6207_v13 = vrot.slane %v3061_v4, 9  ;;  %v6208_v54 = vrot.slane %v3062_v7, 9  ;;  %v3644_v15 = vmax.f32 %v2980_v0, %v6205_v23  ;;  %1897 = vperm.xlu0 %6756, %v8392_v52   ;;  %4359 = vmatpush.bf16.msra.mxu3 %v6665_v40 }
 0x2b7   : > { %v1601_v58 = vpop.permute.xlu1 %1600  ;;  %1625 = vperm.xlu2 %6758, %v8265_v36   ;;  %v3901_v1 = vperm.slane %v3751_v43, 0  ;;  %v3968_v12 = vsel %vm3954_vm4, %v3899_v14, %v3898_v50  ;;  %6801 = vpow2.f32 %v2862_v25  ;;  %v8402_v21 = vadd.f32 %v8351_v33, %v2755_v3  ;;  %v8418_v3 = vld [vmem:[#allocation2 + $0x152] sm:$0xff] }
 0x2b8   : > { %v1838_v48 = vpop.permute.xlu0 %1837  ;;  %v6798_v20 = vpop.eup %6797  ;;  %v3969_v55 = vsel %vm3956_vm5, %v3900_v60, %v3968_v12  ;;  %v3645_v44 = vmax.f32 %v3060_v39, %v6206_v32  ;;  %v3646_v9 = vmax.f32 %v3061_v4, %v6207_v13  ;;  %v3647_v26 = vmax.f32 %v3062_v7, %v6208_v54  ;;  %v8423_v7 = vld [vmem:[#allocation2 + $0x129] sm:$0xff] }
 0x2b9   : > { %v2128_v34 = vpop.permute.xlu2 %2127  ;;  %v8409_v36 = vsel %vm3958_vm6, %v3901_v1, %v3969_v55  ;;  %v3756_v25 = vmax.f32 %v3644_v15, %v8361_v37  ;;  %v2913_v16 = vadd.f32 1.0, %v6798_v20  ;;  %v2823_v63 = vsub.f32 0.0, %v8402_v21 }
 0x2ba   : > { %v3757_v0 = vmax.f32 %v3645_v44, %v8369_v56  ;;  %v3758_v6 = vmax.f32 %v3646_v9, %v8371_v10  ;;  %v3759_v2 = vmax.f32 %v3647_v26, %v8382_v62  ;;  %v1697_v43 = vmul.f32 %v7803_v45, %v8257_v38  ;;  %v8425_v56 = vld [vmem:[#allocation2 + $0x159] sm:$0xff] }
 0x2bb   : > { %v6800_v17 = vpop.eup %6799  ;;  %6803 = vrcp.f32 %v2913_v16  ;;  %v2866_v39 = vmul.f32 1.442695, %v2823_v63  ;;  %v1693_v37 = vmul.f32 %v7803_v45, %v8377_v24  ;;  %v1695_v4 = vmul.f32 %v7803_v45, %v1601_v58  ;;  %v6664_v24 = vld [vmem:[%s9607_s3 + $0x60] sm:$0xff] }
 0x2bc   : > { %v3906_v10 = vperm.slane %v3756_v25, 0  ;;  %v3907_v23 = vperm.slane %v3757_v0, 0  ;;  %v3908_v62 = vperm.slane %v3758_v6, 0  ;;  %v2979_v50 = vmul.f32 %v6800_v17, %v8318_v41  ;;  %4360 = vmatpush.bf16.msra.mxu3 %v6664_v24 }
 0x2bd   : > { %v6802_v38 = vpop.eup %6801  ;;  %v1723_v14 = vadd.f32 %v8325_v47, %v8259_v61  ;;  %v3909_v60 = vperm.slane %v3759_v2, 0  ;;  %6805 = vpow2.f32 %v2866_v39  ;;  %v1948_v32 = vmul.f32 %v7809_v8, %v1838_v48  ;;  %1907 = vperm.xlu1 %6757, %v8418_v3   ;;  %v8455_v2 = vld [vmem:[#allocation2 + $0x141] sm:$0xff] }
 0x2be   : > { %v3975_v13 = vsel %vm3954_vm4, %v3907_v23, %v3906_v10  ;;  %v3057_v54 = vrot.slane %v2979_v50, 2  ;;  %v3058_v15 = vrot.slane %v2979_v50, 4  ;;  %v1727_v41 = vadd.f32 %v1695_v4, %v8278_v31  ;;  %1635 = vperm.xlu0 %6756, %v8423_v7   ;;  %v2021_v39 = vld [vmem:[#allocation2 + $0x120] sm:$0xff] }
 0x2bf   : > { %v1848_v58 = vpop.permute.xlu1 %1847  ;;  %1655 = vperm.xlu2 %6758, %v8425_v56   ;;  %v3976_v61 = vsel %vm3956_vm5, %v3908_v62, %v3975_v13  ;;  %v3059_v47 = vrot.slane %v2979_v50, 6  ;;  %v2917_v1 = vadd.f32 1.0, %v6802_v38  ;;  %v8440_v12 = vadd.f32 %v1948_v32, %v1723_v14 }
 0x2c0   : > { %v1868_v48 = vpop.permute.xlu0 %1867  ;;  %v8443_v40 = vsel %vm3958_vm6, %v3909_v60, %v3976_v61  ;;  %v1729_v20 = vadd.f32 %v1697_v43, %v8315_v46  ;;  %v1952_v31 = vmul.f32 %v7809_v8, %v8300_v18  ;;  %v1725_v55 = vadd.f32 %v1693_v37, %v8249_v29  ;;  %v2025_v37 = vld [vmem:[#allocation2 + $0x150] sm:$0xff] }
 0x2c1   : > { %v8449_v44 = vpop.permute.xlu2 %1862  ;;  %v6804_v9 = vpop.eup %6803  ;;  %v6201_v26 = vrot.slane %v2979_v50, 9  ;;  %6807 = vrcp.f32 %v2917_v1  ;;  %v1950_v25 = vmul.f32 %v7809_v8, %v1848_v58  ;;  %v1954_v16 = vmul.f32 %v7809_v8, %v1868_v48 }
 0x2c2   : > { %v6202_v63 = vrot.slane %v3057_v54, 9  ;;  %v6203_v0 = vrot.slane %v3058_v15, 9  ;;  %v2977_v6 = vmul.f32 %v6804_v9, %v8354_v27  ;;  %v2214_v46 = vmul.f32 %v7821_v53, %v2128_v34 }
 0x2c3   : > { %v6806_v18 = vpop.eup %6805  ;;  %v6204_v43 = vrot.slane %v3059_v47, 9  ;;  %v8457_v29 = vadd.f32 %v1950_v25, %v1725_v55  ;;  %v1986_v17 = vadd.f32 %v1954_v16, %v1729_v20  ;;  %v8459_v4 = vadd.f32 %v1952_v31, %v1727_v41 }
 0x2c4   : > { %v3051_v10 = vrot.slane %v2977_v6, 2  ;;  %v3052_v23 = vrot.slane %v2977_v6, 4  ;;  %v3053_v62 = vrot.slane %v2977_v6, 6  ;;  %v6193_v38 = vrot.slane %v2977_v6, 9 }
 0x2c5   : > { %v3640_v14 = vmax.f32 %v2979_v50, %v6201_v26  ;;  %v2919_v60 = vadd.f32 1.0, %v6806_v18  ;;  %1645 = vperm.xlu1 %6757, %v8455_v2   ;;  %v8462_v27 = vadd.f32 %v2214_v46, %v1986_v17  ;;  %v3641_v61 = vmax.f32 %v3057_v54, %v6202_v63  ;;  %v2023_v17 = vld [vmem:[#allocation2 + $0x138] sm:$0xff]  ;;  %v8471_v63 = vld [vmem:[#allocation2 + $0x12a] sm:$0xff] }
 0x2c6   : > { %v6194_v34 = vrot.slane %v3051_v10, 9  ;;  %v6195_v32 = vrot.slane %v3052_v23, 9  ;;  %v6196_v24 = vrot.slane %v3053_v62, 9  ;;  %v3632_v13 = vmax.f32 %v2977_v6, %v6193_v38  ;;  %2137 = vperm.xlu0 %6756, %v2021_v39  }
 0x2c7   : > { %v8464_v58 = vpop.permute.xlu1 %1585  ;;  %2157 = vperm.xlu2 %6758, %v2025_v37   ;;  %v6808_v41 = vpop.eup %6807  ;;  %v3642_v1 = vmax.f32 %v3058_v15, %v6203_v0  ;;  %v3643_v48 = vmax.f32 %v3059_v47, %v6204_v43  ;;  %6809 = vrcp.f32 %v2919_v60  ;;  %v2027_v47 = vld [vmem:[#allocation2 + $0x168] sm:$0xff] }
 0x2c8   : > { %v8466_v20 = vpop.permute.xlu0 %1605  ;;  %v3633_v50 = vmax.f32 %v3051_v10, %v6194_v34  ;;  %v3634_v31 = vmax.f32 %v3052_v23, %v6195_v32  ;;  %v3635_v55 = vmax.f32 %v3053_v62, %v6196_v24  ;;  %v3752_v9 = vmax.f32 %v3632_v13, %v3640_v14 }
 0x2c9   : > { %v8468_v26 = vpop.permute.xlu2 %2364  ;;  %v2981_v25 = vmul.f32 %v6808_v41, %v8366_v35 }
 0x2ca   : > { %v3753_v16 = vmax.f32 %v3633_v50, %v3641_v61  ;;  %v3754_v6 = vmax.f32 %v3634_v31, %v3642_v1  ;;  %v3755_v46 = vmax.f32 %v3635_v55, %v3643_v48  ;;  %v3902_v18 = vperm.slane %v3752_v9, 0 }
 0x2cb   : > { %v3063_v39 = vrot.slane %v2981_v25, 2  ;;  %v3064_v54 = vrot.slane %v2981_v25, 4  ;;  %v3065_v15 = vrot.slane %v2981_v25, 6  ;;  %v6209_v62 = vrot.slane %v2981_v25, 9 }
 0x2cc   : > { %v3903_v0 = vperm.slane %v3753_v16, 0  ;;  %v3904_v43 = vperm.slane %v3754_v6, 0  ;;  %v3971_v37 = vsel %vm3960_vm7, %v3902_v18, %v8409_v36  ;;  %v3905_v23 = vperm.slane %v3755_v46, 0  ;;  %v8487_v18 = vld [vmem:[#allocation2 + $0x142] sm:$0xff] }
 0x2cd   : > { %v6810_v10 = vpop.eup %6809  ;;  %2147 = vperm.xlu1 %6757, %v2023_v17   ;;  %v6210_v34 = vrot.slane %v3063_v39, 9  ;;  %v6211_v32 = vrot.slane %v3064_v54, 9  ;;  %v6212_v24 = vrot.slane %v3065_v15, 9  ;;  %v3648_v9 = vmax.f32 %v2981_v25, %v6209_v62 }
 0x2ce   : > { %v3972_v35 = vsel %vm3962_vm8, %v3903_v0, %v3971_v37  ;;  %v2983_v38 = vmul.f32 %v6810_v10, %v8402_v21  ;;  %2167 = vperm.xlu0 %6756, %v2027_v47  }
 0x2cf   : > { %v8477_v14 = vpop.permute.xlu1 %1615  ;;  %1892 = vperm.xlu2 %6758, %v8471_v63   ;;  %v3973_v60 = vsel %vm3964_vm9, %v3904_v43, %v3972_v35  ;;  %v3649_v16 = vmax.f32 %v3063_v39, %v6210_v34  ;;  %v3650_v6 = vmax.f32 %v3064_v54, %v6211_v32  ;;  %v3651_v17 = vmax.f32 %v3065_v15, %v6212_v24 }
 0x2d0   : > { %v8481_v13 = vpop.permute.xlu0 %2107  ;;  %v3974_v36 = vsel %vm3966_vm10, %v3905_v23, %v3973_v60  ;;  %v3069_v41 = vrot.slane %v2983_v38, 2  ;;  %v3070_v61 = vrot.slane %v2983_v38, 4  ;;  %v3071_v1 = vrot.slane %v2983_v38, 6 }
 0x2d1   : > { %v8484_v48 = vpop.permute.xlu2 %2102  ;;  %4027 = vst.msk [vmem:[#allocation3 + $0x21] sm:$0xff] %vm3804_vm2, %v3974_v36  ;;  %v6217_v21 = vrot.slane %v2983_v38, 9 }
 0x2d2   : > { %v6218_v50 = vrot.slane %v3069_v41, 9  ;;  %v6219_v31 = vrot.slane %v3070_v61, 9  ;;  %v6220_v55 = vrot.slane %v3071_v1, 9 }
 0x2d3   : > { %v3656_v46 = vmax.f32 %v2983_v38, %v6217_v21 }
 0x2d4   : > { %v3657_v47 = vmax.f32 %v3069_v41, %v6218_v50  ;;  %v3658_v0 = vmax.f32 %v3070_v61, %v6219_v31  ;;  %v3659_v43 = vmax.f32 %v3071_v1, %v6220_v55  ;;  %v8502_v41 = vld [vmem:[#allocation2 + $0x15a] sm:$0xff]  ;;  %v8506_v1 = vld [vmem:[#allocation2 + $0x169] sm:$0xff] }
 0x2d5   : > { %v3760_v37 = vmax.f32 %v3648_v9, %v3656_v46  ;;  %1882 = vperm.xlu1 %6757, %v8272_v5   ;;  %9804 = vst [vmem:[#allocation10_spill] sm:$0xff] %v8506_v1  ;;  %v2022_v50 = vld [vmem:[#allocation2 + $0x128] sm:$0xff]  ;;  %v2026_v9 = vld [vmem:[#allocation2 + $0x158] sm:$0xff] }
 0x2d6   : > { %v3761_v10 = vmax.f32 %v3649_v16, %v3657_v47  ;;  %v3762_v23 = vmax.f32 %v3650_v6, %v3658_v0  ;;  %v3763_v35 = vmax.f32 %v3651_v17, %v3659_v43  ;;  %1902 = vperm.xlu0 %6756, %v8487_v18  }
 0x2d7   : > { %v2118_v60 = vpop.permute.xlu1 %2117  ;;  %2394 = vperm.xlu2 %6758, %v8343_v19   ;;  %v3910_v25 = vperm.slane %v3760_v37, 0 }
 0x2d8   : > { %v2212_v39 = vmul.f32 %v7821_v53, %v2118_v60  ;;  %v8493_v54 = vpop.permute.xlu0 %1842  ;;  %v3911_v15 = vperm.slane %v3761_v10, 0  ;;  %v3912_v62 = vperm.slane %v3762_v23, 0  ;;  %v4298_v38 = vld [vmem:[#allocation3 + $0x20] sm:$0xff]  ;;  %v3913_v36 = vperm.slane %v3763_v35, 0  ;;  %v2024_v60 = vld [vmem:[#allocation2 + $0x140] sm:$0xff] }
 0x2d9   : > { %v8495_v34 = vpop.permute.xlu2 %2132  ;;  %v3978_v5 = vsel %vm3960_vm7, %v3910_v25, %v8443_v40  ;;  %v4305_v24 = vpack.c.bf16 %v4298_v38, %v8125_v22  ;;  %v4056_v31 = vld [vmem:[#allocation3 + $0x21] sm:$0xff] }
 0x2da   : > { %v2244_v32 = vadd.f32 %v2212_v39, %v8459_v4  ;;  %v3979_v19 = vsel %vm3962_vm8, %v3911_v15, %v3978_v5  ;;  %v4206_v55 = vld [vmem:[#allocation3 + $0x22] sm:$0xff] }
 0x2db   : > { %v3980_v61 = vsel %vm3964_vm9, %v3912_v62, %v3979_v19  ;;  %6377 = vmatmul.msk.bf16.vlgmr.msra.gmra.mxu3 %vm3804_vm2, %v4305_v24  ;;  %v2028_v25 = vld [vmem:[#allocation2 + $0x170] sm:$0xff] }
 0x2dc   : > { %v3981_v21 = vsel %vm3966_vm10, %v3913_v36, %v3980_v61  ;;  %v9806_v24 = vld [vmem:[#allocation17_spill] sm:$0xff]  ;;  %v9807_v19 = vld [vmem:[#allocation20_spill] sm:$0xff] }
 0x2dd   : > { %4028 = vst.msk [vmem:[#allocation3 + $0x31] sm:$0xff] %vm3804_vm2, %v3981_v21  ;;  %1912 = vperm.xlu1 %6757, %v8502_v41   ;;  %v667_v61 = vmul.f32 %v7784_v28, %v9807_v19  ;;  %v9808_v21 = vld [vmem:[#allocation24_spill] sm:$0xff] }
 0x2de   : > { %2404 = vperm.xlu0 %6756, %v8312_v57  }
 0x2df   : > { %v8512_v22 = vpop.permute.xlu1 %1852  ;;  %2424 = vperm.xlu2 %6758, %v8506_v1   ;;  %v8591_v1 = vld [vmem:[#allocation2 + $0x16a] sm:$0xff] }
 0x2e0   : > { %v8515_v40 = vpop.permute.xlu0 %1872 }
 0x2e1   : > { %v2634_v4 = vpop.permute.xlu2 %2633 }
 0x2e2   : > { %v2728_v23 = vmul.f32 %v7852_v59, %v2634_v4  ;;  %v660_v4 = vmul.f32 %v7784_v28, %v9808_v21  ;;  %v9819_v21 = vld [vmem:[#allocation57_spill] sm:$0xff] }
 0x2e4   : > { %v4057_v16 = vld [vmem:[#allocation3 + $0x31] sm:$0xff] }
 0x2e5   : > { %v8517_v6 = vld [vmem:[#allocation3 + $0x30] sm:$0xff]  ;;  %v4063_v17 = vpack.c.bf16 %v4057_v16, %v4056_v31  ;;  %2414 = vperm.xlu1 %6757, %v8356_v51   ;;  %v9810_v31 = vld [vmem:[#allocation45_spill] sm:$0xff] }
 0x2e6   : > { %9805 = vst [vmem:[#allocation12_spill] sm:$0xff] %v8517_v6  ;;  %v4207_v46 = vld [vmem:[#allocation3 + $0x32] sm:$0xff]  ;;  %v4043_v47 = vpack.c.bf16 %v8517_v6, %v4298_v38  ;;  %2142 = vperm.xlu0 %6756, %v2022_v50   ;;  %v9809_v50 = vld [vmem:[#allocation25_spill] sm:$0xff] }
 0x2e7   : > { %v4213_v0 = vpack.c.bf16 %v4207_v46, %v4206_v55  ;;  %v2355_v57 = vpop.permute.xlu1 %2354  ;;  %2162 = vperm.xlu2 %6758, %v2026_v9   ;;  %6318 = vmatmul.msk.bf16.gmra.mxu0 %vm3804_vm2, %v4063_v17  ;;  %v919_v55 = vmul.f32 %v7782_v11, %v9810_v31  ;;  %v9811_v9 = vld [vmem:[#allocation26_spill] sm:$0xff]  ;;  %v9828_v6 = vld [vmem:[#allocation75_spill] sm:$0xff] }
 0x2e8   : > { %6338 = vmatmul.msk.bf16.gmra.mxu1 %vm3804_vm2, %v4043_v47  ;;  %v2375_v43 = vpop.permute.xlu0 %2374  ;;  %v8549_v16 = vmul.f32 %v7784_v28, %v9811_v9  ;;  %v9813_v46 = vld [vmem:[#allocation30_spill] sm:$0xff]  ;;  %v9814_v47 = vld [vmem:[#allocation32_spill] sm:$0xff] }
 0x2e9   : > { %6358 = vmatmul.msk.bf16.gmra.mxu2 %vm3804_vm2, %v4213_v0  ;;  %v2469_v37 = vmul.f32 %v7841_v49, %v2375_v43  ;;  %v8525_v10 = vpop.permute.xlu2 %2369  ;;  %v666_v17 = vmul.f32 %v7784_v28, %v9813_v46  ;;  %v669_v0 = vmul.f32 %v7784_v28, %v9814_v47  ;;  %v9815_v43 = vld [vmem:[#allocation53_spill] sm:$0xff] }
 0x2ea   : > { %9812 = vst [vmem:[#allocation40_spill] sm:$0xff] %v8549_v16 }
 0x2eb   : > { %v2501_v35 = vadd.f32 %v2469_v37, %v2244_v32  ;;  %v664_v32 = vmul.f32 %v7784_v28, %v9806_v24  ;;  %v917_v37 = vmul.f32 %v7782_v11, %v9815_v43  ;;  %v9818_v24 = vld [vmem:[#allocation56_spill] sm:$0xff]  ;;  %v9823_v43 = vld [vmem:[#allocation67_spill] sm:$0xff] }
 0x2ec   : > { %v921_v19 = vmul.f32 %v7782_v11, %v9818_v24  ;;  %v9825_v24 = vld [vmem:[#allocation68_spill] sm:$0xff] }
 0x2ed   : > { %v2760_v51 = vadd.f32 %v2728_v23, %v2501_v35  ;;  %2152 = vperm.xlu1 %6757, %v2024_v60   ;;  %v9816_v23 = vld [vmem:[#allocation54_spill] sm:$0xff]  ;;  %v2208_v60 = vmul.f32 %v7821_v53, %v8385_v30  ;;  %v9820_v30 = vld [vmem:[#allocation59_spill] sm:$0xff]  ;;  %v949_v47 = vadd.f32 %v917_v37, %v660_v4 }
 0x2ee   : > { %2172 = vperm.xlu0 %6756, %v2028_v25   ;;  %v928_v35 = vmul.f32 %v7782_v11, %v9816_v23  ;;  %v2465_v25 = vmul.f32 %v7841_v49, %v2355_v57  ;;  %v924_v57 = vmul.f32 %v7782_v11, %v9820_v30  ;;  %v9824_v23 = vld [vmem:[#allocation115_spill] sm:$0xff]  ;;  %v953_v37 = vadd.f32 %v921_v19, %v664_v32  ;;  %v9830_v32 = vld [vmem:[#allocation97_spill] sm:$0xff] }
 0x2ef   : > { %v8529_v39 = vadd.f32 %v8351_v33, %v2760_v51  ;;  %2663 = vperm.xlu2 %6758, %v8392_v52   ;;  %v2385_v15 = vpop.permute.xlu1 %2384  ;;  %v662_v52 = vmul.f32 %v7784_v28, %v9809_v50  ;;  %v9817_v51 = vld [vmem:[#allocation33_spill] sm:$0xff]  ;;  %v923_v50 = vmul.f32 %v7782_v11, %v9819_v21  ;;  %v2240_v9 = vadd.f32 %v2208_v60, %v8440_v12  ;;  %v9827_v30 = vld [vmem:[#allocation71_spill] sm:$0xff] }
 0x2f0   : > { %v8533_v38 = vpop.permute.xlu0 %2112 }
 0x2f1   : > { %v2828_v62 = vsub.f32 0.0, %v8529_v39  ;;  %v8535_v5 = vpop.permute.xlu2 %2618  ;;  %v951_v31 = vadd.f32 %v919_v55, %v662_v52  ;;  %v2497_v12 = vadd.f32 %v2465_v25, %v2240_v9  ;;  %v8597_v9 = vld [vmem:[#allocation2 + $0x171] sm:$0xff] }
 0x2f3   : > { %v2876_v36 = vmul.f32 1.442695, %v2828_v62  ;;  %v671_v62 = vmul.f32 %v7784_v28, %v9817_v51  ;;  %v1176_v51 = vmul.f32 %v9824_v23, %v9823_v43  ;;  %v955_v43 = vadd.f32 %v923_v50, %v666_v17  ;;  %v9831_v17 = vld [vmem:[#allocation116_spill] sm:$0xff] }
 0x2f4   : > { %v1433_v19 = vmul.f32 %v9831_v17, %v9830_v32  ;;  %v9832_v50 = vld [vmem:[#allocation76_spill] sm:$0xff] }
 0x2f5   : > { %6811 = vpow2.f32 %v2876_v36  ;;  %2653 = vperm.xlu1 %6757, %v8358_v42   ;;  %v9821_v36 = vld [vmem:[#allocation60_spill] sm:$0xff]  ;;  %v960_v21 = vadd.f32 %v928_v35, %v671_v62  ;;  %v9829_v35 = vld [vmem:[#allocation63_spill] sm:$0xff] }
 0x2f6   : > { %2673 = vperm.xlu0 %6756, %v8418_v3   ;;  %v926_v42 = vmul.f32 %v7782_v11, %v9821_v36  ;;  %v1182_v3 = vmul.f32 %v9824_v23, %v9825_v24  ;;  %v1185_v36 = vmul.f32 %v9824_v23, %v9827_v30  ;;  %v1178_v24 = vmul.f32 %v9824_v23, %v9828_v6 }
 0x2f7   : > { %2399 = vperm.xlu2 %6758, %v8423_v7   ;;  %v8576_v46 = vpop.permute.xlu1 %2122  ;;  %v2210_v7 = vmul.f32 %v7821_v53, %v8481_v13  ;;  %v8595_v62 = vmul.f32 %v7782_v11, %v9829_v35  ;;  %v1208_v30 = vadd.f32 %v1176_v51, %v949_v47  ;;  %v9833_v47 = vld [vmem:[#allocation79_spill] sm:$0xff] }
 0x2f8   : > { %9822 = vst [vmem:[#allocation43_spill] sm:$0xff] %v8576_v46  ;;  %v2614_v52 = vpop.permute.xlu0 %2613  ;;  %v956_v46 = vadd.f32 %v924_v57, %v667_v61  ;;  %v1180_v61 = vmul.f32 %v9824_v23, %v9832_v50  ;;  %v1183_v51 = vmul.f32 %v9824_v23, %v9833_v47  ;;  %v9836_v47 = vld [vmem:[#allocation98_spill] sm:$0xff] }
 0x2f9   : > { %v8584_v55 = vpop.permute.xlu2 %2648  ;;  %v2724_v4 = vmul.f32 %v7852_v59, %v2614_v52  ;;  %v1214_v52 = vadd.f32 %v1182_v3, %v955_v43  ;;  %v2242_v6 = vadd.f32 %v2210_v7, %v8457_v29  ;;  %v2467_v3 = vmul.f32 %v7841_v49, %v8468_v26  ;;  %v9834_v7 = vld [vmem:[#allocation83_spill] sm:$0xff] }
 0x2fa   : > { %9826 = vst [vmem:[#allocation46_spill] sm:$0xff] %v8584_v55  ;;  %v4119_v60 = vpop.f32.mrf.mxu0  ;;  %v958_v55 = vadd.f32 %v926_v42, %v669_v0  ;;  %v2471_v0 = vmul.f32 %v7841_v49, %v2385_v15  ;;  %v1210_v42 = vadd.f32 %v1178_v24, %v951_v31  ;;  %v1187_v15 = vmul.f32 %v9824_v23, %v9834_v7 }
 0x2fb   : > { %v4184_v28 = vpop.f32.mrf.mxu1  ;;  %v6812_v13 = vpop.eup %6811  ;;  %v2756_v25 = vadd.f32 %v2724_v4, %v2497_v12  ;;  %v1692_v31 = vmul.f32 %v7803_v45, %v8464_v58  ;;  %v1465_v4 = vadd.f32 %v1433_v19, %v1208_v30  ;;  %v1949_v26 = vmul.f32 %v7809_v8, %v8493_v54 }
 0x2fc   : > { %v4185_v16 = vadd.f32 %v4184_v28, %v4119_v60  ;;  %v8602_v28 = vadd.f32 %v1185_v36, %v958_v55  ;;  %v2924_v29 = vadd.f32 1.0, %v6812_v13  ;;  %v9835_v55 = vld [vmem:[#allocation91_spill] sm:$0xff]  ;;  %v2503_v35 = vadd.f32 %v2471_v0, %v8462_v27  ;;  %v9838_v0 = vld [vmem:[#allocation9_spill] sm:$0xff] }
 0x2fd   : > { %v8608_v57 = vadd.f32 %v8351_v33, %v2756_v25  ;;  %2683 = vperm.xlu1 %6757, %v8591_v1   ;;  %v1437_v36 = vmul.f32 %v9831_v17, %v9835_v55  ;;  %v1212_v58 = vadd.f32 %v1180_v61, %v953_v37  ;;  %v1435_v7 = vmul.f32 %v9831_v17, %v9836_v47  ;;  %v9837_v27 = vld [vmem:[#allocation103_spill] sm:$0xff] }
 0x2fe   : > { %2409 = vperm.xlu0 %6756, %v8455_v2   ;;  %v2499_v2 = vadd.f32 %v2467_v3, %v2242_v6  ;;  %6813 = vrcp.f32 %v2924_v29  ;;  %v1215_v54 = vadd.f32 %v1183_v51, %v956_v46  ;;  %v1724_v6 = vadd.f32 %v1692_v31, %v1465_v4  ;;  %v9839_v29 = vld [vmem:[#allocation94_spill] sm:$0xff] }
 0x2ff   : > { %2429 = vperm.xlu2 %6758, %v8597_v9   ;;  %v2824_v12 = vsub.f32 0.0, %v8608_v57  ;;  %v2624_v60 = vpop.permute.xlu1 %2623  ;;  %v8635_v55 = vadd.f32 %v1187_v15, %v960_v21  ;;  %v1469_v61 = vadd.f32 %v1437_v36, %v1212_v58  ;;  %v1467_v21 = vadd.f32 %v1435_v7, %v1210_v42 }
 0x300   : > { %v2726_v24 = vmul.f32 %v7852_v59, %v2624_v60  ;;  %v2644_v13 = vpop.permute.xlu0 %2643  ;;  %v1440_v60 = vmul.f32 %v9831_v17, %v9839_v29  ;;  %v1698_v51 = vmul.f32 %v7803_v45, %v8477_v14  ;;  %v1951_v15 = vmul.f32 %v7809_v8, %v8512_v22 }
 0x301   : > { %v2868_v25 = vmul.f32 1.442695, %v2824_v12  ;;  %v2730_v50 = vmul.f32 %v7852_v59, %v2644_v13  ;;  %v8633_v19 = vpop.permute.xlu2 %1640  ;;  %v1694_v12 = vmul.f32 %v7803_v45, %v9838_v0  ;;  %v1696_v36 = vmul.f32 %v7803_v45, %v8466_v20 }
 0x302   : > { %v4269_v43 = vpop.f32.mrf.mxu2  ;;  %v2758_v30 = vadd.f32 %v2726_v24, %v2499_v2  ;;  %v2209_v31 = vmul.f32 %v7821_v53, %v8484_v48  ;;  %v1955_v22 = vmul.f32 %v7809_v8, %v8515_v40  ;;  %v2725_v40 = vmul.f32 %v7852_v59, %v8535_v5 }
 0x303   : > { %v8628_v32 = vadd.f32 %v4269_v43, %v4185_v16  ;;  %6815 = vpow2.f32 %v2868_v25  ;;  %v2762_v3 = vadd.f32 %v2730_v50, %v2503_v35  ;;  %v1439_v16 = vmul.f32 %v9831_v17, %v9837_v27  ;;  %v9840_v25 = vld [vmem:[#allocation105_spill] sm:$0xff] }
 0x304   : > { %v8642_v37 = vadd.f32 %v8351_v33, %v2758_v30  ;;  %v1981_v43 = vadd.f32 %v1949_v26, %v1724_v6  ;;  %v6814_v26 = vpop.eup %6813  ;;  %v1726_v2 = vadd.f32 %v1694_v12, %v1467_v21  ;;  %v1442_v50 = vmul.f32 %v9831_v17, %v9840_v25  ;;  %v8673_v6 = vld [vmem:[#allocation2 + $0x172] sm:$0xff]  ;;  %v9841_v21 = vld [vmem:[#allocation43_spill] sm:$0xff] }
 0x305   : > { %v8647_v46 = vadd.f32 %v8351_v33, %v2762_v3  ;;  %2419 = vperm.xlu1 %6757, %v8425_v56   ;;  %v1471_v14 = vadd.f32 %v1439_v16, %v1214_v52  ;;  %v1728_v30 = vadd.f32 %v1696_v36, %v1469_v61  ;;  %v8675_v3 = vld [vmem:[#allocation2 + $0x181] sm:$0xff]  ;;  %v8678_v16 = vmul.f32 %v6814_v26, %v8529_v39 }
 0x306   : > { %2658 = vperm.xlu0 %6756, %v8471_v63   ;;  %v2826_v4 = vsub.f32 0.0, %v8642_v37  ;;  %v2211_v63 = vmul.f32 %v7821_v53, %v8533_v38  ;;  %v2241_v35 = vadd.f32 %v2209_v31, %v1981_v43  ;;  %v1983_v47 = vadd.f32 %v1951_v15, %v1726_v2  ;;  %v9843_v26 = vld [vmem:[#allocation46_spill] sm:$0xff] }
 0x307   : > { %2678 = vperm.xlu2 %6758, %v8502_v41   ;;  %v2830_v56 = vsub.f32 0.0, %v8647_v46  ;;  %v2360_v42 = vpop.permute.xlu1 %2359  ;;  %v1730_v58 = vadd.f32 %v1698_v51, %v1471_v14  ;;  %v8680_v12 = vadd.f32 %v1440_v60, %v1215_v54  ;;  %v1953_v61 = vmul.f32 %v7809_v8, %v8449_v44  ;;  %v9842_v44 = vld [vmem:[#allocation106_spill] sm:$0xff] }
 0x308   : > { %v2380_v41 = vpop.permute.xlu0 %2379  ;;  %v2872_v20 = vmul.f32 1.442695, %v2826_v4  ;;  %v2466_v48 = vmul.f32 %v7841_v49, %v2360_v42  ;;  %v2243_v0 = vadd.f32 %v2211_v63, %v1983_v47  ;;  %v2215_v5 = vmul.f32 %v7821_v53, %v8495_v34 }
 0x309   : > { %v6816_v24 = vpop.eup %6815  ;;  %v2880_v13 = vmul.f32 1.442695, %v2830_v56  ;;  %v8669_v7 = vpop.permute.xlu2 %1887  ;;  %v1987_v27 = vadd.f32 %v1955_v22, %v1730_v58  ;;  %v2468_v43 = vmul.f32 %v7841_v49, %v8525_v10  ;;  %v2213_v39 = vmul.f32 %v7821_v53, %v9841_v21 }
 0x30a   : > { %v2920_v52 = vadd.f32 1.0, %v6816_v24  ;;  %6817 = vpow2.f32 %v2872_v20  ;;  %v2498_v38 = vadd.f32 %v2466_v48, %v2241_v35  ;;  %v8694_v54 = vadd.f32 %v1442_v50, %v8602_v28 }
 0x30b   : > { %v1444_v60 = vmul.f32 %v9831_v17, %v9842_v44  ;;  %v3084_v10 = vrot.slane %v8678_v16, 2  ;;  %v2247_v15 = vadd.f32 %v2215_v5, %v1987_v27  ;;  %v2500_v4 = vadd.f32 %v2468_v43, %v2243_v0 }
 0x30c   : > { %6819 = vrcp.f32 %v2920_v52  ;;  %v2757_v29 = vadd.f32 %v2725_v40, %v2498_v38  ;;  %v3085_v42 = vrot.slane %v8678_v16, 4  ;;  %v3086_v28 = vrot.slane %v8678_v16, 6 }
 0x30d   : > { %6821 = vpow2.f32 %v2880_v13  ;;  %2668 = vperm.xlu1 %6757, %v8487_v18   ;;  %v1985_v18 = vadd.f32 %v1953_v61, %v1728_v30  ;;  %v2731_v14 = vmul.f32 %v7852_v59, %v9843_v26  ;;  %v6237_v63 = vrot.slane %v8678_v16, 9 }
 0x30e   : > { %2688 = vperm.xlu0 %6756, %v8673_v6   ;;  %v8699_v51 = vadd.f32 %v8351_v33, %v2757_v29  ;;  %v2470_v58 = vmul.f32 %v7841_v49, %v2380_v41  ;;  %v6238_v52 = vrot.slane %v3084_v10, 9  ;;  %v6239_v38 = vrot.slane %v3085_v42, 9  ;;  %v9845_v29 = vld [vmem:[#allocation10_spill] sm:$0xff] }
 0x30f   : > { %1670 = vperm.xlu2 %6758, %v8675_v3   ;;  %v2390_v34 = vpop.permute.xlu1 %2389  ;;  %v2245_v24 = vadd.f32 %v2213_v39, %v1985_v18  ;;  %v6240_v27 = vrot.slane %v3086_v28, 9  ;;  %v8736_v26 = vmul.f32 %v7803_v45, %v8633_v19  ;;  %v2031_v19 = vld [vmem:[#allocation2 + $0x198] sm:$0xff] }
 0x310   : > { %v2472_v36 = vmul.f32 %v7841_v49, %v2390_v34  ;;  %v2629_v31 = vpop.permute.xlu0 %2628  ;;  %v6818_v56 = vpop.eup %6817  ;;  %v2825_v50 = vsub.f32 0.0, %v8699_v51 }
 0x311   : > { %v2727_v2 = vmul.f32 %v7852_v59, %v2629_v31  ;;  %v2922_v20 = vadd.f32 1.0, %v6818_v56  ;;  %v8709_v35 = vpop.permute.xlu2 %1625  ;;  %v2502_v44 = vadd.f32 %v2470_v58, %v2245_v24  ;;  %v8727_v56 = vadd.f32 %v1444_v60, %v8635_v55 }
 0x312   : > { %v6820_v22 = vpop.eup %6819  ;;  %v2504_v13 = vadd.f32 %v2472_v36, %v2247_v15  ;;  %9844 = vst [vmem:[#allocation47_spill] sm:$0xff] %v8709_v35  ;;  %v2870_v39 = vmul.f32 1.442695, %v2825_v50  ;;  %v8742_v55 = vmax.f32 %v3085_v42, %v6239_v38  ;;  %v8744_v60 = vmax.f32 %v3086_v28, %v6240_v27 }
 0x313   : > { %v6822_v48 = vpop.eup %6821  ;;  %v2984_v25 = vmul.f32 %v6820_v22, %v8608_v57  ;;  %v2759_v47 = vadd.f32 %v2727_v2, %v2500_v4  ;;  %6823 = vrcp.f32 %v2922_v20 }
 0x314   : > { %v2926_v30 = vadd.f32 1.0, %v6822_v48  ;;  %v2763_v40 = vadd.f32 %v2731_v14, %v2504_v13  ;;  %v8738_v13 = vld [vmem:[#allocation2 + $0x182] sm:$0xff] }
 0x315   : > { %v3072_v0 = vrot.slane %v2984_v25, 2  ;;  %v3073_v61 = vrot.slane %v2984_v25, 4  ;;  %1660 = vperm.xlu1 %6757, %v9845_v29   ;;  %v3074_v5 = vrot.slane %v2984_v25, 6  ;;  %v8719_v57 = vadd.f32 %v8351_v33, %v2759_v47 }
 0x316   : > { %6825 = vrcp.f32 %v2926_v30  ;;  %v8716_v43 = vadd.f32 %v8351_v33, %v2763_v40  ;;  %1917 = vperm.xlu0 %6756, %v8591_v1   ;;  %v6221_v41 = vrot.slane %v2984_v25, 9  ;;  %v8730_v1 = vmax.f32 %v8678_v16, %v6237_v63 }
 0x317   : > { %1665 = vperm.xlu2 %6758, %v8597_v9   ;;  %v6222_v21 = vrot.slane %v3072_v0, 9  ;;  %v2639_v18 = vpop.permute.xlu1 %2638  ;;  %v6223_v34 = vrot.slane %v3073_v61, 9  ;;  %v2827_v36 = vsub.f32 0.0, %v8719_v57  ;;  %v8732_v9 = vmax.f32 %v3084_v10, %v6238_v52  ;;  %v8747_v10 = vld [vmem:[#allocation2 + $0x189] sm:$0xff] }
 0x318   : > { %v2831_v15 = vsub.f32 0.0, %v8716_v43  ;;  %v2729_v31 = vmul.f32 %v7852_v59, %v2639_v18  ;;  %v1621_v4 = vpop.permute.xlu0 %1620  ;;  %v6224_v2 = vrot.slane %v3074_v5, 9  ;;  %6827 = vpow2.f32 %v2870_v39 }
 0x319   : > { %v6824_v14 = vpop.eup %6823  ;;  %v2874_v24 = vmul.f32 1.442695, %v2827_v36  ;;  %v8740_v48 = vpop.permute.xlu2 %1655  ;;  %v3660_v50 = vmax.f32 %v2984_v25, %v6221_v41  ;;  %v3661_v58 = vmax.f32 %v3072_v0, %v6222_v21  ;;  %v3662_v47 = vmax.f32 %v3073_v61, %v6223_v34 }
 0x31a   : > { %v2882_v22 = vmul.f32 1.442695, %v2831_v15  ;;  %v2761_v20 = vadd.f32 %v2729_v31, %v2502_v44  ;;  %9846 = vst [vmem:[#allocation48_spill] sm:$0xff] %v8740_v48  ;;  %v2986_v16 = vmul.f32 %v6824_v14, %v8642_v37  ;;  %v3663_v42 = vmax.f32 %v3074_v5, %v6224_v2 }
 0x31c   : > { %v6826_v63 = vpop.eup %6825  ;;  %6829 = vpow2.f32 %v2882_v22  ;;  %v3078_v52 = vrot.slane %v2986_v16, 2  ;;  %v3079_v30 = vrot.slane %v2986_v16, 4  ;;  %v3080_v40 = vrot.slane %v2986_v16, 6 }
 0x31d   : > { %v6229_v29 = vrot.slane %v2986_v16, 9  ;;  %1927 = vperm.xlu1 %6757, %v8738_v13   ;;  %v2990_v28 = vmul.f32 %v6826_v63, %v8647_v46  ;;  %6831 = vpow2.f32 %v2874_v24  ;;  %v8752_v37 = vadd.f32 %v8351_v33, %v2761_v20  ;;  %v2029_v24 = vld [vmem:[#allocation2 + $0x180] sm:$0xff] }
 0x31e   : > { %1675 = vperm.xlu0 %6756, %v8747_v10   ;;  %v6230_v25 = vrot.slane %v3078_v52, 9  ;;  %v6231_v38 = vrot.slane %v3079_v30, 9  ;;  %v6232_v27 = vrot.slane %v3080_v40, 9  ;;  %v6828_v5 = vpop.eup %6827 }
 0x31f   : > { %2187 = vperm.xlu2 %6758, %v2031_v19   ;;  %v3668_v0 = vmax.f32 %v2986_v16, %v6229_v29  ;;  %v1631_v61 = vpop.permute.xlu1 %1630  ;;  %v3090_v41 = vrot.slane %v2990_v28, 2  ;;  %v3091_v21 = vrot.slane %v2990_v28, 4  ;;  %v3092_v39 = vrot.slane %v2990_v28, 6 }
 0x320   : > { %v6245_v44 = vrot.slane %v2990_v28, 9  ;;  %v8755_v18 = vpop.permute.xlu0 %1650  ;;  %v3669_v46 = vmax.f32 %v3078_v52, %v6230_v25  ;;  %v3670_v34 = vmax.f32 %v3079_v30, %v6231_v38  ;;  %v3671_v15 = vmax.f32 %v3080_v40, %v6232_v27 }
 0x321   : > { %v3764_v33 = vmax.f32 %v3660_v50, %v3668_v0  ;;  %v6246_v31 = vrot.slane %v3090_v41, 9  ;;  %v6247_v14 = vrot.slane %v3091_v21, 9  ;;  %v6248_v2 = vrot.slane %v3092_v39, 9  ;;  %v8757_v20 = vpop.permute.xlu2 %2157 }
 0x322   : > { %v6830_v36 = vpop.eup %6829  ;;  %v3684_v22 = vmax.f32 %v2990_v28, %v6245_v44  ;;  %v3765_v16 = vmax.f32 %v3661_v58, %v3669_v46  ;;  %v3766_v19 = vmax.f32 %v3662_v47, %v3670_v34  ;;  %v3767_v63 = vmax.f32 %v3663_v42, %v3671_v15 }
 0x323   : > { %v1699_v29 = vmul.f32 %v7803_v45, %v1621_v4  ;;  %v6832_v48 = vpop.eup %6831  ;;  %v3685_v35 = vmax.f32 %v3090_v41, %v6246_v31  ;;  %v3686_v11 = vmax.f32 %v3091_v21, %v6247_v14  ;;  %v3687_v52 = vmax.f32 %v3092_v39, %v6248_v2  ;;  %v2032_v31 = vld [vmem:[#allocation2 + $0x1a0] sm:$0xff] }
 0x324   : > { %v3772_v30 = vmax.f32 %v8730_v1, %v3684_v22  ;;  %v3914_v50 = vperm.slane %v3764_v33, 0  ;;  %v3915_v40 = vperm.slane %v3765_v16, 0  ;;  %v3916_v25 = vperm.slane %v3766_v19, 0  ;;  %v9848_v19 = vld [vmem:[#allocation40_spill] sm:$0xff] }
 0x325   : > { %v2921_v38 = vadd.f32 1.0, %v6828_v5  ;;  %2177 = vperm.xlu1 %6757, %v2029_v24   ;;  %v3773_v28 = vmax.f32 %v8732_v9, %v3685_v35  ;;  %v3774_v27 = vmax.f32 %v8742_v55, %v3686_v11  ;;  %v3775_v58 = vmax.f32 %v8744_v60, %v3687_v52  ;;  %v8776_v5 = vld [vmem:[#allocation2 + $0x18a] sm:$0xff] }
 0x326   : > { %v2829_v47 = vsub.f32 0.0, %v8752_v37  ;;  %1922 = vperm.xlu0 %6756, %v8673_v6   ;;  %v3917_v4 = vperm.slane %v3767_v63, 0  ;;  %v3982_v1 = vsel %vm3954_vm4, %v3915_v40, %v3914_v50  ;;  %v2923_v42 = vadd.f32 1.0, %v6832_v48 }
 0x327   : > { %2434 = vperm.xlu2 %6758, %v8675_v3   ;;  %6833 = vrcp.f32 %v2921_v38  ;;  %v1878_v0 = vpop.permute.xlu1 %1877  ;;  %v3983_v41 = vsel %vm3956_vm5, %v3916_v25, %v3982_v1  ;;  %v3922_v21 = vperm.slane %v3772_v30, 0  ;;  %v3923_v35 = vperm.slane %v3773_v28, 0 }
 0x328   : > { %v3924_v9 = vperm.slane %v3774_v27, 0  ;;  %v1898_v11 = vpop.permute.xlu0 %1897  ;;  %v8770_v55 = vsel %vm3958_vm6, %v3917_v4, %v3983_v41  ;;  %v1958_v6 = vmul.f32 %v7809_v8, %v8669_v7  ;;  %v2927_v60 = vadd.f32 1.0, %v6830_v36  ;;  %v2290_v36 = vld [vmem:[#allocation2 + $0x199] sm:$0xff] }
 0x329   : > { %v1701_v3 = vmul.f32 %v7803_v45, %v1631_v61  ;;  %v3925_v39 = vperm.slane %v3775_v58, 0  ;;  %v3989_v44 = vsel %vm3954_vm4, %v3923_v35, %v3922_v21  ;;  %6835 = vrcp.f32 %v2923_v42  ;;  %v8778_v46 = vpop.permute.xlu2 %1892  ;;  %v9847_v61 = vld [vmem:[#allocation84_spill] sm:$0xff] }
 0x32a   : > { %v2878_v48 = vmul.f32 1.442695, %v2829_v47  ;;  %v3990_v34 = vsel %vm3956_vm5, %v3924_v9, %v3989_v44  ;;  %v1731_v15 = vadd.f32 %v1699_v29, %v8680_v12  ;;  %v1956_v7 = vmul.f32 %v7809_v8, %v1878_v0 }
 0x32b   : > { %v1733_v33 = vadd.f32 %v1701_v3, %v8694_v54  ;;  %v1189_v14 = vmul.f32 %v9824_v23, %v9847_v61  ;;  %v8787_v2 = vsel %vm3958_vm6, %v3925_v39, %v3990_v34  ;;  %v1735_v22 = vadd.f32 %v8736_v26, %v8727_v56  ;;  %v9849_v56 = vld [vmem:[#allocation99_spill] sm:$0xff] }
 0x32c   : > { %v1960_v24 = vmul.f32 %v7809_v8, %v1898_v11  ;;  %6837 = vrcp.f32 %v2927_v60  ;;  %v8792_v12 = vadd.f32 %v1956_v7, %v1731_v15  ;;  %v962_v63 = vadd.f32 %v8595_v62, %v9848_v19 }
 0x32d   : > { %v6834_v16 = vpop.eup %6833  ;;  %1932 = vperm.xlu1 %6757, %v8776_v5   ;;  %v8795_v54 = vadd.f32 %v1958_v6, %v1733_v33  ;;  %6839 = vpow2.f32 %v2878_v48  ;;  %v1446_v26 = vmul.f32 %v9831_v17, %v9849_v56  ;;  %v1705_v62 = vmul.f32 %v7803_v45, %v8755_v18  ;;  %v2291_v56 = vld [vmem:[#allocation2 + $0x1a1] sm:$0xff] }
 0x32e   : > { %v2985_v29 = vmul.f32 %v6834_v16, %v8699_v51  ;;  %v1992_v52 = vadd.f32 %v1960_v24, %v1735_v22  ;;  %2444 = vperm.xlu0 %6756, %v2290_v36   ;;  %v1221_v40 = vadd.f32 %v1189_v14, %v962_v63  ;;  %v2030_v51 = vld [vmem:[#allocation2 + $0x188] sm:$0xff]  ;;  %v2220_v35 = vmul.f32 %v7821_v53, %v8757_v20  ;;  %v2547_v63 = vld [vmem:[#allocation2 + $0x19a] sm:$0xff] }
 0x32f   : > { %2192 = vperm.xlu2 %6758, %v2032_v31   ;;  %v1908_v30 = vpop.permute.xlu1 %1907  ;;  %v6836_v50 = vpop.eup %6835 }
 0x330   : > { %v3075_v25 = vrot.slane %v2985_v29, 2  ;;  %v8802_v38 = vpop.permute.xlu0 %1635  ;;  %v3076_v28 = vrot.slane %v2985_v29, 4  ;;  %v3077_v27 = vrot.slane %v2985_v29, 6  ;;  %v2987_v58 = vmul.f32 %v6836_v50, %v8719_v57 }
 0x331   : > { %v8807_v47 = vpop.permute.xlu2 %2394  ;;  %v1478_v1 = vadd.f32 %v1446_v26, %v1221_v40  ;;  %v6225_v42 = vrot.slane %v2985_v29, 9  ;;  %v1962_v57 = vmul.f32 %v7809_v8, %v1908_v30  ;;  %v2548_v26 = vld [vmem:[#allocation2 + $0x1a2] sm:$0xff]  ;;  %v8822_v30 = vadd.f32 %v2220_v35, %v1992_v52 }
 0x332   : > { %v6838_v4 = vpop.eup %6837  ;;  %v6226_v0 = vrot.slane %v3075_v25, 9  ;;  %v3081_v21 = vrot.slane %v2987_v58, 2  ;;  %v6227_v9 = vrot.slane %v3076_v28, 9  ;;  %v6228_v11 = vrot.slane %v3077_v27, 9 }
 0x333   : > { %v6840_v41 = vpop.eup %6839  ;;  %v1737_v6 = vadd.f32 %v1705_v62, %v1478_v1  ;;  %v3082_v60 = vrot.slane %v2987_v58, 4  ;;  %v3083_v18 = vrot.slane %v2987_v58, 6  ;;  %v6233_v3 = vrot.slane %v2987_v58, 9 }
 0x334   : > { %v6234_v39 = vrot.slane %v3081_v21, 9  ;;  %v3664_v44 = vmax.f32 %v2985_v29, %v6225_v42  ;;  %v3665_v48 = vmax.f32 %v3075_v25, %v6226_v0  ;;  %v2991_v34 = vmul.f32 %v6838_v4, %v8716_v43 }
 0x335   : > { %2182 = vperm.xlu1 %6757, %v2030_v51   ;;  %v2925_v15 = vadd.f32 1.0, %v6840_v41  ;;  %v6235_v33 = vrot.slane %v3082_v60, 9  ;;  %v6236_v7 = vrot.slane %v3083_v18, 9  ;;  %v3672_v36 = vmax.f32 %v2987_v58, %v6233_v3 }
 0x336   : > { %2693 = vperm.xlu0 %6756, %v8738_v13   ;;  %v3673_v31 = vmax.f32 %v3081_v21, %v6234_v39  ;;  %v3666_v14 = vmax.f32 %v3076_v28, %v6227_v9  ;;  %v3667_v22 = vmax.f32 %v3077_v27, %v6228_v11  ;;  %v8817_v24 = vadd.f32 %v1962_v57, %v1737_v6 }
 0x337   : > { %2439 = vperm.xlu2 %6758, %v8747_v10   ;;  %v8815_v20 = vpop.permute.xlu1 %1645  ;;  %6841 = vrcp.f32 %v2925_v15  ;;  %v3674_v13 = vmax.f32 %v3082_v60, %v6235_v33  ;;  %v3675_v16 = vmax.f32 %v3083_v18, %v6236_v7  ;;  %v3768_v10 = vmax.f32 %v3664_v44, %v3672_v36 }
 0x338   : > { %v2138_v61 = vpop.permute.xlu0 %2137  ;;  %v3769_v19 = vmax.f32 %v3665_v48, %v3673_v31  ;;  %v3093_v27 = vrot.slane %v2991_v34, 2  ;;  %v3094_v58 = vrot.slane %v2991_v34, 4  ;;  %v3095_v62 = vrot.slane %v2991_v34, 6 }
 0x339   : > { %v8819_v29 = vpop.permute.xlu2 %2424  ;;  %v2216_v43 = vmul.f32 %v7821_v53, %v2138_v61  ;;  %v3770_v50 = vmax.f32 %v3666_v14, %v3674_v13  ;;  %v3771_v40 = vmax.f32 %v3667_v22, %v3675_v16  ;;  %v3918_v25 = vperm.slane %v3768_v10, 0 }
 0x33a   : > { %v3919_v28 = vperm.slane %v3769_v19, 0  ;;  %v6249_v52 = vrot.slane %v2991_v34, 9  ;;  %v6251_v6 = vrot.slane %v3094_v58, 9  ;;  %v6252_v57 = vrot.slane %v3095_v62, 9 }
 0x33b   : > { %v8825_v51 = vadd.f32 %v2216_v43, %v8792_v12  ;;  %v3920_v4 = vperm.slane %v3770_v50, 0  ;;  %v3985_v1 = vsel %vm3960_vm7, %v3918_v25, %v8770_v55  ;;  %v3921_v0 = vperm.slane %v3771_v40, 0 }
 0x33c   : > { %v3986_v41 = vsel %vm3962_vm8, %v3919_v28, %v3985_v1  ;;  %v6250_v12 = vrot.slane %v3093_v27, 9  ;;  %v3688_v44 = vmax.f32 %v2991_v34, %v6249_v52  ;;  %v3690_v31 = vmax.f32 %v3094_v58, %v6251_v6  ;;  %v9850_v28 = vld [vmem:[#allocation12_spill] sm:$0xff] }
 0x33d   : > { %2703 = vperm.xlu1 %6757, %v2547_v63   ;;  %v6842_v42 = vpop.eup %6841  ;;  %v3987_v35 = vsel %vm3964_vm9, %v3920_v4, %v3986_v41  ;;  %v3691_v61 = vmax.f32 %v3095_v62, %v6252_v57 }
 0x33e   : > { %2449 = vperm.xlu0 %6756, %v2291_v56   ;;  %v2989_v9 = vmul.f32 %v6842_v42, %v8752_v37  ;;  %v3988_v60 = vsel %vm3966_vm10, %v3921_v0, %v3987_v35  ;;  %v3689_v36 = vmax.f32 %v3093_v27, %v6250_v12 }
 0x33f   : > { %2708 = vperm.xlu2 %6758, %v2548_v26   ;;  %v2148_v21 = vpop.permute.xlu1 %2147  ;;  %4029 = vst.msk [vmem:[#allocation3 + $0x41] sm:$0xff] %vm3804_vm2, %v3988_v60 }
 0x340   : > { %v8832_v11 = vpop.permute.xlu0 %2167  ;;  %v3087_v55 = vrot.slane %v2989_v9, 2  ;;  %v3088_v18 = vrot.slane %v2989_v9, 4  ;;  %v3089_v3 = vrot.slane %v2989_v9, 6  ;;  %v6241_v39 = vrot.slane %v2989_v9, 9 }
 0x341   : > { %v8836_v48 = vpop.permute.xlu2 %2162  ;;  %v2218_v4 = vmul.f32 %v7821_v53, %v2148_v21 }
 0x342   : > { %v6242_v15 = vrot.slane %v3087_v55, 9  ;;  %v6243_v33 = vrot.slane %v3088_v18, 9  ;;  %v6244_v7 = vrot.slane %v3089_v3, 9  ;;  %v3680_v37 = vmax.f32 %v2989_v9, %v6241_v39 }
 0x344   : > { %v3681_v14 = vmax.f32 %v3087_v55, %v6242_v15  ;;  %v3682_v22 = vmax.f32 %v3088_v18, %v6243_v33  ;;  %v3683_v13 = vmax.f32 %v3089_v3, %v6244_v7  ;;  %v3776_v16 = vmax.f32 %v3680_v37, %v3688_v44 }
 0x345   : > { %2698 = vperm.xlu1 %6757, %v8776_v5  }
 0x346   : > { %v3777_v19 = vmax.f32 %v3681_v14, %v3689_v36  ;;  %v3778_v63 = vmax.f32 %v3682_v22, %v3690_v31  ;;  %v3779_v34 = vmax.f32 %v3683_v13, %v3691_v61  ;;  %v3926_v43 = vperm.slane %v3776_v16, 0  ;;  %v4300_v26 = vld [vmem:[#allocation3 + $0x40] sm:$0xff]  ;;  %v8876_v31 = vpop.f32.mrf.mxu0  ;;  %v8878_v61 = vpop.f32.mrf.mxu1  ;;  %v9851_v16 = vld [vmem:[#allocation51_spill] sm:$0xff] }
 0x347   : > { %v8839_v10 = vpop.permute.xlu1 %1882  ;;  %v4306_v5 = vpack.c.bf16 %v4300_v26, %v9850_v28  ;;  %v4058_v12 = vld [vmem:[#allocation3 + $0x41] sm:$0xff] }
 0x348   : > { %v8841_v56 = vpop.permute.xlu0 %1902  ;;  %v3927_v50 = vperm.slane %v3777_v19, 0  ;;  %v3928_v40 = vperm.slane %v3778_v63, 0  ;;  %v3992_v25 = vsel %vm3960_vm7, %v3926_v43, %v8787_v2  ;;  %v3929_v27 = vperm.slane %v3779_v34, 0  ;;  %v4208_v6 = vld [vmem:[#allocation3 + $0x42] sm:$0xff]  ;;  %v9853_v43 = vld [vmem:[#allocation23_spill] sm:$0xff] }
 0x349   : > { %6378 = vmatmul.msk.bf16.gmra.mxu3 %vm3804_vm2, %v4306_v5  ;;  %v2664_v1 = vpop.permute.xlu2 %2663  ;;  %v2250_v2 = vadd.f32 %v2218_v4, %v8795_v54  ;;  %v8863_v54 = vld [vmem:[%s9606_s2] ss:$0 sm:$0xff] }
 0x34a   : > { %v3993_v58 = vsel %vm3962_vm8, %v3927_v50, %v3992_v25  ;;  %v2734_v35 = vmul.f32 %v7852_v59, %v2664_v1  ;;  %v9852_v19 = vld [vmem:[#allocation113_spill] sm:$0xff]  ;;  %v9859_v1 = vld [vmem:[#allocation58_spill] sm:$0xff] }
 0x34b   : > { %v3994_v62 = vsel %vm3964_vm9, %v3928_v40, %v3993_v58  ;;  %v925_v63 = vmul.f32 %v9852_v19, %v9851_v16  ;;  %v9855_v40 = vld [vmem:[#allocation55_spill] sm:$0xff]  ;;  %v9856_v5 = vld [vmem:[#allocation29_spill] sm:$0xff] }
 0x34c   : > { %v3995_v42 = vsel %vm3966_vm10, %v3929_v27, %v3994_v62  ;;  %v931_v25 = vmul.f32 %v9852_v19, %v9855_v40  ;;  %v9858_v62 = vld [vmem:[#allocation35_spill] sm:$0xff] }
 0x34d   : > { %4030 = vst.msk [vmem:[#allocation3 + $0x51] sm:$0xff] %vm3804_vm2, %v3995_v42  ;;  %v934_v42 = vmul.f32 %v9852_v19, %v9859_v1 }
 0x34f   : > { %v8852_v52 = vpop.permute.xlu1 %1912 }
 0x350   : > { %v2405_v0 = vpop.permute.xlu0 %2404 }
 0x351   : > { %v2475_v41 = vmul.f32 %v7841_v49, %v2405_v0  ;;  %v8868_v15 = vpop.permute.xlu2 %2399  ;;  %v9860_v0 = vld [vmem:[#allocation36_spill] sm:$0xff] }
 0x353   : > { %v2507_v9 = vadd.f32 %v2475_v41, %v2250_v2  ;;  %v9861_v41 = vld [vmem:[#allocation61_spill] sm:$0xff] }
 0x354   : > { %v4059_v57 = vld [vmem:[#allocation3 + $0x51] sm:$0xff] }
 0x355   : > { %v2766_v21 = vadd.f32 %v2734_v35, %v2507_v9  ;;  %v8857_v60 = vld [vmem:[#allocation3 + $0x50] sm:$0xff]  ;;  %v4064_v18 = vpack.c.bf16 %v4059_v57, %v4058_v12  ;;  %v927_v35 = vmul.f32 %v9852_v19, %v9861_v41  ;;  %v8911_v57 = vpop.f32.mrf.mxu2 }
 0x356   : > { %v4209_v55 = vld [vmem:[#allocation3 + $0x52] sm:$0xff]  ;;  %v4044_v3 = vpack.c.bf16 %v8857_v60, %v4300_v26  ;;  %v9854_v26 = vld [vmem:[#allocation114_spill] sm:$0xff]  ;;  %9864 = vst [vmem:[#allocation52_spill] sm:$0xff] %v8911_v57 }
 0x357   : > { %v4214_v39 = vpack.c.bf16 %v4209_v55, %v4208_v6  ;;  %v8866_v44 = vadd.f32 %v8863_v54, %v2766_v21  ;;  %v2415_v33 = vpop.permute.xlu1 %2414  ;;  %6319 = vmatmul.msk.bf16.gmra.mxu0 %vm3804_vm2, %v4064_v18  ;;  %v670_v50 = vmul.f32 %v9854_v26, %v9853_v43  ;;  %v676_v27 = vmul.f32 %v9854_v26, %v9856_v5  ;;  %v9862_v9 = vld [vmem:[#allocation62_spill] sm:$0xff]  ;;  %v9863_v6 = vld [vmem:[#allocation64_spill] sm:$0xff] }
 0x358   : > { %v8870_v7 = vpop.permute.xlu0 %2142  ;;  %6339 = vmatmul.msk.bf16.gmra.mxu1 %vm3804_vm2, %v4044_v3  ;;  %v672_v4 = vmul.f32 %v9854_v26, %v9858_v62  ;;  %v674_v2 = vmul.f32 %v9854_v26, %v9860_v0  ;;  %v929_v12 = vmul.f32 %v9852_v19, %v9862_v9  ;;  %v932_v21 = vmul.f32 %v9852_v19, %v9863_v6  ;;  %v9865_v55 = vld [vmem:[#allocation38_spill] sm:$0xff]  ;;  %v9866_v3 = vld [vmem:[#allocation39_spill] sm:$0xff] }
 0x359   : > { %v2834_v37 = vsub.f32 0.0, %v8866_v44  ;;  %6359 = vmatmul.msk.bf16.gmra.mxu2 %vm3804_vm2, %v4214_v39  ;;  %v8893_v28 = vpop.permute.xlu2 %2429  ;;  %v675_v18 = vmul.f32 %v9854_v26, %v9865_v55  ;;  %v677_v39 = vmul.f32 %v9854_v26, %v9866_v3  ;;  %v2477_v1 = vmul.f32 %v7841_v49, %v2415_v33  ;;  %v9869_v9 = vld [vmem:[#allocation74_spill] sm:$0xff]  ;;  %v9870_v55 = vld [vmem:[#allocation81_spill] sm:$0xff] }
 0x35a   : > { %v963_v5 = vadd.f32 %v931_v25, %v674_v2  ;;  %v1188_v6 = vmul.f32 %v9824_v23, %v9869_v9  ;;  %v961_v3 = vadd.f32 %v929_v12, %v672_v4  ;;  %v2222_v2 = vmul.f32 %v7821_v53, %v8832_v11 }
 0x35b   : > { %v2888_v36 = vmul.f32 1.442695, %v2834_v37  ;;  %v9867_v37 = vld [vmem:[#allocation41_spill] sm:$0xff]  ;;  %v8924_v41 = vadd.f32 %v934_v42, %v677_v39  ;;  %v8932_v25 = vadd.f32 %v932_v21, %v675_v18  ;;  %v2509_v4 = vadd.f32 %v2477_v1, %v8822_v30  ;;  %v9873_v21 = vld [vmem:[#allocation82_spill] sm:$0xff] }
 0x35c   : > { %v1220_v11 = vadd.f32 %v1188_v6, %v961_v3  ;;  %v9876_v1 = vld [vmem:[#allocation86_spill] sm:$0xff] }
 0x35d   : > { %6843 = vpow2.f32 %v2888_v36  ;;  %v8919_v36 = vmul.f32 %v9854_v26, %v9867_v37  ;;  %v9871_v37 = vld [vmem:[#allocation66_spill] sm:$0xff]  ;;  %v1190_v6 = vmul.f32 %v9824_v23, %v9876_v1 }
 0x35e   : > { %v4362_v14 = vpop.f32.mrf.mxu3  ;;  %v935_v42 = vmul.f32 %v9852_v19, %v9871_v37  ;;  %v1704_v37 = vmul.f32 %v7803_v45, %v8815_v20  ;;  %v1961_v20 = vmul.f32 %v7809_v8, %v8841_v56 }
 0x35f   : > { %v8881_v22 = vadd.f32 %v4362_v14, %v8628_v32  ;;  %v8883_v13 = vpop.permute.xlu1 %2152  ;;  %v9857_v32 = vld [vmem:[#allocation31_spill] sm:$0xff] }
 0x360   : > { %v8887_v34 = vpop.permute.xlu0 %2172  ;;  %v668_v58 = vmul.f32 %v9854_v26, %v9857_v32  ;;  %v9868_v32 = vld [vmem:[#allocation65_spill] sm:$0xff]  ;;  %v1184_v26 = vmul.f32 %v9824_v23, %v9870_v55  ;;  %v9875_v55 = vld [vmem:[#allocation47_spill] sm:$0xff] }
 0x361   : > { %v933_v62 = vmul.f32 %v9852_v19, %v9868_v32  ;;  %v1186_v19 = vmul.f32 %v9824_v23, %v9873_v21 }
 0x362   : > { %v957_v14 = vadd.f32 %v925_v63, %v668_v58  ;;  %v2473_v63 = vmul.f32 %v7841_v49, %v8807_v47  ;;  %v959_v58 = vadd.f32 %v927_v35, %v670_v50  ;;  %v9872_v47 = vld [vmem:[#allocation104_spill] sm:$0xff] }
 0x363   : > { %v6844_v40 = vpop.eup %6843  ;;  %v8940_v9 = vadd.f32 %v933_v62, %v676_v27  ;;  %v1441_v50 = vmul.f32 %v9831_v17, %v9872_v47  ;;  %v1700_v27 = vmul.f32 %v7803_v45, %v9875_v55  ;;  %v2254_v62 = vadd.f32 %v2222_v2, %v8817_v24 }
 0x364   : > { %v4124_v16 = vpop.f32.mrf.mxu0  ;;  %v2930_v39 = vadd.f32 1.0, %v6844_v40  ;;  %v1216_v12 = vadd.f32 %v1184_v26, %v957_v14  ;;  %v9874_v40 = vld [vmem:[#allocation107_spill] sm:$0xff]  ;;  %v2479_v24 = vmul.f32 %v7841_v49, %v8819_v29  ;;  %v2217_v29 = vmul.f32 %v7821_v53, %v8870_v7 }
 0x365   : > { %v4189_v43 = vpop.f32.mrf.mxu1 }
 0x366   : > { %v4190_v0 = vadd.f32 %v4189_v43, %v4124_v16  ;;  %v2505_v16 = vadd.f32 %v2473_v63, %v8825_v51  ;;  %v1445_v51 = vmul.f32 %v9831_v17, %v9874_v40  ;;  %6845 = vrcp.f32 %v2930_v39 }
 0x367   : > { %v2654_v33 = vpop.permute.xlu1 %2653  ;;  %v1473_v3 = vadd.f32 %v1441_v50, %v1216_v12 }
 0x368   : > { %v2732_v43 = vmul.f32 %v7852_v59, %v2654_v33  ;;  %v2674_v32 = vpop.permute.xlu0 %2673  ;;  %v8953_v33 = vpop.permute.xlu2 %2678  ;;  %v1477_v47 = vadd.f32 %v1445_v51, %v1220_v11  ;;  %v9879_v11 = vld [vmem:[#allocation48_spill] sm:$0xff] }
 0x369   : > { %v2736_v35 = vmul.f32 %v7852_v59, %v2674_v32  ;;  %v1732_v50 = vadd.f32 %v1700_v27, %v1473_v3  ;;  %v1706_v51 = vmul.f32 %v7803_v45, %v9879_v11 }
 0x36a   : > { %v2764_v18 = vadd.f32 %v2732_v43, %v2505_v16  ;;  %v1218_v16 = vadd.f32 %v1186_v19, %v959_v58  ;;  %v9877_v43 = vld [vmem:[#allocation108_spill] sm:$0xff]  ;;  %v1736_v55 = vadd.f32 %v1704_v37, %v1477_v47 }
 0x36b   : > { %v2768_v30 = vadd.f32 %v2736_v35, %v2509_v4  ;;  %v1447_v32 = vmul.f32 %v9831_v17, %v9877_v43  ;;  %v2511_v4 = vadd.f32 %v2479_v24, %v2254_v62 }
 0x36c   : > { %v4274_v63 = vpop.f32.mrf.mxu2  ;;  %v8960_v26 = vadd.f32 %v8863_v54, %v2764_v18  ;;  %v1222_v18 = vadd.f32 %v1190_v6, %v963_v5  ;;  %v6846_v56 = vpop.eup %6845  ;;  %v1993_v1 = vadd.f32 %v1961_v20, %v1736_v55  ;;  %v1963_v5 = vmul.f32 %v7809_v8, %v8852_v52 }
 0x36d   : > { %v8957_v14 = vadd.f32 %v4274_v63, %v4190_v0  ;;  %v8967_v2 = vadd.f32 %v8863_v54, %v2768_v30  ;;  %v1957_v0 = vmul.f32 %v7809_v8, %v8839_v10  ;;  %v9878_v10 = vld [vmem:[#allocation96_spill] sm:$0xff]  ;;  %v1702_v30 = vmul.f32 %v7803_v45, %v8802_v38 }
 0x36e   : > { %v2832_v39 = vsub.f32 0.0, %v8960_v26  ;;  %v1443_v40 = vmul.f32 %v9831_v17, %v9878_v10  ;;  %v1479_v7 = vadd.f32 %v1447_v32, %v1222_v18  ;;  %v8989_v6 = vadd.f32 %v935_v42, %v8919_v36  ;;  %v9881_v36 = vld [vmem:[#allocation80_spill] sm:$0xff] }
 0x36f   : > { %v2684_v35 = vpop.permute.xlu1 %2683  ;;  %v2836_v58 = vsub.f32 0.0, %v8967_v2  ;;  %v1989_v27 = vadd.f32 %v1957_v0, %v1732_v50  ;;  %v2221_v32 = vmul.f32 %v7821_v53, %v8836_v48  ;;  %v8997_v0 = vmul.f32 %v6846_v56, %v8866_v44 }
 0x370   : > { %v2884_v12 = vmul.f32 1.442695, %v2832_v39  ;;  %v2738_v21 = vmul.f32 %v7852_v59, %v2684_v35  ;;  %v2410_v19 = vpop.permute.xlu0 %2409  ;;  %v1475_v24 = vadd.f32 %v1443_v40, %v1218_v16  ;;  %v1738_v43 = vadd.f32 %v1706_v51, %v1479_v7  ;;  %v8999_v38 = vpop.permute.xlu2 %1670  ;;  %v9880_v39 = vld [vmem:[#allocation77_spill] sm:$0xff] }
 0x371   : > { %v2892_v62 = vmul.f32 1.442695, %v2836_v58  ;;  %v2249_v3 = vadd.f32 %v2217_v29, %v1989_v27  ;;  %v9003_v52 = vmul.f32 %v9824_v23, %v9880_v39  ;;  %v9007_v42 = vmul.f32 %v9824_v23, %v9881_v36  ;;  %v9882_v39 = vld [vmem:[#allocation87_spill] sm:$0xff] }
 0x372   : > { %6847 = vpow2.f32 %v2884_v12  ;;  %v2770_v63 = vadd.f32 %v2738_v21, %v2511_v4  ;;  %v2474_v16 = vmul.f32 %v7841_v49, %v8868_v15  ;;  %v1959_v48 = vmul.f32 %v7809_v8, %v8778_v46 }
 0x373   : > { %6849 = vpow2.f32 %v2892_v62  ;;  %v1734_v44 = vadd.f32 %v1702_v30, %v1475_v24  ;;  %v1995_v50 = vadd.f32 %v1963_v5, %v1738_v43  ;;  %v2253_v20 = vadd.f32 %v2221_v32, %v1993_v1 }
 0x374   : > { %v8992_v37 = vadd.f32 %v8863_v54, %v2770_v63  ;;  %v2223_v29 = vmul.f32 %v7821_v53, %v8887_v34  ;;  %v2506_v18 = vadd.f32 %v2474_v16, %v2249_v3  ;;  %v3102_v15 = vrot.slane %v8997_v0, 2 }
 0x375   : > { %v2219_v10 = vmul.f32 %v7821_v53, %v8883_v13  ;;  %v3103_v51 = vrot.slane %v8997_v0, 4  ;;  %v2737_v55 = vmul.f32 %v7852_v59, %v8953_v33  ;;  %v3104_v56 = vrot.slane %v8997_v0, 6 }
 0x376   : > { %v2838_v47 = vsub.f32 0.0, %v8992_v37  ;;  %v1991_v63 = vadd.f32 %v1959_v48, %v1734_v44  ;;  %v2255_v7 = vadd.f32 %v2223_v29, %v1995_v50  ;;  %v2476_v13 = vmul.f32 %v7841_v49, %v2410_v19  ;;  %v9883_v19 = vld [vmem:[#allocation88_spill] sm:$0xff] }
 0x377   : > { %v2420_v4 = vpop.permute.xlu1 %2419  ;;  %v6261_v1 = vrot.slane %v8997_v0, 9  ;;  %v6262_v5 = vrot.slane %v3102_v15, 9  ;;  %v6263_v33 = vrot.slane %v3103_v51, 9  ;;  %v2480_v24 = vmul.f32 %v7841_v49, %v8893_v28 }
 0x378   : > { %v6848_v35 = vpop.eup %6847  ;;  %v2896_v12 = vmul.f32 1.442695, %v2838_v47  ;;  %v2478_v58 = vmul.f32 %v7841_v49, %v2420_v4  ;;  %v2659_v21 = vpop.permute.xlu0 %2658  ;;  %v2251_v43 = vadd.f32 %v2219_v10, %v1991_v63  ;;  %v9037_v36 = vmul.f32 %v9824_v23, %v9882_v39 }
 0x379   : > { %v2928_v40 = vadd.f32 1.0, %v6848_v35  ;;  %v2733_v46 = vmul.f32 %v7852_v59, %v2659_v21  ;;  %v6850_v11 = vpop.eup %6849  ;;  %v9041_v16 = vmul.f32 %v9824_v23, %v9883_v19  ;;  %v6264_v47 = vrot.slane %v3104_v56, 9  ;;  %v9043_v48 = vpop.permute.xlu2 %1665 }
 0x37a   : > { %6851 = vpow2.f32 %v2896_v12  ;;  %v2510_v34 = vadd.f32 %v2478_v58, %v2253_v20  ;;  %v2932_v27 = vadd.f32 1.0, %v6850_v11  ;;  %v2508_v28 = vadd.f32 %v2476_v13, %v2251_v43 }
 0x37b   : > { %6853 = vrcp.f32 %v2928_v40  ;;  %v2765_v62 = vadd.f32 %v2733_v46, %v2506_v18  ;;  %v2512_v12 = vadd.f32 %v2480_v24, %v2255_v7  ;;  %v3700_v21 = vmax.f32 %v8997_v0, %v6261_v1 }
 0x37c   : > { %v2769_v30 = vadd.f32 %v2737_v55, %v2510_v34  ;;  %6855 = vrcp.f32 %v2932_v27  ;;  %v3701_v18 = vmax.f32 %v3102_v15, %v6262_v5  ;;  %v3702_v40 = vmax.f32 %v3103_v51, %v6263_v33 }
 0x37d   : > { %v9028_v3 = vadd.f32 %v8863_v54, %v2765_v62  ;;  %v3703_v27 = vmax.f32 %v3104_v56, %v6264_v47 }
 0x37e   : > { %v9033_v32 = vadd.f32 %v8863_v54, %v2769_v30 }
 0x37f   : > { %v2833_v44 = vsub.f32 0.0, %v9028_v3  ;;  %v2669_v50 = vpop.permute.xlu1 %2668 }
 0x380   : > { %v6852_v20 = vpop.eup %6851  ;;  %v2837_v4 = vsub.f32 0.0, %v9033_v32  ;;  %v2735_v35 = vmul.f32 %v7852_v59, %v2669_v50  ;;  %v2689_v29 = vpop.permute.xlu0 %2688 }
 0x381   : > { %v6854_v58 = vpop.eup %6853  ;;  %v2934_v23 = vadd.f32 1.0, %v6852_v20  ;;  %v2739_v10 = vmul.f32 %v7852_v59, %v2689_v29  ;;  %v2886_v62 = vmul.f32 1.442695, %v2833_v44 }
 0x382   : > { %v2992_v46 = vmul.f32 %v6854_v58, %v8960_v26  ;;  %v2894_v11 = vmul.f32 1.442695, %v2837_v4  ;;  %v2767_v55 = vadd.f32 %v2735_v35, %v2508_v28  ;;  %v6856_v34 = vpop.eup %6855 }
 0x383   : > { %6857 = vrcp.f32 %v2934_v23  ;;  %v2771_v63 = vadd.f32 %v2739_v10, %v2512_v12  ;;  %v2996_v0 = vmul.f32 %v6856_v34, %v8967_v2  ;;  %v9060_v23 = vpop.permute.xlu2 %2187 }
 0x384   : > { %v3096_v13 = vrot.slane %v2992_v46, 2  ;;  %v3097_v30 = vrot.slane %v2992_v46, 4  ;;  %v3098_v7 = vrot.slane %v2992_v46, 6  ;;  %v6253_v24 = vrot.slane %v2992_v46, 9 }
 0x385   : > { %6859 = vpow2.f32 %v2894_v11  ;;  %v9053_v15 = vadd.f32 %v8863_v54, %v2767_v55  ;;  %v9056_v51 = vadd.f32 %v8863_v54, %v2771_v63  ;;  %v3108_v33 = vrot.slane %v2996_v0, 2 }
 0x386   : > { %v6254_v26 = vrot.slane %v3096_v13, 9  ;;  %v6255_v1 = vrot.slane %v3097_v30, 9  ;;  %v6256_v5 = vrot.slane %v3098_v7, 9  ;;  %v3692_v56 = vmax.f32 %v2992_v46, %v6253_v24 }
 0x387   : > { %v3109_v43 = vrot.slane %v2996_v0, 4  ;;  %v3110_v39 = vrot.slane %v2996_v0, 6  ;;  %v6269_v19 = vrot.slane %v2996_v0, 9  ;;  %v1661_v47 = vpop.permute.xlu1 %1660  ;;  %v6270_v35 = vrot.slane %v3108_v33, 9 }
 0x388   : > { %v3693_v44 = vmax.f32 %v3096_v13, %v6254_v26  ;;  %v3694_v50 = vmax.f32 %v3097_v30, %v6255_v1  ;;  %v3695_v20 = vmax.f32 %v3098_v7, %v6256_v5  ;;  %v3780_v2 = vmax.f32 %v3692_v56, %v3700_v21  ;;  %v9058_v28 = vpop.permute.xlu0 %1917 }
 0x389   : > { %v6858_v4 = vpop.eup %6857  ;;  %v6271_v29 = vrot.slane %v3109_v43, 9  ;;  %v6272_v12 = vrot.slane %v3110_v39, 9  ;;  %v3708_v58 = vmax.f32 %v2996_v0, %v6269_v19  ;;  %v3709_v63 = vmax.f32 %v3108_v33, %v6270_v35 }
 0x38a   : > { %v3781_v10 = vmax.f32 %v3693_v44, %v3701_v18  ;;  %v3782_v46 = vmax.f32 %v3694_v50, %v3702_v40  ;;  %v3783_v11 = vmax.f32 %v3695_v20, %v3703_v27  ;;  %v3930_v55 = vperm.slane %v3780_v2, 0 }
 0x38b   : > { %v6860_v34 = vpop.eup %6859  ;;  %v3710_v24 = vmax.f32 %v3109_v43, %v6271_v29  ;;  %v3711_v13 = vmax.f32 %v3110_v39, %v6272_v12  ;;  %v2998_v30 = vmul.f32 %v6858_v4, %v8992_v37  ;;  %v2835_v18 = vsub.f32 0.0, %v9053_v15 }
 0x38c   : > { %v3931_v21 = vperm.slane %v3781_v10, 0  ;;  %v3932_v7 = vperm.slane %v3782_v46, 0  ;;  %v3933_v26 = vperm.slane %v3783_v11, 0  ;;  %v2933_v1 = vadd.f32 1.0, %v6860_v34  ;;  %v9884_v10 = vld [vmem:[#allocation109_spill] sm:$0xff]  ;;  %v9885_v11 = vld [vmem:[#allocation110_spill] sm:$0xff] }
 0x38d   : > { %v3114_v5 = vrot.slane %v2998_v30, 2  ;;  %v3115_v56 = vrot.slane %v2998_v30, 4  ;;  %v3116_v57 = vrot.slane %v2998_v30, 6  ;;  %v6277_v0 = vrot.slane %v2998_v30, 9 }
 0x38e   : > { %v3996_v19 = vsel %vm3954_vm4, %v3931_v21, %v3930_v55  ;;  %6861 = vrcp.f32 %v2933_v1  ;;  %v2839_v40 = vsub.f32 0.0, %v9056_v51  ;;  %v2890_v20 = vmul.f32 1.442695, %v2835_v18 }
 0x38f   : > { %v3997_v27 = vsel %vm3956_vm5, %v3932_v7, %v3996_v19  ;;  %v6278_v33 = vrot.slane %v3114_v5, 9  ;;  %v6279_v43 = vrot.slane %v3115_v56, 9  ;;  %v6280_v37 = vrot.slane %v3116_v57, 9  ;;  %v1928_v39 = vpop.permute.xlu1 %1927 }
 0x390   : > { %v9068_v44 = vsel %vm3958_vm6, %v3933_v26, %v3997_v27  ;;  %v3716_v50 = vmax.f32 %v2998_v30, %v6277_v0  ;;  %6863 = vpow2.f32 %v2886_v62  ;;  %v1676_v2 = vpop.permute.xlu0 %1675  ;;  %v2898_v12 = vmul.f32 1.442695, %v2839_v40  ;;  %v2435_v30 = vpop.permute.xlu2 %2434  ;;  %v6670_v27 = vld [vmem:[%s9607_s3 + $0x90] sm:$0xff] }
 0x391   : > { %v3717_v4 = vmax.f32 %v3114_v5, %v6278_v33  ;;  %v3718_v35 = vmax.f32 %v3115_v56, %v6279_v43  ;;  %v3719_v29 = vmax.f32 %v3116_v57, %v6280_v37  ;;  %v1448_v46 = vmul.f32 %v9831_v17, %v9884_v10 }
 0x392   : > { %v1450_v55 = vmul.f32 %v9831_v17, %v9885_v11  ;;  %v3788_v34 = vmax.f32 %v3708_v58, %v3716_v50  ;;  %6865 = vpow2.f32 %v2890_v20  ;;  %v1223_v1 = vadd.f32 %v9003_v52, %v8932_v25 }
 0x393   : > { %v3789_v21 = vmax.f32 %v3709_v63, %v3717_v4  ;;  %v3790_v7 = vmax.f32 %v3710_v24, %v3718_v35  ;;  %v3791_v26 = vmax.f32 %v3711_v13, %v3719_v29  ;;  %6867 = vpow2.f32 %v2898_v12  ;;  %v6671_v24 = vld [vmem:[%s9607_s3 + $0x98] sm:$0xff] }
 0x394   : > { %v6862_v62 = vpop.eup %6861  ;;  %v1226_v57 = vadd.f32 %v9007_v42, %v8989_v6  ;;  %v1225_v5 = vadd.f32 %v9041_v16, %v8924_v41  ;;  %v1707_v56 = vmul.f32 %v7803_v45, %v1661_v47  ;;  %v3938_v0 = vperm.slane %v3788_v34, 0  ;;  %v9886_v6 = vld [vmem:[#allocation102_spill] sm:$0xff]  ;;  %v9887_v16 = vld [vmem:[#allocation111_spill] sm:$0xff]  ;;  %4450 = vmatpush.bf16.msrb.mxu0 %v6671_v24 }
 0x395   : > { %v3939_v58 = vperm.slane %v3789_v21, 0  ;;  %v3940_v19 = vperm.slane %v3790_v7, 0  ;;  %v9082_v63 = vmul.f32 %v6862_v62, %v9033_v32  ;;  %v1224_v25 = vadd.f32 %v9037_v36, %v8940_v9  ;;  %v6669_v21 = vld [vmem:[%s9607_s3 + $0x88] sm:$0xff] }
 0x396   : > { %v6864_v13 = vpop.eup %6863  ;;  %v1449_v52 = vmul.f32 %v9831_v17, %v9886_v6  ;;  %v1480_v41 = vadd.f32 %v1448_v46, %v1223_v1  ;;  %v1482_v42 = vadd.f32 %v1450_v55, %v1225_v5  ;;  %v1451_v47 = vmul.f32 %v9831_v17, %v9887_v16 }
 0x397   : > { %v1709_v32 = vmul.f32 %v7803_v45, %v8999_v38  ;;  %v3941_v18 = vperm.slane %v3791_v26, 0  ;;  %v4003_v40 = vsel %vm3954_vm4, %v3939_v58, %v3938_v0  ;;  %v2178_v9 = vpop.permute.xlu1 %2177  ;;  %v2929_v43 = vadd.f32 1.0, %v6864_v13 }
 0x398   : > { %v6866_v36 = vpop.eup %6865  ;;  %v4004_v33 = vsel %vm3956_vm5, %v3940_v19, %v4003_v40  ;;  %v1739_v37 = vadd.f32 %v1707_v56, %v1480_v41  ;;  %v1964_v17 = vmul.f32 %v7809_v8, %v9058_v28  ;;  %v1923_v50 = vpop.permute.xlu0 %1922  ;;  %v3111_v4 = vrot.slane %v9082_v63, 2  ;;  %4451 = vmatpush.bf16.msrb.mxu0 %v6670_v27 }
 0x399   : > { %v6868_v20 = vpop.eup %6867  ;;  %v9103_v38 = vsel %vm3958_vm6, %v3941_v18, %v4004_v33  ;;  %v3112_v35 = vrot.slane %v9082_v63, 4  ;;  %v1966_v29 = vmul.f32 %v7809_v8, %v1928_v39  ;;  %v3113_v12 = vrot.slane %v9082_v63, 6 }
 0x39a   : > { %6869 = vrcp.f32 %v2929_v43  ;;  %v2931_v10 = vadd.f32 1.0, %v6866_v36  ;;  %v2935_v46 = vadd.f32 1.0, %v6868_v20  ;;  %v1481_v11 = vadd.f32 %v1449_v52, %v1224_v25  ;;  %v6675_v43 = vld [vmem:[%s9607_s3 + $0xb8] sm:$0xff] }
 0x39b   : > { %v1483_v55 = vadd.f32 %v1451_v47, %v1226_v57  ;;  %v1708_v28 = vmul.f32 %v7803_v45, %v9043_v48  ;;  %v2224_v34 = vmul.f32 %v7821_v53, %v2178_v9  ;;  %v1741_v7 = vadd.f32 %v1709_v32, %v1482_v42  ;;  %v2193_v57 = vpop.permute.xlu2 %2192  ;;  %4543 = vmatpush.bf16.msrb.mxu1 %v6675_v43 }
 0x39c   : > { %6871 = vrcp.f32 %v2931_v10  ;;  %v1996_v39 = vadd.f32 %v1964_v17, %v1739_v37  ;;  %v1710_v26 = vmul.f32 %v7803_v45, %v1676_v2  ;;  %v6273_v62 = vrot.slane %v9082_v63, 9  ;;  %4452 = vmatpush.bf16.msrb.mxu0 %v6669_v21 }
 0x39d   : > { %v6274_v1 = vrot.slane %v3111_v4, 9  ;;  %v6275_v5 = vrot.slane %v3112_v35, 9  ;;  %6873 = vrcp.f32 %v2935_v46  ;;  %v6276_v56 = vrot.slane %v3113_v12, 9 }
 0x39e   : > { %v1998_v48 = vadd.f32 %v1966_v29, %v1741_v7  ;;  %v2256_v0 = vadd.f32 %v2224_v34, %v1996_v39  ;;  %v1965_v58 = vmul.f32 %v7809_v8, %v1923_v50  ;;  %v1740_v19 = vadd.f32 %v1708_v28, %v1481_v11  ;;  %v6674_v7 = vld [vmem:[%s9607_s3 + $0xb0] sm:$0xff] }
 0x39f   : > { %v2226_v24 = vmul.f32 %v7821_v53, %v9060_v23  ;;  %v1933_v13 = vpop.permute.xlu1 %1932  ;;  %v2481_v45 = vmul.f32 %v7841_v49, %v2435_v30  ;;  %v9122_v2 = vmul.f32 %v7821_v53, %v2193_v57  ;;  %v1742_v6 = vadd.f32 %v1710_v26, %v1483_v55  ;;  %v6678_v39 = vld [vmem:[%s9607_s3 + $0xd0] sm:$0xff]  ;;  %4544 = vmatpush.bf16.msrb.mxu1 %v6674_v7 }
 0x3a0   : > { %v6870_v25 = vpop.eup %6869  ;;  %v1967_v52 = vmul.f32 %v7809_v8, %v1933_v13  ;;  %v2445_v41 = vpop.permute.xlu0 %2444  ;;  %v9126_v42 = vmax.f32 %v9082_v63, %v6273_v62  ;;  %v9128_v16 = vmax.f32 %v3111_v4, %v6274_v1  ;;  %v9130_v47 = vmax.f32 %v3112_v35, %v6275_v5 }
 0x3a1   : > { %v2993_v23 = vmul.f32 %v6870_v25, %v9028_v3  ;;  %v9133_v18 = vmax.f32 %v3113_v12, %v6276_v56  ;;  %v9135_v30 = vadd.f32 %v1965_v58, %v1740_v19  ;;  %v9137_v40 = vadd.f32 %v2226_v24, %v1998_v48  ;;  %v6679_v3 = vld [vmem:[%s9607_s3 + $0xd8] sm:$0xff] }
 0x3a2   : > { %v6872_v32 = vpop.eup %6871  ;;  %v9139_v27 = vadd.f32 %v2481_v45, %v2256_v0  ;;  %v9149_v50 = vadd.f32 %v1967_v52, %v1742_v6  ;;  %v9152_v20 = vmul.f32 %v7841_v49, %v2445_v41  ;;  %4637 = vmatpush.bf16.msrb.mxu2 %v6679_v3 }
 0x3a3   : > { %v6874_v8 = vpop.eup %6873  ;;  %v3099_v9 = vrot.slane %v2993_v23, 2  ;;  %v3100_v36 = vrot.slane %v2993_v23, 4  ;;  %v3101_v63 = vrot.slane %v2993_v23, 6  ;;  %v6257_v33 = vrot.slane %v2993_v23, 9  ;;  %v9160_v57 = vpop.permute.xlu2 %2439 }
 0x3a4   : > { %v2995_v37 = vmul.f32 %v6872_v32, %v9053_v15  ;;  %v2999_v17 = vmul.f32 %v6874_v8, %v9056_v51  ;;  %v6673_v32 = vld [vmem:[%s9607_s3 + $0xa8] sm:$0xff] }
 0x3a5   : > { %v6258_v4 = vrot.slane %v3099_v9, 9  ;;  %v6259_v35 = vrot.slane %v3100_v36, 9  ;;  %v6260_v29 = vrot.slane %v3101_v63, 9  ;;  %v3696_v12 = vmax.f32 %v2993_v23, %v6257_v33  ;;  %v6677_v8 = vld [vmem:[%s9607_s3 + $0xc8] sm:$0xff]  ;;  %4545 = vmatpush.bf16.msrb.mxu1 %v6673_v32 }
 0x3a6   : > { %v3105_v10 = vrot.slane %v2995_v37, 2  ;;  %v3106_v46 = vrot.slane %v2995_v37, 4  ;;  %v3107_v11 = vrot.slane %v2995_v37, 6  ;;  %v6265_v55 = vrot.slane %v2995_v37, 9  ;;  %4638 = vmatpush.bf16.msrb.mxu2 %v6678_v39 }
 0x3a7   : > { %v3697_v28 = vmax.f32 %v3099_v9, %v6258_v4  ;;  %v3698_v34 = vmax.f32 %v3100_v36, %v6259_v35  ;;  %v3699_v15 = vmax.f32 %v3101_v63, %v6260_v29  ;;  %v3117_v21 = vrot.slane %v2999_v17, 2  ;;  %v2183_v51 = vpop.permute.xlu1 %2182 }
 0x3a8   : > { %v6266_v26 = vrot.slane %v3105_v10, 9  ;;  %v6267_v62 = vrot.slane %v3106_v46, 9  ;;  %v6268_v1 = vrot.slane %v3107_v11, 9  ;;  %v3704_v5 = vmax.f32 %v2995_v37, %v6265_v55  ;;  %v2694_v56 = vpop.permute.xlu0 %2693 }
 0x3a9   : > { %v3118_v48 = vrot.slane %v2999_v17, 4  ;;  %v3119_v0 = vrot.slane %v2999_v17, 6  ;;  %v6281_v58 = vrot.slane %v2999_v17, 9  ;;  %v6282_v19 = vrot.slane %v3117_v21, 9 }
 0x3aa   : > { %v3705_v24 = vmax.f32 %v3105_v10, %v6266_v26  ;;  %v3706_v13 = vmax.f32 %v3106_v46, %v6267_v62  ;;  %v3707_v25 = vmax.f32 %v3107_v11, %v6268_v1  ;;  %v3784_v45 = vmax.f32 %v3696_v12, %v3704_v5  ;;  %4639 = vmatpush.bf16.msrb.mxu2 %v6677_v8 }
 0x3ab   : > { %v6283_v6 = vrot.slane %v3118_v48, 9  ;;  %v6284_v52 = vrot.slane %v3119_v0, 9  ;;  %v3720_v41 = vmax.f32 %v2999_v17, %v6281_v58  ;;  %v3721_v23 = vmax.f32 %v3117_v21, %v6282_v19 }
 0x3ac   : > { %v3785_v9 = vmax.f32 %v3697_v28, %v3705_v24  ;;  %v3786_v36 = vmax.f32 %v3698_v34, %v3706_v13  ;;  %v3787_v63 = vmax.f32 %v3699_v15, %v3707_v25  ;;  %v3934_v33 = vperm.slane %v3784_v45, 0 }
 0x3ad   : > { %v3722_v43 = vmax.f32 %v3118_v48, %v6283_v6  ;;  %v3723_v3 = vmax.f32 %v3119_v0, %v6284_v52  ;;  %v3792_v37 = vmax.f32 %v9126_v42, %v3720_v41  ;;  %v3793_v4 = vmax.f32 %v9128_v16, %v3721_v23  ;;  %v6668_v42 = vld [vmem:[%s9607_s3 + $0x80] sm:$0xff] }
 0x3ae   : > { %v3935_v17 = vperm.slane %v3785_v9, 0  ;;  %v3936_v35 = vperm.slane %v3786_v36, 0  ;;  %v3937_v29 = vperm.slane %v3787_v63, 0  ;;  %v3999_v12 = vsel %vm3960_vm7, %v3934_v33, %v9068_v44  ;;  %v6672_v16 = vld [vmem:[%s9607_s3 + $0xa0] sm:$0xff]  ;;  %4453 = vmatpush.bf16.msrb.mxu0 %v6668_v42 }
 0x3af   : > { %v3794_v10 = vmax.f32 %v9130_v47, %v3722_v43  ;;  %v3795_v46 = vmax.f32 %v9133_v18, %v3723_v3  ;;  %v3942_v11 = vperm.slane %v3792_v37, 0  ;;  %v3943_v55 = vperm.slane %v3793_v4, 0  ;;  %v2704_v28 = vpop.permute.xlu1 %2703  ;;  %v6676_v44 = vld [vmem:[%s9607_s3 + $0xc0] sm:$0xff]  ;;  %4546 = vmatpush.bf16.msrb.mxu1 %v6672_v16  ;;  %v6682_v16 = vld [vmem:[%s9607_s3 + $0xf0] sm:$0xff] }
 0x3b0   : > { %v4000_v34 = vsel %vm3962_vm8, %v3935_v17, %v3999_v12  ;;  %v2225_v47 = vmul.f32 %v7821_v53, %v2183_v51  ;;  %v2740_v18 = vmul.f32 %v7852_v59, %v2694_v56  ;;  %v2742_v15 = vmul.f32 %v7852_v59, %v2704_v28  ;;  %v2450_v21 = vpop.permute.xlu0 %2449  ;;  %v2709_v51 = vpop.permute.xlu2 %2708  ;;  %4640 = vmatpush.bf16.msrb.mxu2 %v6676_v44  ;;  %v6686_v44 = vld [vmem:[%s9607_s3 + $0x110] sm:$0xff] }
 0x3b1   : > { %v4001_v7 = vsel %vm3964_vm9, %v3936_v35, %v4000_v34  ;;  %v3944_v39 = vperm.slane %v3794_v10, 0  ;;  %v4006_v26 = vsel %vm3960_vm7, %v3942_v11, %v9103_v38  ;;  %v2515_v62 = vadd.f32 %v9152_v20, %v9137_v40  ;;  %v6683_v11 = vld [vmem:[%s9607_s3 + $0xf8] sm:$0xff] }
 0x3b2   : > { %v4002_v1 = vsel %vm3966_vm10, %v3937_v29, %v4001_v7  ;;  %v3945_v5 = vperm.slane %v3795_v46, 0  ;;  %v4007_v53 = vsel %vm3962_vm8, %v3943_v55, %v4006_v26  ;;  %v2772_v56 = vadd.f32 %v2740_v18, %v9139_v27  ;;  %v6687_v55 = vld [vmem:[%s9607_s3 + $0x118] sm:$0xff]  ;;  %4730 = vmatpush.bf16.msrb.mxu3 %v6683_v11  ;;  %v4390_v26 = vld [vmem:[#allocation3 + $0x11] sm:$0xff] }
 0x3b3   : > { %4031 = vst.msk [vmem:[#allocation3 + $0x61] sm:$0xff] %vm3804_vm2, %v4002_v1  ;;  %v4008_v48 = vsel %vm3964_vm9, %v3944_v39, %v4007_v53  ;;  %v2774_v0 = vadd.f32 %v2742_v15, %v2515_v62  ;;  %v2259_v38 = vadd.f32 %v9122_v2, %v9149_v50  ;;  %v2484_v40 = vmul.f32 %v7841_v49, %v2450_v21  ;;  %v9263_v18 = vld [vmem:[#allocation3 + $0x22] sm:$0xff]  ;;  %v4483_v62 = vld [vmem:[#allocation3 + $0x12] sm:$0xff] }
 0x3b4   : > { %v4009_v20 = vsel %vm3966_vm10, %v3945_v5, %v4008_v48  ;;  %v2257_v58 = vadd.f32 %v2225_v47, %v9135_v30  ;;  %v2808_v19 = vadd.f32 %v8863_v54, %v2772_v56  ;;  %v2743_v27 = vmul.f32 %v7852_v59, %v2709_v51  ;;  %4823 = vmatpush.bf16.msra.mxu0 %v6687_v55  ;;  %v9261_v47 = vld [vmem:[#allocation3 + $0x21] sm:$0xff]  ;;  %v6681_v1 = vld [vmem:[%s9607_s3 + $0xe8] sm:$0xff]  ;;  %v9268_v5 = vpop.f32.mrf.mxu3 }
 0x3b5   : > { %4032 = vst.msk [vmem:[#allocation3 + $0x71] sm:$0xff] %vm3804_vm2, %v4009_v20  ;;  %v9206_v24 = vadd.f32 %v8863_v54, %v2774_v0  ;;  %v2516_v13 = vadd.f32 %v2484_v40, %v2259_v38  ;;  %v2482_v25 = vmul.f32 %v7841_v49, %v9160_v57  ;;  %v4398_v51 = vpack.c.bf16 %v9261_v47, %v4390_v26  ;;  %v4578_v48 = vld [vmem:[#allocation3 + $0x30] sm:$0xff] }
 0x3b6   : > { %v2840_v2 = vsub.f32 0.0, %v2808_v19  ;;  %4731 = vmatpush.bf16.msrb.mxu3 %v6682_v16  ;;  %v4491_v56 = vpack.c.bf16 %v9263_v18, %v4483_v62 }
 0x3b7   : > { %v2842_v50 = vsub.f32 0.0, %v9206_v24  ;;  %v2775_v45 = vadd.f32 %v2743_v27, %v2516_v13  ;;  %v2699_v6 = vpop.permute.xlu1 %2698  ;;  %v2514_v30 = vadd.f32 %v2482_v25, %v2257_v58  ;;  %v4577_v25 = vld [vmem:[#allocation3 + $0x20] sm:$0xff] }
 0x3b8   : > { %v2900_v52 = vmul.f32 1.442695, %v2840_v2  ;;  %v2741_v41 = vmul.f32 %v7852_v59, %v2699_v6  ;;  %4824 = vmatpush.bf16.msra.mxu0 %v6686_v44 }
 0x3b9   : > { %v2904_v23 = vmul.f32 1.442695, %v2842_v50  ;;  %v9213_v32 = vadd.f32 %v8863_v54, %v2775_v45  ;;  %v9273_v50 = vpop.f32.mrf.mxu0  ;;  %v9275_v45 = vpop.f32.mrf.mxu1 }
 0x3ba   : > { %6875 = vpow2.f32 %v2900_v52  ;;  %v4302_v8 = vld [vmem:[#allocation3 + $0x60] sm:$0xff]  ;;  %v2773_v9 = vadd.f32 %v2741_v41, %v2514_v30  ;;  %v4585_v52 = vpack.c.bf16 %v4578_v48, %v4577_v25  ;;  %4732 = vmatpush.bf16.msrb.mxu3 %v6681_v1 }
 0x3bb   : > { %6877 = vpow2.f32 %v2904_v23  ;;  %v2843_v36 = vsub.f32 0.0, %v9213_v32  ;;  %v4307_v49 = vpack.c.bf16 %v4302_v8, %v8857_v60  ;;  %v9217_v57 = vld [vmem:[#allocation3 + $0x61] sm:$0xff] }
 0x3bc   : > { %v9219_v63 = vld [vmem:[#allocation3 + $0x62] sm:$0xff]  ;;  %v9221_v33 = vld [vmem:[#allocation3 + $0x71] sm:$0xff]  ;;  %v9228_v3 = vadd.f32 %v8863_v54, %v2773_v9 }
 0x3bd   : > { %v9223_v43 = vld [vmem:[#allocation3 + $0x70] sm:$0xff]  ;;  %v2906_v37 = vmul.f32 1.442695, %v2843_v36  ;;  %6379 = vmatmul.msk.bf16.gmra.mxu3 %vm3804_vm2, %v4307_v49  ;;  %v9233_v4 = vpack.c.bf16 %v9221_v33, %v9217_v57 }
 0x3be   : > { %v9225_v59 = vld [vmem:[#allocation3 + $0x72] sm:$0xff]  ;;  %v9236_v60 = vpack.c.bf16 %v9223_v43, %v4302_v8  ;;  %v2841_v35 = vsub.f32 0.0, %v9228_v3 }
 0x3bf   : > { %v9240_v17 = vpack.c.bf16 %v9225_v59, %v9219_v63  ;;  %6879 = vpow2.f32 %v2906_v37  ;;  %6320 = vmatmul.msk.bf16.gmra.mxu0 %vm3804_vm2, %v9233_v4  ;;  %v6685_v49 = vld [vmem:[%s9607_s3 + $0x108] sm:$0xff]  ;;  %v6680_v37 = vld [vmem:[%s9607_s3 + $0xe0] sm:$0xff] }
 0x3c0   : > { %6340 = vmatmul.msk.bf16.gmra.mxu1 %vm3804_vm2, %v9236_v60  ;;  %v6876_v54 = vpop.eup %6875  ;;  %v2902_v29 = vmul.f32 1.442695, %v2841_v35  ;;  %4825 = vmatpush.bf16.msra.mxu0 %v6685_v49 }
 0x3c1   : > { %6360 = vmatmul.msk.bf16.gmra.mxu2 %vm3804_vm2, %v9240_v17  ;;  %v6878_v12 = vpop.eup %6877  ;;  %v2936_v10 = vadd.f32 1.0, %v6876_v54  ;;  %4733 = vmatpush.bf16.msrb.mxu3 %v6680_v37 }
 0x3c2   : > { %v2938_v46 = vadd.f32 1.0, %v6878_v12  ;;  %6881 = vpow2.f32 %v2902_v29 }
 0x3c3   : > { %6883 = vrcp.f32 %v2936_v10 }
 0x3c4   : > { %6885 = vrcp.f32 %v2938_v46 }
 0x3c5   : > { %v6880_v28 = vpop.eup %6879 }
 0x3c6   : > { %v2939_v42 = vadd.f32 1.0, %v6880_v28 }
 0x3c8   : > { %v6882_v34 = vpop.eup %6881  ;;  %6887 = vrcp.f32 %v2939_v42 }
 0x3c9   : > { %v6884_v15 = vpop.eup %6883  ;;  %v2937_v21 = vadd.f32 1.0, %v6882_v34 }
 0x3ca   : > { %v6886_v7 = vpop.eup %6885  ;;  %v3000_v39 = vmul.f32 %v6884_v15, %v2808_v19  ;;  %v9287_v15 = vpop.f32.mrf.mxu2 }
 0x3cb   : > { %v3002_v53 = vmul.f32 %v6886_v7, %v9206_v24  ;;  %6889 = vrcp.f32 %v2937_v21 }
 0x3cc   : > { %v3120_v0 = vrot.slane %v3000_v39, 2  ;;  %v3121_v38 = vrot.slane %v3000_v39, 4  ;;  %v3122_v40 = vrot.slane %v3000_v39, 6  ;;  %v6285_v20 = vrot.slane %v3000_v39, 9  ;;  %v4367_v16 = vpop.f32.mrf.mxu3 }
 0x3cd   : > { %v3126_v58 = vrot.slane %v3002_v53, 2  ;;  %v3127_v19 = vrot.slane %v3002_v53, 4  ;;  %v3128_v27 = vrot.slane %v3002_v53, 6  ;;  %v6293_v13 = vrot.slane %v3002_v53, 9 }
 0x3ce   : > { %v6888_v2 = vpop.eup %6887  ;;  %v6286_v24 = vrot.slane %v3120_v0, 9  ;;  %v6287_v6 = vrot.slane %v3121_v38, 9  ;;  %v3724_v8 = vmax.f32 %v3000_v39, %v6285_v20  ;;  %v6288_v54 = vrot.slane %v3122_v40, 9 }
 0x3cf   : > { %v6294_v30 = vrot.slane %v3126_v58, 9  ;;  %v6295_v41 = vrot.slane %v3127_v19, 9  ;;  %v3732_v23 = vmax.f32 %v3002_v53, %v6293_v13  ;;  %6397 = vmatmul.msk.bf16.vlgmr.msrb.gmra.mxu0 %vm3804_vm2, %v4398_v51  ;;  %v6296_v9 = vrot.slane %v3128_v27, 9 }
 0x3d0   : > { %6417 = vmatmul.msk.bf16.vlgmr.msrb.gmra.mxu1 %vm3804_vm2, %v4491_v56  ;;  %v3003_v36 = vmul.f32 %v6888_v2, %v9213_v32  ;;  %v3725_v29 = vmax.f32 %v3120_v0, %v6286_v24  ;;  %v3726_v46 = vmax.f32 %v3121_v38, %v6287_v6  ;;  %v3727_v21 = vmax.f32 %v3122_v40, %v6288_v54  ;;  %v9294_v6 = vld [vmem:[#allocation3 + $0x41] sm:$0xff]  ;;  %v4485_v54 = vld [vmem:[#allocation3 + $0x32] sm:$0xff] }
 0x3d1   : > { %6437 = vmatmul.msk.bf16.vlgmr.msrb.gmra.mxu2 %vm3804_vm2, %v4585_v52  ;;  %v6890_v35 = vpop.eup %6889  ;;  %v3733_v12 = vmax.f32 %v3126_v58, %v6294_v30  ;;  %v3734_v10 = vmax.f32 %v3127_v19, %v6295_v41  ;;  %v3796_v11 = vmax.f32 %v3724_v8, %v3732_v23  ;;  %v3735_v44 = vmax.f32 %v3128_v27, %v6296_v9  ;;  %v9296_v52 = vld [vmem:[#allocation3 + $0x42] sm:$0xff] }
 0x3d2   : > { %v3129_v55 = vrot.slane %v3003_v36, 2  ;;  %v3130_v28 = vrot.slane %v3003_v36, 4  ;;  %v3131_v42 = vrot.slane %v3003_v36, 6  ;;  %v6297_v39 = vrot.slane %v3003_v36, 9 }
 0x3d3   : > { %v3797_v32 = vmax.f32 %v3725_v29, %v3733_v12  ;;  %v3798_v34 = vmax.f32 %v3726_v46, %v3734_v10  ;;  %v3001_v26 = vmul.f32 %v6890_v35, %v9228_v3  ;;  %v3946_v62 = vperm.slane %v3796_v11, 0  ;;  %v4392_v35 = vld [vmem:[#allocation3 + $0x31] sm:$0xff] }
 0x3d4   : > { %v6298_v1 = vrot.slane %v3129_v55, 9  ;;  %v6299_v53 = vrot.slane %v3130_v28, 9  ;;  %v4129_v51 = vpop.f32.mrf.mxu0  ;;  %v9291_v48 = vadd.f32 %v4367_v16, %v8957_v14  ;;  %v6300_v0 = vrot.slane %v3131_v42, 9  ;;  %v4580_v29 = vld [vmem:[#allocation3 + $0x50] sm:$0xff] }
 0x3d5   : > { %v3947_v7 = vperm.slane %v3797_v32, 0  ;;  %v4194_v56 = vpop.f32.mrf.mxu1  ;;  %v3123_v38 = vrot.slane %v3001_v26, 2  ;;  %v3124_v20 = vrot.slane %v3001_v26, 4  ;;  %v3125_v58 = vrot.slane %v3001_v26, 6 }
 0x3d6   : > { %v3799_v19 = vmax.f32 %v3727_v21, %v3735_v44  ;;  %v3948_v27 = vperm.slane %v3798_v34, 0  ;;  %v6289_v13 = vrot.slane %v3001_v26, 9  ;;  %v4195_v40 = vadd.f32 %v4194_v56, %v4129_v51  ;;  %v4579_v44 = vld [vmem:[#allocation3 + $0x40] sm:$0xff] }
 0x3d7   : > { %v4010_v25 = vsel %vm3954_vm4, %v3947_v7, %v3946_v62  ;;  %v6290_v2 = vrot.slane %v3123_v38, 9  ;;  %v6291_v3 = vrot.slane %v3124_v20, 9  ;;  %v6292_v24 = vrot.slane %v3125_v58, 9 }
 0x3d8   : > { %v3736_v30 = vmax.f32 %v3003_v36, %v6297_v39  ;;  %v3737_v14 = vmax.f32 %v3129_v55, %v6298_v1  ;;  %v3738_v41 = vmax.f32 %v3130_v28, %v6299_v53  ;;  %v3728_v23 = vmax.f32 %v3001_v26, %v6289_v13  ;;  %v6684_v1 = vld [vmem:[%s9607_s3 + $0x100] sm:$0xff] }
 0x3d9   : > { %v3739_v8 = vmax.f32 %v3131_v42, %v6300_v0  ;;  %v3729_v9 = vmax.f32 %v3123_v38, %v6290_v2  ;;  %v3730_v49 = vmax.f32 %v3124_v20, %v6291_v3  ;;  %v3731_v37 = vmax.f32 %v3125_v58, %v6292_v24  ;;  %4826 = vmatpush.bf16.msra.mxu0 %v6684_v1  ;;  %v4394_v20 = vld [vmem:[#allocation3 + $0x51] sm:$0xff] }
 0x3da   : > { %v4011_v12 = vsel %vm3956_vm5, %v3948_v27, %v4010_v25  ;;  %v3800_v10 = vmax.f32 %v3728_v23, %v3736_v30  ;;  %v4399_v46 = vpack.c.bf16 %v9294_v6, %v4392_v35  ;;  %v4492_v11 = vpack.c.bf16 %v9296_v52, %v4485_v54  ;;  %v4487_v58 = vld [vmem:[#allocation3 + $0x52] sm:$0xff]  ;;  %v9343_v30 = vpop.f32.mrf.mxu3 }
 0x3db   : > { %v3949_v32 = vperm.slane %v3799_v19, 0  ;;  %v3801_v16 = vmax.f32 %v3729_v9, %v3737_v14  ;;  %v3802_v36 = vmax.f32 %v3730_v49, %v3738_v41  ;;  %v3803_v55 = vmax.f32 %v3731_v37, %v3739_v8  ;;  %v4584_v2 = vld [vmem:[#allocation3 + $0x90] sm:$0xff] }
 0x3dc   : > { %v4279_v28 = vpop.f32.mrf.mxu2  ;;  %v3950_v42 = vperm.slane %v3800_v10, 0  ;;  %v4586_v21 = vpack.c.bf16 %v4580_v29, %v4579_v44  ;;  %v4400_v27 = vpack.c.bf16 %v9217_v57, %v4394_v20  ;;  %v4493_v13 = vpack.c.bf16 %v9219_v63, %v4487_v58  ;;  %v4770_v14 = vld [vmem:[#allocation3 + $0x92] sm:$0xff] }
 0x3dd   : > { %v4293_v34 = vadd.f32 %v4279_v28, %v4195_v40  ;;  %v4012_v7 = vsel %vm3958_vm6, %v3949_v32, %v4011_v12  ;;  %v3951_v39 = vperm.slane %v3801_v16, 0  ;;  %v3952_v26 = vperm.slane %v3802_v36, 0 }
 0x3de   : > { %v4013_v62 = vsel %vm3960_vm7, %v3950_v42, %v4012_v7  ;;  %v3953_v53 = vperm.slane %v3803_v55, 0  ;;  %v4678_v3 = vpack.c.bf16 %v4392_v35, %v9261_v47  ;;  %v4679_v63 = vpack.c.bf16 %v4394_v20, %v9294_v6  ;;  %v9339_v6 = vpop.f32.mrf.mxu0 }
 0x3df   : > { %6398 = vmatmul.msk.bf16.gmra.mxu0 %vm3804_vm2, %v4399_v46  ;;  %v4014_v51 = vsel %vm3962_vm8, %v3951_v39, %v4013_v62 }
 0x3e0   : > { %6418 = vmatmul.msk.bf16.gmra.mxu1 %vm3804_vm2, %v4492_v11  ;;  %v4015_v56 = vsel %vm3964_vm9, %v3952_v26, %v4014_v51 }
 0x3e1   : > { %6438 = vmatmul.msk.bf16.gmra.mxu2 %vm3804_vm2, %v4586_v21  ;;  %v4016_v0 = vsel %vm3966_vm10, %v3953_v53, %v4015_v56 }
 0x3e2   : > { %4033 = vst.msk [vmem:[#allocation3 + $0x81] sm:$0xff] %vm3804_vm2, %v4016_v0 }
 0x3e9   : > { %v4304_v38 = vld [vmem:[#allocation3 + $0x80] sm:$0xff] }
 0x3ea   : > { %v4308_v19 = vpack.c.bf16 %v4304_v38, %v9223_v43  ;;  %v4397_v40 = vld [vmem:[#allocation3 + $0x81] sm:$0xff]  ;;  %v4588_v24 = vpack.c.bf16 %v4584_v2, %v4304_v38  ;;  %v4187_v38 = vadd.f32 %v8878_v61, %v8876_v31 }
 0x3eb   : > { %v4490_v25 = vld [vmem:[#allocation3 + $0x82] sm:$0xff]  ;;  %v4401_v43 = vpack.c.bf16 %v4397_v40, %v9221_v33  ;;  %v4772_v33 = vpack.c.bf16 %v4487_v58, %v9296_v52  ;;  %v9345_v52 = vpop.f32.mrf.mxu2  ;;  %v9888_v58 = vld [vmem:[#allocation52_spill] sm:$0xff] }
 0x3ec   : > { %6380 = vmatmul.msk.bf16.gmra.mxu3 %vm3804_vm2, %v4308_v19  ;;  %v4494_v57 = vpack.c.bf16 %v4490_v25, %v9225_v59  ;;  %v4677_v59 = vld [vmem:[#allocation3 + $0x91] sm:$0xff]  ;;  %v4774_v8 = vpack.c.bf16 %v4770_v14, %v4490_v25  ;;  %v4290_v19 = vadd.f32 %v9888_v58, %v4187_v38 }
 0x3ed   : > { %v4681_v47 = vpack.c.bf16 %v4677_v59, %v4397_v40 }
 0x3ef   : > { %6399 = vmatmul.msk.bf16.gmra.mxu0 %vm3804_vm2, %v4400_v27 }
 0x3f0   : > { %6419 = vmatmul.msk.bf16.gmra.mxu1 %vm3804_vm2, %v4493_v13  ;;  %v4383_v13 = vadd.f32 %v9268_v5, %v4290_v19 }
 0x3f1   : > { %6439 = vmatmul.msk.bf16.gmra.mxu2 %vm3804_vm2, %v9236_v60  ;;  %v4771_v60 = vpack.c.bf16 %v4485_v54, %v9263_v18  ;;  %v9341_v18 = vpop.f32.mrf.mxu1 }
 0x3fc   : > { %6457 = vmatmul.msk.bf16.vlgmr.msrb.gmra.mxu3 %vm3804_vm2, %v4678_v3 }
 0x3ff   : > { %6400 = vmatmul.msk.bf16.gmra.mxu0 %vm3804_vm2, %v4401_v43  ;;  %v9367_v43 = vld [vmem:[%s9608_s4] ss:$0 sm:$0xff] }
 0x400   : > { %6420 = vmatmul.msk.bf16.gmra.mxu1 %vm3804_vm2, %v4494_v57 }
 0x401   : > { %6440 = vmatmul.msk.bf16.gmra.mxu2 %vm3804_vm2, %v4588_v24 }
 0x40c   : > { %6458 = vmatmul.msk.bf16.gmra.mxu3 %vm3804_vm2, %v4679_v63 }
 0x40f   : > { %6477 = vmatmul.msk.bf16.vlgmr.msra.gmra.mxu0 %vm3804_vm2, %v4771_v60 }
 0x41c   : > { %6459 = vmatmul.msk.bf16.gmra.mxu3 %vm3804_vm2, %v9233_v4 }
 0x41f   : > { %6478 = vmatmul.msk.bf16.gmra.mxu0 %vm3804_vm2, %v4772_v33 }
 0x42c   : > { %6460 = vmatmul.msk.bf16.gmra.mxu3 %vm3804_vm2, %v4681_v47 }
 0x42f   : > { %6479 = vmatmul.msk.bf16.gmra.mxu0 %vm3804_vm2, %v9240_v17 }
 0x43c   : > { %v4134_v41 = vpop.f32.mrf.mxu0 }
 0x43d   : > { %v4199_v4 = vpop.f32.mrf.mxu1 }
 0x43e   : > { %v4200_v23 = vadd.f32 %v4199_v4, %v4134_v41  ;;  %v4192_v4 = vadd.f32 %v9275_v45, %v9273_v50 }
 0x43f   : > { %6480 = vmatmul.msk.bf16.gmra.mxu0 %vm3804_vm2, %v4774_v8 }
 0x440   : > { %v4372_v9 = vpop.f32.mrf.mxu3 }
 0x441   : > { %v4386_v49 = vadd.f32 %v4372_v9, %v4293_v34  ;;  %v9889_v9 = vmov 0.0  }
 0x442   : > { %5117 = vst.msk [vmem:[#allocation4] sm:$0x3f] %vm5116_vm11, %v9889_v9 }
 0x443   : > { %5118 = vst.msk [vmem:[#allocation4 + $0x8] sm:$0x3f] %vm5116_vm11, %v9889_v9 }
 0x444   : > { %v4284_v37 = vpop.f32.mrf.mxu2  ;;  %v4136_v17 = vpop.f32.mrf.mxu0  ;;  %5122 = vst.msk [vmem:[#allocation4 + $0x28] sm:$0x3f] %vm5116_vm11, %v9889_v9 }
 0x445   : > { %v4295_v35 = vadd.f32 %v4284_v37, %v4200_v23  ;;  %v4201_v54 = vpop.f32.mrf.mxu1  ;;  %5119 = vst.msk [vmem:[#allocation4 + $0x10] sm:$0x3f] %vm5116_vm11, %v9889_v9 }
 0x446   : > { %v4202_v29 = vadd.f32 %v4201_v54, %v4136_v17  ;;  %5120 = vst.msk [vmem:[#allocation4 + $0x18] sm:$0x3f] %vm5116_vm11, %v9889_v9 }
 0x447   : > { %5121 = vst.msk [vmem:[#allocation4 + $0x20] sm:$0x3f] %vm5116_vm11, %v9889_v9 }
 0x448   : > { %v9350_v28 = vpop.f32.mrf.mxu3  ;;  %5739 = vst.msk [vmem:[#allocation5] sm:$0xf] %vm5738_vm14, %v9889_v9 }
 0x449   : > { %5740 = vst.msk [vmem:[#allocation5 + $0x4] sm:$0xf] %vm5738_vm14, %v9889_v9 }
 0x44a   : > { %5742 = vst.msk [vmem:[#allocation5 + $0xc] sm:$0xf] %vm5738_vm14, %v9889_v9 }
 0x44b   : > { %5741 = vst.msk [vmem:[#allocation5 + $0x8] sm:$0xf] %vm5738_vm14, %v9889_v9 }
 0x44c   : > { %v4286_v12 = vpop.f32.mrf.mxu2  ;;  %v4455_v46 = vpop.f32.mrf.mxu0 }
 0x44d   : > { %v4296_v10 = vadd.f32 %v4286_v12, %v4202_v29  ;;  %v4475_v11 = vadd.f32 %v4455_v46, %v8881_v22  ;;  %v4548_v39 = vpop.f32.mrf.mxu1 }
 0x44f   : > { %v4568_v27 = vadd.f32 %v4548_v39, %v4475_v11 }
 0x454   : > { %v4457_v32 = vpop.f32.mrf.mxu0  ;;  %v4642_v26 = vpop.f32.mrf.mxu2 }
 0x455   : > { %v4550_v56 = vpop.f32.mrf.mxu1  ;;  %v4662_v40 = vadd.f32 %v4642_v26, %v4568_v27  ;;  %v4476_v2 = vadd.f32 %v4457_v32, %v4383_v13 }
 0x457   : > { %v4569_v61 = vadd.f32 %v4550_v56, %v4476_v2 }
 0x45c   : > { %v4460_v16 = vpop.f32.mrf.mxu0 }
 0x45d   : > { %v4477_v36 = vadd.f32 %v4460_v16, %v9291_v48  ;;  %v4644_v48 = vpop.f32.mrf.mxu2  ;;  %v4553_v57 = vpop.f32.mrf.mxu1 }
 0x45e   : > { %v4663_v33 = vadd.f32 %v4644_v48, %v4569_v61 }
 0x45f   : > { %v4570_v37 = vadd.f32 %v4553_v57, %v4477_v36 }
 0x464   : > { %v4462_v55 = vpop.f32.mrf.mxu0 }
 0x465   : > { %v4647_v63 = vpop.f32.mrf.mxu2  ;;  %v4555_v8 = vpop.f32.mrf.mxu1 }
 0x466   : > { %v4664_v45 = vadd.f32 %v4647_v63, %v4570_v37 }
 0x46c   : > { %v4465_v44 = vpop.f32.mrf.mxu0 }
 0x46d   : > { %v9352_v42 = vadd.f32 %v4465_v44, %v4386_v49  ;;  %v4292_v49 = vadd.f32 %v9287_v15, %v4192_v4 }
 0x46f   : > { %v4377_v34 = vpop.f32.mrf.mxu3  ;;  %v4385_v50 = vadd.f32 %v9343_v30, %v4292_v49  ;;  %v5177_v30 = vld [vmem:[#allocation4] sm:$0xf] }
 0x470   : > { %v4388_v21 = vadd.f32 %v4377_v34, %v4295_v35  ;;  %v4649_v35 = vpop.f32.mrf.mxu2  ;;  %5185 = vst [vmem:[#allocation1] ss:$2 sm:$0xff] %v5177_v30  ;;  %v4558_v34 = vpop.f32.mrf.mxu1 }
 0x471   : > { %v4478_v12 = vadd.f32 %v4462_v55, %v4385_v50  ;;  %v4572_v13 = vadd.f32 %v4558_v34, %v9352_v42 }
 0x473   : > { %v4571_v36 = vadd.f32 %v4555_v8, %v4478_v12 }
 0x474   : > { %v9354_v7 = vpop.f32.mrf.mxu0 }
 0x477   : > { %v4379_v62 = vpop.f32.mrf.mxu3 }
 0x478   : > { %v4389_v1 = vadd.f32 %v4379_v62, %v4296_v10  ;;  %v4652_v39 = vpop.f32.mrf.mxu2  ;;  %v4197_v62 = vadd.f32 %v9341_v18, %v9339_v6 }
 0x479   : > { %v4666_v6 = vadd.f32 %v4652_v39, %v4572_v13 }
 0x47a   : > { %v4294_v38 = vadd.f32 %v9345_v52, %v4197_v62 }
 0x47c   : > { %v4470_v53 = vpop.f32.mrf.mxu0  ;;  %v4387_v27 = vadd.f32 %v9350_v28, %v4294_v38 }
 0x47d   : > { %v9356_v22 = vadd.f32 %v4470_v53, %v4388_v21  ;;  %v4665_v21 = vadd.f32 %v4649_v35, %v4571_v36 }
 0x47e   : > { %v4480_v18 = vadd.f32 %v9354_v7, %v4387_v27 }
 0x47f   : > { %v4735_v51 = vpop.f32.mrf.mxu3 }
 0x480   : > { %v4755_v3 = vadd.f32 %v4735_v51, %v4662_v40  ;;  %v4654_v63 = vpop.f32.mrf.mxu2 }
 0x484   : > { %v4472_v0 = vpop.f32.mrf.mxu0 }
 0x485   : > { %v9360_v20 = vadd.f32 %v4472_v0, %v4389_v1 }
 0x487   : > { %v4737_v25 = vpop.f32.mrf.mxu3 }
 0x488   : > { %v4756_v14 = vadd.f32 %v4737_v25, %v4663_v33  ;;  %v4560_v25 = vpop.f32.mrf.mxu1  ;;  %v4657_v62 = vpop.f32.mrf.mxu2 }
 0x48c   : > { %v4828_v24 = vpop.f32.mrf.mxu0 }
 0x48d   : > { %v4848_v31 = vadd.f32 %v4828_v24, %v4755_v3 }
 0x48f   : > { %v4860_v60 = vadd.f32 %v9367_v43, %v4848_v31  ;;  %v4740_v47 = vpop.f32.mrf.mxu3 }
 0x490   : > { %v4757_v46 = vadd.f32 %v4740_v47, %v4664_v45 }
 0x491   : > { %v4868_v59 = vsub.f32 0.0, %v4860_v60 }
 0x493   : > { %v4876_v5 = vmul.f32 1.442695, %v4868_v59  ;;  %v4573_v59 = vadd.f32 %v4560_v25, %v4480_v18 }
 0x494   : > { %v4830_v41 = vpop.f32.mrf.mxu0 }
 0x495   : > { %6891 = vpow2.f32 %v4876_v5  ;;  %v4849_v23 = vadd.f32 %v4830_v41, %v4756_v14  ;;  %v4667_v35 = vadd.f32 %v4654_v63, %v4573_v59 }
 0x497   : > { %v4861_v17 = vadd.f32 %v9367_v43, %v4849_v23  ;;  %v4742_v15 = vpop.f32.mrf.mxu3 }
 0x498   : > { %v4758_v53 = vadd.f32 %v4742_v15, %v4665_v21  ;;  %v4563_v21 = vpop.f32.mrf.mxu1 }
 0x499   : > { %v4869_v54 = vsub.f32 0.0, %v4861_v17 }
 0x49b   : > { %v6892_v29 = vpop.eup %6891  ;;  %v4878_v10 = vmul.f32 1.442695, %v4869_v54 }
 0x49c   : > { %v4892_v11 = vadd.f32 1.0, %v6892_v29  ;;  %v4833_v32 = vpop.f32.mrf.mxu0 }
 0x49d   : > { %6893 = vpow2.f32 %v4878_v10  ;;  %v4850_v16 = vadd.f32 %v4833_v32, %v4757_v46 }
 0x49e   : > { %6895 = vrcp.f32 %v4892_v11 }
 0x49f   : > { %v9388_v44 = vadd.f32 %v9367_v43, %v4850_v16  ;;  %v4745_v0 = vpop.f32.mrf.mxu3 }
 0x4a0   : > { %v4759_v31 = vadd.f32 %v4745_v0, %v4666_v6  ;;  %v4565_v59 = vpop.f32.mrf.mxu1 }
 0x4a1   : > { %v4870_v55 = vsub.f32 0.0, %v9388_v44 }
 0x4a3   : > { %v6894_v26 = vpop.eup %6893  ;;  %v4880_v1 = vmul.f32 1.442695, %v4870_v55 }
 0x4a4   : > { %v6896_v51 = vpop.eup %6895  ;;  %v4893_v56 = vadd.f32 1.0, %v6894_v26  ;;  %v4835_v48 = vpop.f32.mrf.mxu0 }
 0x4a5   : > { %6897 = vpow2.f32 %v4880_v1  ;;  %v4851_v58 = vadd.f32 %v4835_v48, %v4758_v53  ;;  %v4908_v19 = vmul.f32 %v6896_v51, %v4860_v60  ;;  %v4574_v48 = vadd.f32 %v4563_v21, %v9356_v22 }
 0x4a6   : > { %6899 = vrcp.f32 %v4893_v56 }
 0x4a7   : > { %v9397_v40 = vadd.f32 %v9367_v43, %v4851_v58  ;;  %v4924_v2 = vrot.slane %v4908_v19, 2  ;;  %v4925_v3 = vrot.slane %v4908_v19, 4  ;;  %v4926_v57 = vrot.slane %v4908_v19, 6  ;;  %v4747_v4 = vpop.f32.mrf.mxu3 }
 0x4a8   : > { %v6481_v60 = vrot.slane %v4908_v19, 9  ;;  %v4760_v55 = vadd.f32 %v4747_v4, %v4667_v35  ;;  %v4668_v13 = vadd.f32 %v4657_v62, %v4574_v48 }
 0x4a9   : > { %v4871_v52 = vsub.f32 0.0, %v9397_v40  ;;  %v6482_v14 = vrot.slane %v4924_v2, 9  ;;  %v6483_v41 = vrot.slane %v4925_v3, 9  ;;  %v6484_v7 = vrot.slane %v4926_v57, 9 }
 0x4aa   : > { %v5068_v50 = vmax.f32 %v4908_v19, %v6481_v60 }
 0x4ab   : > { %v6898_v24 = vpop.eup %6897  ;;  %v4882_v33 = vmul.f32 1.442695, %v4871_v52  ;;  %v5069_v12 = vmax.f32 %v4924_v2, %v6482_v14  ;;  %v5070_v10 = vmax.f32 %v4925_v3, %v6483_v41  ;;  %v5071_v46 = vmax.f32 %v4926_v57, %v6484_v7  ;;  %v4659_v14 = vpop.f32.mrf.mxu2 }
 0x4ac   : > { %v6900_v61 = vpop.eup %6899  ;;  %v4894_v28 = vadd.f32 1.0, %v6898_v24  ;;  %v4838_v42 = vpop.f32.mrf.mxu0 }
 0x4ad   : > { %v4909_v47 = vmul.f32 %v6900_v61, %v4861_v17  ;;  %v4852_v5 = vadd.f32 %v4838_v42, %v4759_v31 }
 0x4ae   : > { %6901 = vrcp.f32 %v4894_v28 }
 0x4af   : > { %v4927_v23 = vrot.slane %v4909_v47, 2  ;;  %v4928_v8 = vrot.slane %v4909_v47, 4  ;;  %v4929_v49 = vrot.slane %v4909_v47, 6  ;;  %v6485_v37 = vrot.slane %v4909_v47, 9  ;;  %v4750_v18 = vpop.f32.mrf.mxu3 }
 0x4b0   : > { %6903 = vpow2.f32 %v4882_v33  ;;  %v9402_v45 = vadd.f32 %v9367_v43, %v4852_v5  ;;  %v4761_v24 = vadd.f32 %v4750_v18, %v4668_v13  ;;  %v4575_v5 = vadd.f32 %v4565_v59, %v9360_v20  ;;  %v5284_v59 = vld [vmem:[#allocation4 + $0x2] sm:$0xf] }
 0x4b1   : > { %v6486_v54 = vrot.slane %v4927_v23, 9  ;;  %v6487_v15 = vrot.slane %v4928_v8, 9  ;;  %v6488_v29 = vrot.slane %v4929_v49, 9  ;;  %v5072_v17 = vmax.f32 %v4909_v47, %v6485_v37 }
 0x4b2   : > { %v4872_v11 = vsub.f32 0.0, %v9402_v45 }
 0x4b3   : > { %v5073_v32 = vmax.f32 %v4927_v23, %v6486_v54  ;;  %v5074_v30 = vmax.f32 %v4928_v8, %v6487_v15  ;;  %v5075_v16 = vmax.f32 %v4929_v49, %v6488_v29  ;;  %v5100_v36 = vmax.f32 %v5068_v50, %v5072_v17 }
 0x4b4   : > { %v6902_v34 = vpop.eup %6901  ;;  %v4884_v39 = vmul.f32 1.442695, %v4872_v11  ;;  %v4840_v26 = vpop.f32.mrf.mxu0  ;;  %v4669_v29 = vadd.f32 %v4659_v14, %v4575_v5 }
 0x4b5   : > { %v5101_v1 = vmax.f32 %v5069_v12, %v5073_v32  ;;  %v5102_v53 = vmax.f32 %v5070_v10, %v5074_v30  ;;  %v5103_v51 = vmax.f32 %v5071_v46, %v5075_v16  ;;  %v4853_v0 = vadd.f32 %v4840_v26, %v4760_v55 }
 0x4b6   : > { %v6904_v56 = vpop.eup %6903  ;;  %6905 = vpow2.f32 %v4884_v39  ;;  %v5139_v38 = vperm.slane %v5100_v36, 0  ;;  %v4910_v6 = vmul.f32 %v6902_v34, %v9388_v44 }
 0x4b7   : > { %v5140_v58 = vperm.slane %v5101_v1, 0  ;;  %v5141_v19 = vperm.slane %v5102_v53, 0  ;;  %v4895_v27 = vadd.f32 1.0, %v6904_v56  ;;  %v5142_v25 = vperm.slane %v5103_v51, 0  ;;  %v4752_v15 = vpop.f32.mrf.mxu3  ;;  %v5201_v56 = vld [vmem:[#allocation4 + $0x1] sm:$0xf] }
 0x4b8   : > { %v9409_v3 = vadd.f32 %v9367_v43, %v4853_v0  ;;  %v4930_v31 = vrot.slane %v4910_v6, 2  ;;  %v4931_v44 = vrot.slane %v4910_v6, 4  ;;  %v4932_v60 = vrot.slane %v4910_v6, 6 }
 0x4b9   : > { %v5155_v2 = vsel %vm3954_vm4, %v5140_v58, %v5139_v38  ;;  %6907 = vrcp.f32 %v4895_v27  ;;  %v6489_v41 = vrot.slane %v4910_v6, 9  ;;  %v4762_v32 = vadd.f32 %v4752_v15, %v4669_v29 }
 0x4ba   : > { %v5156_v22 = vsel %vm3956_vm5, %v5141_v19, %v5155_v2  ;;  %v4873_v52 = vsub.f32 0.0, %v9409_v3  ;;  %v6490_v23 = vrot.slane %v4930_v31, 9  ;;  %v6491_v8 = vrot.slane %v4931_v44, 9 }
 0x4bb   : > { %v5157_v57 = vsel %vm3958_vm6, %v5142_v25, %v5156_v22  ;;  %v6492_v49 = vrot.slane %v4932_v60, 9  ;;  %v5076_v20 = vmax.f32 %v4910_v6, %v6489_v41 }
 0x4bc   : > { %v6906_v63 = vpop.eup %6905  ;;  %5173 = vst.msk [vmem:[#allocation4 + $0x9] sm:$0xf] %vm5172_vm12, %v5157_v57  ;;  %v4843_v61 = vpop.f32.mrf.mxu0  ;;  %v4886_v33 = vmul.f32 1.442695, %v4873_v52  ;;  %v5077_v16 = vmax.f32 %v4930_v31, %v6490_v23  ;;  %v5078_v36 = vmax.f32 %v4931_v44, %v6491_v8  ;;  %v6689_v8 = vld [vmem:[%s9609_s5 + $0x8] sm:$0xff] }
 0x4bd   : > { %v4896_v28 = vadd.f32 1.0, %v6906_v63  ;;  %v4854_v42 = vadd.f32 %v4843_v61, %v4761_v24  ;;  %v5079_v34 = vmax.f32 %v4932_v60, %v6492_v49  ;;  %5276 = vmatpush.bf16.msra.mxu2 %v6689_v8 }
 0x4be   : > { %6909 = vpow2.f32 %v4886_v33 }
 0x4bf   : > { %v6908_v47 = vpop.eup %6907  ;;  %v9418_v4 = vadd.f32 %v9367_v43, %v4854_v42  ;;  %6911 = vrcp.f32 %v4896_v28 }
 0x4c0   : > { %v4911_v7 = vmul.f32 %v6908_v47, %v9397_v40 }
 0x4c1   : > { %v4874_v40 = vsub.f32 0.0, %v9418_v4 }
 0x4c2   : > { %v4933_v37 = vrot.slane %v4911_v7, 2  ;;  %v4934_v35 = vrot.slane %v4911_v7, 4  ;;  %v4935_v50 = vrot.slane %v4911_v7, 6  ;;  %v6493_v54 = vrot.slane %v4911_v7, 9 }
 0x4c3   : > { %v5178_v17 = vld [vmem:[#allocation4 + $0x8] sm:$0xf]  ;;  %v4888_v51 = vmul.f32 1.442695, %v4874_v40 }
 0x4c4   : > { %5187 = vst [vmem:[#allocation1 + $0x1] ss:$2 sm:$0xff] %v5178_v17  ;;  %v5080_v12 = vmax.f32 %v4911_v7, %v6493_v54  ;;  %v6494_v10 = vrot.slane %v4933_v37, 9  ;;  %v6495_v46 = vrot.slane %v4934_v35, 9  ;;  %v6496_v11 = vrot.slane %v4935_v50, 9  ;;  %v6910_v30 = vpop.eup %6909  ;;  %v4845_v39 = vpop.f32.mrf.mxu0 }
 0x4c5   : > { %v6912_v55 = vpop.eup %6911  ;;  %v4897_v53 = vadd.f32 1.0, %v6910_v30  ;;  %v4855_v58 = vadd.f32 %v4845_v39, %v4762_v32  ;;  %v5202_v25 = vld [vmem:[#allocation4 + $0x9] sm:$0xf] }
 0x4c6   : > { %v5104_v21 = vmax.f32 %v5076_v20, %v5080_v12  ;;  %v5081_v26 = vmax.f32 %v4933_v37, %v6494_v10  ;;  %v5082_v62 = vmax.f32 %v4934_v35, %v6495_v46  ;;  %v5083_v1 = vmax.f32 %v4935_v50, %v6496_v11  ;;  %v5285_v37 = vld [vmem:[#allocation4 + $0xa] sm:$0xf] }
 0x4c7   : > { %v4912_v19 = vmul.f32 %v6912_v55, %v9402_v45  ;;  %6913 = vrcp.f32 %v4897_v53  ;;  %v9426_v57 = vadd.f32 %v9367_v43, %v4855_v58 }
 0x4c8   : > { %v5105_v48 = vmax.f32 %v5077_v16, %v5081_v26  ;;  %v5106_v0 = vmax.f32 %v5078_v36, %v5082_v62  ;;  %v5107_v38 = vmax.f32 %v5079_v34, %v5083_v1  ;;  %v5143_v13 = vperm.slane %v5104_v21, 0  ;;  %v6688_v21 = vld [vmem:[%s9609_s5] sm:$0xff]  ;;  %v6691_v1 = vld [vmem:[%s9609_s5 + $0x18] sm:$0xff] }
 0x4c9   : > { %6915 = vpow2.f32 %v4888_v51  ;;  %v4936_v24 = vrot.slane %v4912_v19, 2  ;;  %v4937_v45 = vrot.slane %v4912_v19, 4  ;;  %v4938_v63 = vrot.slane %v4912_v19, 6  ;;  %5277 = vmatpush.bf16.msra.mxu2 %v6688_v21  ;;  %5247 = vmatpush.bf16.msra.mxu1 %v6691_v1 }
 0x4ca   : > { %v5144_v6 = vperm.slane %v5105_v48, 0  ;;  %v5145_v18 = vperm.slane %v5106_v0, 0  ;;  %v5146_v2 = vperm.slane %v5107_v38, 0  ;;  %v4875_v44 = vsub.f32 0.0, %v9426_v57 }
 0x4cb   : > { %v9422_v27 = vld.sshfl [vmem:[#allocation1] sm:$0xff pattern:$0x75316420]  ;;  %v6497_v60 = vrot.slane %v4912_v19, 9  ;;  %v6498_v43 = vrot.slane %v4936_v24, 9  ;;  %v6499_v47 = vrot.slane %v4937_v45, 9 }
 0x4cc   : > { %5209 = vst [vmem:[#allocation1] ss:$2 sm:$0xff] %v5201_v56  ;;  %v5158_v22 = vsel %vm3954_vm4, %v5144_v6, %v5143_v13  ;;  %v4890_v33 = vmul.f32 1.442695, %v4875_v44  ;;  %v6500_v5 = vrot.slane %v4938_v63, 9  ;;  %v6690_v13 = vld [vmem:[%s9609_s5 + $0x10] sm:$0xff] }
 0x4cd   : > { %5211 = vst [vmem:[#allocation1 + $0x1] ss:$2 sm:$0xff] %v5202_v25  ;;  %v5159_v52 = vsel %vm3956_vm5, %v5145_v18, %v5158_v22  ;;  %v6914_v61 = vpop.eup %6913  ;;  %v5084_v35 = vmax.f32 %v4912_v19, %v6497_v60  ;;  %v5085_v17 = vmax.f32 %v4936_v24, %v6498_v43  ;;  %v5086_v20 = vmax.f32 %v4937_v45, %v6499_v47  ;;  %v5339_v56 = vld [vmem:[#allocation4 + $0x8] sm:$0xf]  ;;  %v6693_v25 = vld [vmem:[%s9609_s5 + $0x28] sm:$0xff] }
 0x4ce   : > { %v5160_v31 = vsel %vm3958_vm6, %v5146_v2, %v5159_v52  ;;  %v4913_v28 = vmul.f32 %v6914_v61, %v9409_v3  ;;  %6917 = vpow2.f32 %v4890_v33  ;;  %v5087_v12 = vmax.f32 %v4938_v63, %v6500_v5  ;;  %5248 = vmatpush.bf16.msra.mxu1 %v6690_v13  ;;  %v5394_v45 = vld [vmem:[#allocation4 + $0x9] sm:$0xf]  ;;  %5329 = vmatpush.bf16.msra.mxu3 %v6693_v25  ;;  %v6699_v13 = vld [vmem:[%s9609_s5 + $0x58] sm:$0xff] }
 0x4cf   : > { %5174 = vst.msk [vmem:[#allocation4 + $0x11] sm:$0xf] %vm5172_vm12, %v5160_v31  ;;  %v6916_v42 = vpop.eup %6915 }
 0x4d0   : > { %v4939_v14 = vrot.slane %v4913_v28, 2  ;;  %v4940_v41 = vrot.slane %v4913_v28, 4  ;;  %v4941_v7 = vrot.slane %v4913_v28, 6  ;;  %v6501_v23 = vrot.slane %v4913_v28, 9 }
 0x4d1   : > { %v4898_v50 = vadd.f32 1.0, %v6916_v42 }
 0x4d2   : > { %v6502_v3 = vrot.slane %v4939_v14, 9  ;;  %v6503_v54 = vrot.slane %v4940_v41, 9  ;;  %v6504_v15 = vrot.slane %v4941_v7, 9  ;;  %v5088_v29 = vmax.f32 %v4913_v28, %v6501_v23 }
 0x4d3   : > { %6919 = vrcp.f32 %v4898_v50 }
 0x4d4   : > { %v9436_v49 = vld.sshfl [vmem:[#allocation1] sm:$0xff pattern:$0x75316420]  ;;  %v5089_v10 = vmax.f32 %v4939_v14, %v6502_v3  ;;  %v5090_v46 = vmax.f32 %v4940_v41, %v6503_v54  ;;  %v5091_v11 = vmax.f32 %v4941_v7, %v6504_v15  ;;  %v5108_v32 = vmax.f32 %v5084_v35, %v5088_v29  ;;  %v6918_v34 = vpop.eup %6917  ;;  %v6695_v41 = vld [vmem:[%s9609_s5 + $0x38] sm:$0xff] }
 0x4d5   : > { %5292 = vst [vmem:[#allocation1] ss:$2 sm:$0xff] %v5284_v59  ;;  %v4899_v62 = vadd.f32 1.0, %v6918_v34  ;;  %v6692_v14 = vld [vmem:[%s9609_s5 + $0x20] sm:$0xff]  ;;  %5384 = vmatpush.bf16.msrb.mxu1 %v6695_v41 }
 0x4d6   : > { %5294 = vst [vmem:[#allocation1 + $0x1] ss:$2 sm:$0xff] %v5285_v37  ;;  %v5179_v40 = vld [vmem:[#allocation4 + $0x10] sm:$0xf]  ;;  %v5109_v30 = vmax.f32 %v5085_v17, %v5089_v10  ;;  %v5110_v16 = vmax.f32 %v5086_v20, %v5090_v46  ;;  %v5111_v36 = vmax.f32 %v5087_v12, %v5091_v11  ;;  %v5147_v39 = vperm.slane %v5108_v32, 0  ;;  %5330 = vmatpush.bf16.msra.mxu3 %v6692_v14  ;;  %v6694_v11 = vld [vmem:[%s9609_s5 + $0x30] sm:$0xff] }
 0x4d7   : > { %5189 = vst [vmem:[#allocation1 + $0x10] ss:$2 sm:$0xff] %v5179_v40  ;;  %6921 = vrcp.f32 %v4899_v62  ;;  %v5340_v38 = vld [vmem:[#allocation4 + $0x10] sm:$0xf]  ;;  %v5449_v15 = vld [vmem:[#allocation4 + $0xa] sm:$0xf] }
 0x4d8   : > { %v5148_v55 = vperm.slane %v5109_v30, 0  ;;  %v5149_v26 = vperm.slane %v5110_v16, 0  ;;  %v5150_v48 = vperm.slane %v5111_v36, 0  ;;  %v5395_v31 = vld [vmem:[#allocation4 + $0x11] sm:$0xf] }
 0x4d9   : > { %v6920_v53 = vpop.eup %6919  ;;  %v5203_v29 = vld [vmem:[#allocation4 + $0x11] sm:$0xf]  ;;  %5385 = vmatpush.bf16.msrb.mxu1 %v6694_v11  ;;  %v5508_v41 = vld [vmem:[#allocation4 + $0x28] sm:$0xf] }
 0x4da   : > { %v5161_v0 = vsel %vm3954_vm4, %v5148_v55, %v5147_v39  ;;  %v4914_v6 = vmul.f32 %v6920_v53, %v9418_v4  ;;  %v5450_v20 = vld [vmem:[#allocation4 + $0x12] sm:$0xf]  ;;  %5494 = vmatpush.bf16.msrb.mxu3 %v6699_v13 }
 0x4db   : > { %v5162_v58 = vsel %vm3956_vm5, %v5149_v26, %v5161_v0  ;;  %v6697_v26 = vld [vmem:[%s9609_s5 + $0x48] sm:$0xff] }
 0x4dc   : > { %v5163_v19 = vsel %vm3958_vm6, %v5150_v48, %v5162_v58  ;;  %v4942_v2 = vrot.slane %v4914_v6, 2  ;;  %v4943_v22 = vrot.slane %v4914_v6, 4  ;;  %v4944_v52 = vrot.slane %v4914_v6, 6  ;;  %5439 = vmatpush.bf16.msrb.mxu2 %v6697_v26  ;;  %v5286_v48 = vld [vmem:[#allocation4 + $0x12] sm:$0xf] }
 0x4dd   : > { %v9444_v51 = vld.sshfl [vmem:[#allocation1] sm:$0xff pattern:$0x75316420]  ;;  %5175 = vst.msk [vmem:[#allocation4 + $0x19] sm:$0xf] %vm5172_vm12, %v5163_v19  ;;  %v6922_v18 = vpop.eup %6921  ;;  %v6505_v28 = vrot.slane %v4914_v6, 9 }
 0x4de   : > { %5347 = vst [vmem:[#allocation1] ss:$2 sm:$0xff] %v5339_v56  ;;  %v4915_v24 = vmul.f32 %v6922_v18, %v9426_v57  ;;  %v6506_v33 = vrot.slane %v4942_v2, 9  ;;  %v6507_v42 = vrot.slane %v4943_v22, 9  ;;  %v6508_v59 = vrot.slane %v4944_v52, 9 }
 0x4df   : > { %5349 = vst [vmem:[#allocation1 + $0x1] ss:$2 sm:$0xff] %v5340_v38  ;;  %v5092_v7 = vmax.f32 %v4914_v6, %v6505_v28  ;;  %v5505_v56 = vld [vmem:[#allocation4 + $0x10] sm:$0xf]  ;;  %v6698_v6 = vld [vmem:[%s9609_s5 + $0x50] sm:$0xff]  ;;  %v6703_v28 = vld [vmem:[%s9609_s5 + $0x78] sm:$0xff] }
 0x4e0   : > { %v4945_v44 = vrot.slane %v4915_v24, 2  ;;  %v4946_v4 = vrot.slane %v4915_v24, 4  ;;  %v4947_v60 = vrot.slane %v4915_v24, 6  ;;  %v6509_v43 = vrot.slane %v4915_v24, 9  ;;  %v5560_v18 = vld [vmem:[#allocation4 + $0x11] sm:$0xf]  ;;  %5495 = vmatpush.bf16.msrb.mxu3 %v6698_v6 }
 0x4e1   : > { %v5093_v23 = vmax.f32 %v4942_v2, %v6506_v33  ;;  %v5094_v8 = vmax.f32 %v4943_v22, %v6507_v42  ;;  %v5095_v37 = vmax.f32 %v4944_v52, %v6508_v59  ;;  %v6702_v59 = vld [vmem:[%s9609_s5 + $0x70] sm:$0xff] }
 0x4e2   : > { %v6510_v47 = vrot.slane %v4945_v44, 9  ;;  %v6511_v5 = vrot.slane %v4946_v4, 9  ;;  %v6512_v57 = vrot.slane %v4947_v60, 9  ;;  %v5096_v35 = vmax.f32 %v4915_v24, %v6509_v43  ;;  %v6705_v43 = vld [vmem:[%s9609_s5 + $0x88] sm:$0xff] }
 0x4e4   : > { %v5180_v61 = vld [vmem:[#allocation4 + $0x18] sm:$0xf]  ;;  %v5097_v50 = vmax.f32 %v4945_v44, %v6510_v47  ;;  %v5098_v3 = vmax.f32 %v4946_v4, %v6511_v5  ;;  %v5099_v54 = vmax.f32 %v4947_v60, %v6512_v57  ;;  %v5112_v12 = vmax.f32 %v5092_v7, %v5096_v35  ;;  %v5615_v44 = vld [vmem:[#allocation4 + $0x12] sm:$0xf]  ;;  %v6704_v47 = vld [vmem:[%s9609_s5 + $0x80] sm:$0xff] }
 0x4e5   : > { %5191 = vst [vmem:[#allocation1 + $0x11] ss:$2 sm:$0xff] %v5180_v61  ;;  %v5204_v34 = vld [vmem:[#allocation4 + $0x19] sm:$0xf] }
 0x4e6   : > { %v9458_v63 = vld.sshfl [vmem:[#allocation1] sm:$0xff pattern:$0x75316420]  ;;  %v5113_v40 = vmax.f32 %v5093_v23, %v5097_v50  ;;  %v5114_v10 = vmax.f32 %v5094_v8, %v5098_v3  ;;  %v5115_v46 = vmax.f32 %v5095_v37, %v5099_v54  ;;  %v5151_v30 = vperm.slane %v5112_v12, 0  ;;  %v5506_v0 = vld [vmem:[#allocation4 + $0x18] sm:$0xf] }
 0x4e7   : > { %5402 = vst [vmem:[#allocation1] ss:$2 sm:$0xff] %v5394_v45  ;;  %v5287_v58 = vld [vmem:[#allocation4 + $0x1a] sm:$0xf]  ;;  %v5563_v37 = vld [vmem:[#allocation4 + $0x29] sm:$0xf] }
 0x4e8   : > { %5404 = vst [vmem:[#allocation1 + $0x1] ss:$2 sm:$0xff] %v5395_v31  ;;  %v5152_v16 = vperm.slane %v5113_v40, 0  ;;  %v5153_v36 = vperm.slane %v5114_v10, 0  ;;  %v5154_v39 = vperm.slane %v5115_v46, 0  ;;  %v6700_v31 = vld [vmem:[%s9609_s5 + $0x60] sm:$0xff] }
 0x4e9   : > { %v5341_v2 = vld [vmem:[#allocation4 + $0x18] sm:$0xf]  ;;  %v5618_v54 = vld [vmem:[#allocation4 + $0x2a] sm:$0xf] }
 0x4ea   : > { %v5164_v55 = vsel %vm3954_vm4, %v5152_v16, %v5151_v30  ;;  %v5561_v22 = vld [vmem:[#allocation4 + $0x19] sm:$0xf] }
 0x4eb   : > { %v5165_v62 = vsel %vm3956_vm5, %v5153_v36, %v5164_v55  ;;  %v5616_v4 = vld [vmem:[#allocation4 + $0x1a] sm:$0xf] }
 0x4ec   : > { %v5193_v32 = vld.sshfl [vmem:[#allocation1 + $0x10] sm:$0xff pattern:$0x75316420]  ;;  %v5166_v1 = vsel %vm3958_vm6, %v5154_v39, %v5165_v62 }
 0x4ed   : > { %5213 = vst [vmem:[#allocation1 + $0x10] ss:$2 sm:$0xff] %v5203_v29  ;;  %v5196_v21 = vpack.c.bf16 %v5193_v32, %v9422_v27  ;;  %v6696_v27 = vld [vmem:[%s9609_s5 + $0x40] sm:$0xff]  ;;  %v5396_v60 = vld [vmem:[#allocation4 + $0x19] sm:$0xf] }
 0x4ee   : > { %5215 = vst [vmem:[#allocation1 + $0x11] ss:$2 sm:$0xff] %v5204_v34  ;;  %5440 = vmatpush.bf16.msrb.mxu2 %v6696_v27  ;;  %v5451_v5 = vld [vmem:[#allocation4 + $0x1a] sm:$0xf] }
 0x4ef   : > { %v9466_v17 = vld.sshfl [vmem:[#allocation1] sm:$0xff pattern:$0x75316420]  ;;  %6530 = vmatmul.msk.bf16.vlgmr.msra.gmra.mxu2 %vm5237_vm13, %v5196_v21  ;;  %5176 = vst.msk [vmem:[#allocation4 + $0x21] sm:$0xf] %vm5172_vm12, %v5166_v1 }
 0x4f0   : > { %5457 = vst [vmem:[#allocation1] ss:$2 sm:$0xff] %v5449_v15 }
 0x4f1   : > { %5459 = vst [vmem:[#allocation1 + $0x1] ss:$2 sm:$0xff] %v5450_v20 }
 0x4f2   : > { %5605 = vmatpush.bf16.msra.mxu2 %v6703_v28  ;;  %v5759_v28 = vld [vmem:[#allocation5] sm:$0x3] }
 0x4f5   : > { %v5217_v38 = vld.sshfl [vmem:[#allocation1 + $0x10] sm:$0xff pattern:$0x75316420] }
 0x4f6   : > { %5296 = vst [vmem:[#allocation1 + $0x10] ss:$2 sm:$0xff] %v5286_v48  ;;  %v5220_v19 = vpack.c.bf16 %v5217_v38, %v9436_v49  ;;  %v6701_v49 = vld [vmem:[%s9609_s5 + $0x68] sm:$0xff]  ;;  %v5342_v24 = vld [vmem:[#allocation4 + $0x20] sm:$0xf]  ;;  %5606 = vmatpush.bf16.msra.mxu2 %v6702_v59 }
 0x4f7   : > { %5298 = vst [vmem:[#allocation1 + $0x11] ss:$2 sm:$0xff] %v5287_v58  ;;  %v5397_v33 = vld [vmem:[#allocation4 + $0x21] sm:$0xf] }
 0x4f8   : > { %v9483_v53 = vld.sshfl [vmem:[#allocation1] sm:$0xff pattern:$0x75316420]  ;;  %6521 = vmatmul.msk.bf16.vlgmr.msra.gmra.mxu1 %vm5237_vm13, %v5220_v19  ;;  %v5452_v57 = vld [vmem:[#allocation4 + $0x22] sm:$0xf] }
 0x4f9   : > { %5513 = vst [vmem:[#allocation1] ss:$2 sm:$0xff] %v5505_v56  ;;  %5550 = vmatpush.bf16.msra.mxu1 %v6701_v49  ;;  %v5507_v23 = vld [vmem:[#allocation4 + $0x20] sm:$0xf] }
 0x4fa   : > { %5515 = vst [vmem:[#allocation1 + $0x1] ss:$2 sm:$0xff] %v5506_v0  ;;  %v5562_v50 = vld [vmem:[#allocation4 + $0x21] sm:$0xf] }
 0x4fb   : > { %v5617_v29 = vld [vmem:[#allocation4 + $0x22] sm:$0xf] }
 0x4fd   : > { %5551 = vmatpush.bf16.msra.mxu1 %v6700_v31 }
 0x4fe   : > { %v5300_v52 = vld.sshfl [vmem:[#allocation1 + $0x10] sm:$0xff pattern:$0x75316420] }
 0x4ff   : > { %5351 = vst [vmem:[#allocation1 + $0x10] ss:$2 sm:$0xff] %v5341_v2  ;;  %v5303_v45 = vpack.c.bf16 %v5300_v52, %v9444_v51 }
 0x500   : > { %5353 = vst [vmem:[#allocation1 + $0x11] ss:$2 sm:$0xff] %v5342_v24 }
 0x501   : > { %v5520_v25 = vld.sshfl [vmem:[#allocation1] sm:$0xff pattern:$0x75316420]  ;;  %6539 = vmatmul.msk.bf16.vlgmr.msra.gmra.mxu3 %vm5237_vm13, %v5303_v45 }
 0x502   : > { %5568 = vst [vmem:[#allocation1] ss:$2 sm:$0xff] %v5560_v18  ;;  %5660 = vmatpush.bf16.msra.mxu3 %v6705_v43 }
 0x503   : > { %5570 = vst [vmem:[#allocation1 + $0x1] ss:$2 sm:$0xff] %v5561_v22 }
 0x506   : > { %5661 = vmatpush.bf16.msra.mxu3 %v6704_v47 }
 0x507   : > { %v5355_v51 = vld.sshfl [vmem:[#allocation1 + $0x10] sm:$0xff pattern:$0x75316420] }
 0x508   : > { %5406 = vst [vmem:[#allocation1 + $0x10] ss:$2 sm:$0xff] %v5396_v60  ;;  %v5358_v42 = vpack.c.bf16 %v5355_v51, %v9458_v63 }
 0x509   : > { %5408 = vst [vmem:[#allocation1 + $0x11] ss:$2 sm:$0xff] %v5397_v33 }
 0x50a   : > { %v5575_v61 = vld.sshfl [vmem:[#allocation1] sm:$0xff pattern:$0x75316420]  ;;  %6548 = vmatmul.msk.bf16.vlgmr.msrb.gmra.mxu1 %vm5237_vm13, %v5358_v42 }
 0x50b   : > { %5625 = vst [vmem:[#allocation1 + $0x1] ss:$2 sm:$0xff] %v5616_v4 }
 0x50c   : > { %5623 = vst [vmem:[#allocation1] ss:$2 sm:$0xff] %v5615_v44 }
 0x510   : > { %v5410_v63 = vld.sshfl [vmem:[#allocation1 + $0x10] sm:$0xff pattern:$0x75316420] }
 0x511   : > { %5461 = vst [vmem:[#allocation1 + $0x10] ss:$2 sm:$0xff] %v5451_v5  ;;  %v5413_v14 = vpack.c.bf16 %v5410_v63, %v9466_v17  ;;  %v6706_v5 = vld [vmem:[%s9611_s7] sm:$0xff] }
 0x512   : > { %5463 = vst [vmem:[#allocation1 + $0x11] ss:$2 sm:$0xff] %v5452_v57 }
 0x513   : > { %6557 = vmatmul.msk.bf16.vlgmr.msrb.gmra.mxu2 %vm5237_vm13, %v5413_v14  ;;  %v5630_v20 = vld.sshfl [vmem:[#allocation1] sm:$0xff pattern:$0x75316420]  ;;  %v6709_v14 = vld [vmem:[%s9611_s7 + $0x18] sm:$0xff] }
 0x514   : > { %5822 = vmatpush.bf16.msrb.mxu2 %v6706_v5  ;;  %5891 = vmatpush.bf16.msrb.mxu0 %v6709_v14  ;;  %v5970_v14 = vld [vmem:[#allocation5 + $0xc] sm:$0x3] }
 0x519   : > { %v5465_v7 = vld.sshfl [vmem:[#allocation1 + $0x10] sm:$0xff pattern:$0x75316420] }
 0x51a   : > { %5517 = vst [vmem:[#allocation1 + $0x10] ss:$2 sm:$0xff] %v5507_v23  ;;  %v5468_v8 = vpack.c.bf16 %v5465_v7, %v9483_v53  ;;  %v6707_v7 = vld [vmem:[%s9611_s7 + $0x8] sm:$0xff] }
 0x51b   : > { %5519 = vst [vmem:[#allocation1 + $0x11] ss:$2 sm:$0xff] %v5508_v41  ;;  %5800 = vmatpush.bf16.msrb.mxu1 %v6707_v7 }
 0x51c   : > { %6566 = vmatmul.msk.bf16.vlgmr.msrb.gmra.mxu3 %vm5237_vm13, %v5468_v8 }
 0x522   : > { %v5521_v35 = vld.sshfl [vmem:[#allocation1 + $0x10] sm:$0xff pattern:$0x75316420] }
 0x523   : > { %5572 = vst [vmem:[#allocation1 + $0x10] ss:$2 sm:$0xff] %v5562_v50  ;;  %v5524_v3 = vpack.c.bf16 %v5521_v35, %v5520_v25  ;;  %v6761_v25 = vld [vmem:[%s9610_s6] ss:$0 sm:$0xff] }
 0x524   : > { %5574 = vst [vmem:[#allocation1 + $0x11] ss:$2 sm:$0xff] %v5563_v37 }
 0x525   : > { %6575 = vmatmul.msk.bf16.vlgmr.msra.gmra.mxu1 %vm5237_vm13, %v5524_v3 }
 0x52b   : > { %v5576_v15 = vld.sshfl [vmem:[#allocation1 + $0x10] sm:$0xff pattern:$0x75316420] }
 0x52c   : > { %5627 = vst [vmem:[#allocation1 + $0x10] ss:$2 sm:$0xff] %v5617_v29  ;;  %v5579_v17 = vpack.c.bf16 %v5576_v15, %v5575_v61 }
 0x52d   : > { %5629 = vst [vmem:[#allocation1 + $0x11] ss:$2 sm:$0xff] %v5618_v54 }
 0x52e   : > { %6584 = vmatmul.msk.bf16.vlgmr.msra.gmra.mxu2 %vm5237_vm13, %v5579_v17 }
 0x534   : > { %v5631_v12 = vld.sshfl [vmem:[#allocation1 + $0x10] sm:$0xff pattern:$0x75316420] }
 0x535   : > { %v5634_v40 = vpack.c.bf16 %v5631_v12, %v5630_v20  ;;  %5763 = vst [vmem:[#allocation1] ss:$4 sm:$0xff] %v5759_v28 }
 0x537   : > { %6593 = vmatmul.msk.bf16.vlgmr.msra.gmra.mxu3 %vm5237_vm13, %v5634_v40 }
 0x572   : > { %v5279_v46 = vpop.f32.mrf.mxu2 }
 0x575   : > { %v5250_v10 = vpop.f32.mrf.mxu1 }
 0x576   : > { %v5280_v39 = vadd.f32 %v5279_v46, %v5250_v10 }
 0x57a   : > { %v5281_v30 = vpop.f32.mrf.mxu2 }
 0x57d   : > { %v5252_v11 = vpop.f32.mrf.mxu1 }
 0x57e   : > { %v5282_v27 = vadd.f32 %v5281_v30, %v5252_v11 }
 0x584   : > { %v5332_v32 = vpop.f32.mrf.mxu3 }
 0x585   : > { %v5337_v26 = vadd.f32 %v5332_v32, %v5280_v39 }
 0x587   : > { %v5387_v16 = vpop.f32.mrf.mxu1 }
 0x588   : > { %v5392_v1 = vadd.f32 %v5387_v16, %v5337_v26 }
 0x58c   : > { %v5334_v36 = vpop.f32.mrf.mxu3 }
 0x58d   : > { %v5338_v0 = vadd.f32 %v5334_v36, %v5282_v27 }
 0x58f   : > { %v5389_v55 = vpop.f32.mrf.mxu1 }
 0x590   : > { %v5393_v19 = vadd.f32 %v5389_v55, %v5338_v0 }
 0x596   : > { %v5442_v34 = vpop.f32.mrf.mxu2 }
 0x597   : > { %v5447_v53 = vadd.f32 %v5442_v34, %v5392_v1 }
 0x59e   : > { %v5444_v62 = vpop.f32.mrf.mxu2 }
 0x59f   : > { %v5497_v21 = vpop.f32.mrf.mxu3  ;;  %v5448_v6 = vadd.f32 %v5444_v62, %v5393_v19 }
 0x5a0   : > { %v5502_v38 = vadd.f32 %v5497_v21, %v5447_v53  ;;  %v6708_v21 = vld [vmem:[%s9611_s7 + $0x10] sm:$0xff] }
 0x5a1   : > { %5856 = vmatpush.bf16.msrb.mxu3 %v6708_v21 }
 0x5a2   : > { %v5553_v56 = vpop.f32.mrf.mxu1 }
 0x5a3   : > { %v5558_v13 = vadd.f32 %v5553_v56, %v5502_v38 }
 0x5a7   : > { %v5499_v48 = vpop.f32.mrf.mxu3 }
 0x5a8   : > { %v5503_v22 = vadd.f32 %v5499_v48, %v5448_v6  ;;  %v5771_v6 = vld [vmem:[#allocation5 + $0x1] sm:$0x3] }
 0x5aa   : > { %v5555_v49 = vpop.f32.mrf.mxu1 }
 0x5ab   : > { %v5559_v31 = vadd.f32 %v5555_v49, %v5503_v22  ;;  %v6711_v49 = vld [vmem:[%s9611_s7 + $0x28] sm:$0xff] }
 0x5ac   : > { %5961 = vmatpush.bf16.msra.mxu2 %v6711_v49 }
 0x5b1   : > { %v5608_v58 = vpop.f32.mrf.mxu2 }
 0x5b2   : > { %v5613_v18 = vadd.f32 %v5608_v58, %v5558_v13 }
 0x5b9   : > { %v5610_v45 = vpop.f32.mrf.mxu2 }
 0x5ba   : > { %v5663_v2 = vpop.f32.mrf.mxu3  ;;  %v5614_v61 = vadd.f32 %v5610_v45, %v5559_v31 }
 0x5bb   : > { %v5668_v52 = vadd.f32 %v5663_v2, %v5613_v18 }
 0x5bd   : > { %v5674_v24 = vadd.f32 %v6761_v25, %v5668_v52  ;;  %v5828_v52 = vld [vmem:[#allocation5 + $0x2] sm:$0x3] }
 0x5bf   : > { %v5676_v44 = vsub.f32 0.0, %v5674_v24 }
 0x5c1   : > { %v5678_v4 = vmul.f32 1.442695, %v5676_v44 }
 0x5c2   : > { %v5665_v60 = vpop.f32.mrf.mxu3 }
 0x5c3   : > { %6923 = vpow2.f32 %v5678_v4  ;;  %v5669_v51 = vadd.f32 %v5665_v60, %v5614_v61  ;;  %v6713_v61 = vld [vmem:[%s9611_s7 + $0x38] sm:$0xff] }
 0x5c4   : > { %6032 = vmatpush.bf16.msra.mxu0 %v6713_v61 }
 0x5c5   : > { %v5675_v33 = vadd.f32 %v6761_v25, %v5669_v51  ;;  %v6710_v25 = vld [vmem:[%s9611_s7 + $0x20] sm:$0xff] }
 0x5c6   : > { %5926 = vmatpush.bf16.msra.mxu1 %v6710_v25 }
 0x5c7   : > { %v5677_v42 = vsub.f32 0.0, %v5675_v33 }
 0x5c9   : > { %v6924_v59 = vpop.eup %6923  ;;  %v5680_v43 = vmul.f32 1.442695, %v5677_v42 }
 0x5ca   : > { %v5682_v47 = vadd.f32 1.0, %v6924_v59 }
 0x5cb   : > { %6925 = vpow2.f32 %v5680_v43 }
 0x5cc   : > { %6927 = vrcp.f32 %v5682_v47 }
 0x5d1   : > { %v6926_v63 = vpop.eup %6925 }
 0x5d2   : > { %v6928_v9 = vpop.eup %6927  ;;  %v5683_v57 = vadd.f32 1.0, %v6926_v63 }
 0x5d3   : > { %v5686_v41 = vmul.f32 %v6928_v9, %v5674_v24  ;;  %v6712_v24 = vld [vmem:[%s9611_s7 + $0x30] sm:$0xff] }
 0x5d4   : > { %6929 = vrcp.f32 %v5683_v57  ;;  %5997 = vmatpush.bf16.msra.mxu3 %v6712_v24 }
 0x5d5   : > { %v5690_v23 = vrot.slane %v5686_v41, 2  ;;  %v5691_v8 = vrot.slane %v5686_v41, 4  ;;  %v5692_v37 = vrot.slane %v5686_v41, 6  ;;  %v6594_v35 = vrot.slane %v5686_v41, 9 }
 0x5d7   : > { %v6595_v50 = vrot.slane %v5690_v23, 9  ;;  %v6596_v3 = vrot.slane %v5691_v8, 9  ;;  %v6597_v54 = vrot.slane %v5692_v37, 9  ;;  %v5726_v15 = vmax.f32 %v5686_v41, %v6594_v35 }
 0x5d9   : > { %v5727_v29 = vmax.f32 %v5690_v23, %v6595_v50  ;;  %v5728_v17 = vmax.f32 %v5691_v8, %v6596_v3  ;;  %v5729_v20 = vmax.f32 %v5692_v37, %v6597_v54  ;;  %v6005_v8 = vld [vmem:[#allocation5 + $0xd] sm:$0x3] }
 0x5da   : > { %v6930_v12 = vpop.eup %6929  ;;  %v6040_v3 = vld [vmem:[#allocation5 + $0xe] sm:$0x3] }
 0x5db   : > { %v5734_v40 = vmax.f32 %v5726_v15, %v5728_v17  ;;  %v5735_v10 = vmax.f32 %v5727_v29, %v5729_v20  ;;  %v5687_v46 = vmul.f32 %v6930_v12, %v5675_v33  ;;  %v6714_v33 = vld [vmem:[%s9611_s7 + $0x40] sm:$0xff] }
 0x5dd   : > { %v5747_v11 = vperm.slane %v5734_v40, 0  ;;  %v5748_v32 = vperm.slane %v5735_v10, 0  ;;  %v5693_v30 = vrot.slane %v5687_v46, 2  ;;  %v5694_v16 = vrot.slane %v5687_v46, 4 }
 0x5de   : > { %v5695_v36 = vrot.slane %v5687_v46, 6  ;;  %v6598_v34 = vrot.slane %v5687_v46, 9 }
 0x5df   : > { %v5751_v39 = vsel %vm3954_vm4, %v5748_v32, %v5747_v11  ;;  %v6599_v55 = vrot.slane %v5693_v30, 9  ;;  %v6600_v26 = vrot.slane %v5694_v16, 9 }
 0x5e0   : > { %5757 = vst.msk [vmem:[#allocation5 + $0x5] sm:$0x3] %vm5756_vm15, %v5751_v39  ;;  %v6601_v62 = vrot.slane %v5695_v36, 9  ;;  %v5730_v1 = vmax.f32 %v5687_v46, %v6598_v34 }
 0x5e1   : > { %v5731_v27 = vmax.f32 %v5693_v30, %v6599_v55  ;;  %v5732_v53 = vmax.f32 %v5694_v16, %v6600_v26 }
 0x5e2   : > { %v5733_v56 = vmax.f32 %v5695_v36, %v6601_v62 }
 0x5e3   : > { %v5736_v48 = vmax.f32 %v5730_v1, %v5732_v53 }
 0x5e4   : > { %v5737_v0 = vmax.f32 %v5731_v27, %v5733_v56 }
 0x5e5   : > { %v5749_v38 = vperm.slane %v5736_v48, 0 }
 0x5e6   : > { %v5750_v58 = vperm.slane %v5737_v0, 0 }
 0x5e7   : > { %v5760_v19 = vld [vmem:[#allocation5 + $0x4] sm:$0x3]  ;;  %v5829_v31 = vld [vmem:[#allocation5 + $0x6] sm:$0x3] }
 0x5e8   : > { %v5752_v13 = vsel %vm3954_vm4, %v5750_v58, %v5749_v38  ;;  %5765 = vst [vmem:[#allocation1 + $0x1] ss:$4 sm:$0xff] %v5760_v19  ;;  %v5772_v22 = vld [vmem:[#allocation5 + $0x5] sm:$0x3]  ;;  %v6762_v19 = vld [vmem:[%s9612_s8] ss:$0 sm:$0xff] }
 0x5e9   : > { %5758 = vst.msk [vmem:[#allocation5 + $0x9] sm:$0x3] %vm5756_vm15, %v5752_v13  ;;  %v5863_v4 = vld [vmem:[#allocation5 + $0x4] sm:$0x3]  ;;  %v5933_v5 = vld [vmem:[#allocation5 + $0x6] sm:$0x3] }
 0x5ea   : > { %v5898_v42 = vld [vmem:[#allocation5 + $0x5] sm:$0x3] }
 0x5ef   : > { %v5766_v18 = vld.sshfl [vmem:[#allocation1] sm:$0xff pattern:$0x73625140] }
 0x5f0   : > { %v5768_v2 = vpack.c.bf16 %v5766_v18, %v5766_v18  ;;  %5775 = vst [vmem:[#allocation1] ss:$4 sm:$0xff] %v5771_v6  ;;  %v5864_v28 = vld [vmem:[#allocation5 + $0x8] sm:$0x3]  ;;  %v5934_v9 = vld [vmem:[#allocation5 + $0xa] sm:$0x3] }
 0x5f1   : > { %5777 = vst [vmem:[#allocation1 + $0x1] ss:$4 sm:$0xff] %v5772_v22  ;;  %v5899_v43 = vld [vmem:[#allocation5 + $0x9] sm:$0x3] }
 0x5f2   : > { %6611 = vmatmul.msk.bf16.vlgmr.msrb.gmra.mxu2 %vm5789_vm0, %v5768_v2  ;;  %v5969_v41 = vld [vmem:[#allocation5 + $0x8] sm:$0x3]  ;;  %v6039_v54 = vld [vmem:[#allocation5 + $0xa] sm:$0x3] }
 0x5f3   : > { %v6004_v37 = vld [vmem:[#allocation5 + $0x9] sm:$0x3] }
 0x5f8   : > { %v5778_v45 = vld.sshfl [vmem:[#allocation1] sm:$0xff pattern:$0x73625140] }
 0x5f9   : > { %v5780_v44 = vpack.c.bf16 %v5778_v45, %v5778_v45  ;;  %5832 = vst [vmem:[#allocation1] ss:$4 sm:$0xff] %v5828_v52 }
 0x5fa   : > { %5834 = vst [vmem:[#allocation1 + $0x1] ss:$4 sm:$0xff] %v5829_v31 }
 0x5fb   : > { %6606 = vmatmul.msk.bf16.vlgmr.msrb.gmra.mxu1 %vm5789_vm0, %v5780_v44 }
 0x5fc   : > { %6067 = vmatpush.bf16.msrb.mxu1 %v6714_v33 }
 0x601   : > { %v5835_v60 = vld.sshfl [vmem:[#allocation1] sm:$0xff pattern:$0x73625140] }
 0x602   : > { %v5837_v51 = vpack.c.bf16 %v5835_v60, %v5835_v60  ;;  %5867 = vst [vmem:[#allocation1] ss:$4 sm:$0xff] %v5863_v4 }
 0x603   : > { %5869 = vst [vmem:[#allocation1 + $0x1] ss:$4 sm:$0xff] %v5864_v28 }
 0x604   : > { %6616 = vmatmul.msk.bf16.vlgmr.msrb.gmra.mxu3 %vm5789_vm0, %v5837_v51 }
 0x60a   : > { %v5870_v59 = vld.sshfl [vmem:[#allocation1] sm:$0xff pattern:$0x73625140] }
 0x60b   : > { %v5872_v47 = vpack.c.bf16 %v5870_v59, %v5870_v59  ;;  %5902 = vst [vmem:[#allocation1] ss:$4 sm:$0xff] %v5898_v42 }
 0x60c   : > { %5904 = vst [vmem:[#allocation1 + $0x1] ss:$4 sm:$0xff] %v5899_v43 }
 0x60d   : > { %6621 = vmatmul.msk.bf16.vlgmr.msrb.gmra.mxu0 %vm5789_vm0, %v5872_v47 }
 0x613   : > { %v5905_v63 = vld.sshfl [vmem:[#allocation1] sm:$0xff pattern:$0x73625140] }
 0x614   : > { %v5907_v57 = vpack.c.bf16 %v5905_v63, %v5905_v63  ;;  %5937 = vst [vmem:[#allocation1] ss:$4 sm:$0xff] %v5933_v5 }
 0x615   : > { %5939 = vst [vmem:[#allocation1 + $0x1] ss:$4 sm:$0xff] %v5934_v9 }
 0x616   : > { %6626 = vmatmul.msk.bf16.vlgmr.msra.gmra.mxu1 %vm5789_vm0, %v5907_v57 }
 0x61c   : > { %v5940_v7 = vld.sshfl [vmem:[#allocation1] sm:$0xff pattern:$0x73625140] }
 0x61d   : > { %v5942_v23 = vpack.c.bf16 %v5940_v7, %v5940_v7  ;;  %5973 = vst [vmem:[#allocation1] ss:$4 sm:$0xff] %v5969_v41 }
 0x61e   : > { %5975 = vst [vmem:[#allocation1 + $0x1] ss:$4 sm:$0xff] %v5970_v14 }
 0x61f   : > { %6631 = vmatmul.msk.bf16.vlgmr.msra.gmra.mxu2 %vm5789_vm0, %v5942_v23 }
 0x625   : > { %v5976_v35 = vld.sshfl [vmem:[#allocation1] sm:$0xff pattern:$0x73625140] }
 0x626   : > { %v5978_v50 = vpack.c.bf16 %v5976_v35, %v5976_v35  ;;  %6008 = vst [vmem:[#allocation1] ss:$4 sm:$0xff] %v6004_v37 }
 0x627   : > { %6010 = vst [vmem:[#allocation1 + $0x1] ss:$4 sm:$0xff] %v6005_v8 }
 0x628   : > { %6636 = vmatmul.msk.bf16.vlgmr.msra.gmra.mxu3 %vm5789_vm0, %v5978_v50 }
 0x62e   : > { %v6011_v15 = vld.sshfl [vmem:[#allocation1] sm:$0xff pattern:$0x73625140] }
 0x62f   : > { %v6013_v29 = vpack.c.bf16 %v6011_v15, %v6011_v15  ;;  %6043 = vst [vmem:[#allocation1] ss:$4 sm:$0xff] %v6039_v54 }
 0x630   : > { %6045 = vst [vmem:[#allocation1 + $0x1] ss:$4 sm:$0xff] %v6040_v3 }
 0x631   : > { %6641 = vmatmul.msk.bf16.vlgmr.msra.gmra.mxu0 %vm5789_vm0, %v6013_v29 }
 0x637   : > { %v6046_v17 = vld.sshfl [vmem:[#allocation1] sm:$0xff pattern:$0x73625140] }
 0x638   : > { %v6048_v20 = vpack.c.bf16 %v6046_v17, %v6046_v17 }
 0x63a   : > { %6646 = vmatmul.msk.bf16.vlgmr.msrb.gmra.mxu1 %vm5789_vm0, %v6048_v20 }
 0x675   : > { %v5824_v12 = vpop.f32.mrf.mxu2 }
 0x678   : > { %v5802_v40 = vpop.f32.mrf.mxu1 }
 0x679   : > { %v5825_v39 = vadd.f32 %v5824_v12, %v5802_v40 }
 0x67d   : > { %v5826_v10 = vpop.f32.mrf.mxu2 }
 0x680   : > { %v5804_v46 = vpop.f32.mrf.mxu1 }
 0x687   : > { %v5858_v11 = vpop.f32.mrf.mxu3 }
 0x688   : > { %v5862_v55 = vadd.f32 %v5858_v11, %v5825_v39 }
 0x68a   : > { %v5893_v32 = vpop.f32.mrf.mxu0 }
 0x68b   : > { %v5897_v1 = vadd.f32 %v5893_v32, %v5862_v55 }
 0x68f   : > { %v5860_v30 = vpop.f32.mrf.mxu3 }
 0x692   : > { %v5895_v16 = vpop.f32.mrf.mxu0 }
 0x693   : > { %v5928_v36 = vpop.f32.mrf.mxu1 }
 0x694   : > { %v5932_v27 = vadd.f32 %v5928_v36, %v5897_v1 }
 0x69b   : > { %v5930_v34 = vpop.f32.mrf.mxu1 }
 0x6a2   : > { %v5963_v21 = vpop.f32.mrf.mxu2 }
 0x6a3   : > { %v5967_v56 = vadd.f32 %v5963_v21, %v5932_v27 }
 0x6aa   : > { %v5965_v26 = vpop.f32.mrf.mxu2 }
 0x6ab   : > { %v5999_v62 = vpop.f32.mrf.mxu3 }
 0x6ac   : > { %v6003_v48 = vadd.f32 %v5999_v62, %v5967_v56 }
 0x6ae   : > { %v6034_v53 = vpop.f32.mrf.mxu0 }
 0x6af   : > { %v6038_v38 = vadd.f32 %v6034_v53, %v6003_v48 }
 0x6b3   : > { %v6001_v0 = vpop.f32.mrf.mxu3 }
 0x6b6   : > { %v6036_v58 = vpop.f32.mrf.mxu0 }
 0x6b7   : > { %v6069_v13 = vpop.f32.mrf.mxu1 }
 0x6b8   : > { %v6073_v6 = vadd.f32 %v6069_v13, %v6038_v38 }
 0x6ba   : > { %v6078_v18 = vadd.f32 %v6762_v19, %v6073_v6 }
 0x6bc   : > { %v6079_v25 = vsub.f32 0.0, %v6078_v18 }
 0x6be   : > { %v6080_v2 = vmul.f32 1.442695, %v6079_v25 }
 0x6bf   : > { %v6071_v22 = vpop.f32.mrf.mxu1 }
 0x6c0   : > { %6931 = vpow2.f32 %v6080_v2 }
 0x6c6   : > { %v6932_v52 = vpop.eup %6931 }
 0x6c7   : > { %v6082_v49 = vadd.f32 1.0, %v6932_v52 }
 0x6c9   : > { %6933 = vrcp.f32 %v6082_v49 }
 0x6cf   : > { %v6934_v24 = vpop.eup %6933 }
 0x6d0   : > { %v6084_v45 = vmul.f32 %v6934_v24, %v6078_v18 }
 0x6d2   : > { %v6086_v31 = vrot.slane %v6084_v45, 2  ;;  %v6647_v44 = vrot.slane %v6084_v45, 9 }
 0x6d4   : > { %v6648_v61 = vrot.slane %v6086_v31, 9  ;;  %v6094_v4 = vmax.f32 %v6084_v45, %v6647_v44 }
 0x6d6   : > { %v6095_v60 = vmax.f32 %v6086_v31, %v6648_v61 }
 0x6d8   : > { %v6096_v28 = vmax.f32 %v6094_v4, %v6095_v60 }
 0x6da   : > { %6098 = vst.msk [vmem:[%s324_s22] sm:$0x1] %vm6097_vm1, %v6096_v28 }
 0x6db   : > { %6964 = shalt.err (!%p6961_p3)
}
 0x6dc   : > { %6715 = dma.vmem_to_hbm [thread:$0]  (%p7091_p5), %s6111_s23, 16, %s6113_s24, %s6100_s25  }
 0x6dd PF: > { %p6721_p4 = scmp.ge.s32.totalorder %s6999_s12, 2  ;;  %s6124_s14 = sand.u32 1, %s6987_s30  }
 0x6de   : > { %s6125_s21 = scalar_lea.sflag [#allocation7], %s6124_s14 }
 0x6df   : > { %p6718_p7 = pnand %p6721_p4, %p7095_p6 }
 0x6e1   : > { %p6719_p8 = pneg %p6718_p7 }
 0x6e3   : > { %6982 = dma.done.wait (%p6719_p8), %s6125_s21, 16  }
 0x6e4   : > { %6984 = vsyncadd (%p6719_p8), %s6125_s21, 4294967280  ;;  %p19_p9 = scmp.ge.s32.totalorder %s7078_s15, 4   ;;  %s9890_s30 = smov %s6991_s10 }
 0x6e5   : > { %s9891_s10 = smov %s6995_s11  ;;  %s9892_s11 = smov %s7089_s18 }
 0x6e6   : > { %s9893_s12 = smov %s7078_s15  ;;  %21 = sbr.rel (!%p19_p9) target bundleno = 3 (0x3), region = 135 }
 0x6eb   :  { %6130 = vsyncpa [#allocation7], 1 }
 0x6ec   :  { %6132 = vsyncpa [#allocation7 + $0x1], 1 }

</bundles_post_ra>
